<compile_context>
chip_gen: v6e
topology: v6e:2x2x1
jax: 0.10.0
libtpu: 0.0.40
codegen_flags: <defaults>
</compile_context>

<pallas_src>
import math

import jax
import jax.numpy as jnp
from jax import lax
from jax.experimental import pallas as pl
from jax.experimental.pallas import tpu as pltpu


# ----------------------------- kernel helpers ------------------------------ #
def _mm(a, b):
    # a: (m, k), b: (k, n) -- weights are pre-transposed to [in, out] on host,
    # so no in-kernel transpose is ever needed.
    return lax.dot_general(
        a, b,
        dimension_numbers=(((1,), (0,)), ((), ())),
        preferred_element_type=jnp.float32,
        precision=lax.Precision.HIGHEST,   # f32-accurate MXU passes (see header)
    )


def _layer_norm(x, g, b, eps=1e-5):
    mu = jnp.mean(x, axis=-1, keepdims=True)
    var = jnp.mean((x - mu) ** 2, axis=-1, keepdims=True)
    return (x - mu) * lax.rsqrt(var + eps) * g + b


def make_kernel(B, L, E, Dp, H, Ep, M, NH, AL):
    dh = H // NH
    inv_sqrt_dh = 1.0 / math.sqrt(dh)

    def kernel(tok_ref, pos_ref, pool_ref, expand_ref, rep_ref,
               w_it_ref, w_ip_ref, b_i_ref, s0_ref,
               wq_ref, bq_ref, wv_ref, bv_ref, wf_ref, bf_ref,
               ln1g_ref, ln1b_ref, w1_ref, b1_ref, w2_ref, b2_ref,
               ln2g_ref, ln2b_ref, fng_ref, fnb_ref, out_ref):
        pool = pool_ref[...]       # (H, NH)  0/1 head-pooling matrix
        expand = expand_ref[...]   # (NH, H)  0/1 head-expand matrix
        rep = rep_ref[...]         # (B*L, B) 0/1 row-replication matrix

        # init_dense(concat([tok, pos])) == tok @ W_tok + pos @ W_pos + b,
        # computed once for all B*L rows.
        xt = _mm(tok_ref[...], w_it_ref[...])                    # (B*L, H)
        xp = _mm(pos_ref[...], w_ip_ref[...])                    # (L, H)
        x = (xt.reshape(B, L, H) + xp + b_i_ref[...]).reshape(B * L, H)

        stream = jnp.broadcast_to(s0_ref[...], (B, Ep))          # (B, Ep)

        for l in range(AL):   # AL is small & static -> unrolled
            # attention: query from stream, value from tokens ("key" is unused)
            # fold the 1/sqrt(dh) scaling into q (B x H elements only)
            q = (_mm(stream, wq_ref[l]) + bq_ref[l]) * inv_sqrt_dh   # (B, H)
            v = _mm(x, wv_ref[l]) + bv_ref[l]                        # (B*L, H)

            # all-head scores: broadcast q over the L token rows, elementwise
            # multiply, then pool groups of dh lanes per head.
            q_rows = _mm(rep, q)                                 # (B*L, H)
            scores = _mm(q_rows * v, pool).reshape(B, L, NH)     # (B, L, NH)

            # TODO(synk): att_dropout omitted (inference / eval mode identity)
            # softmax over tokens (axis=1)
            m = jnp.max(scores, axis=1, keepdims=True)           # (B, 1, NH)
            e = jnp.exp(scores - m)
            den = jnp.sum(e, axis=1, keepdims=True)              # (B, 1, NH)
            r = pl.reciprocal(den, approx=True)                  # EUP slot
            r = r * (2.0 - den * r)                              # Newton refine
            att = (e * r).reshape(B * L, NH)                     # (B*L, NH)

            # att @ v for all heads at once: expand per-head weights back to
            # H lanes, multiply, reduce over the L token rows.
            att_exp = _mm(att, expand)                           # (B*L, H)
            value_sums = jnp.sum((att_exp * v).reshape(B, L, H), axis=1)  # (B, H)

            att_out = _mm(value_sums, wf_ref[l]) + bf_ref[l]     # (B, H)
            post_att = _layer_norm(att_out, ln1g_ref[l], ln1b_ref[l])

            h1 = jnp.maximum(_mm(post_att, w1_ref[l]) + b1_ref[l], 0.0)  # (B, M)
            ff = _mm(h1, w2_ref[l]) + b2_ref[l]                  # (B, Ep)
            post_ff = _layer_norm(ff, ln2g_ref[l], ln2b_ref[l])

            stream = stream + post_ff                            # residual update

        # single full-block store
        out_ref[...] = _layer_norm(stream, fng_ref[...], fnb_ref[...])

    return kernel


# ------------------------------ wrapper ------------------------------------ #
def syntax_builder_forward(params, input_tokens, pos_enc, *, NH, AL):
    B, L, E = input_tokens.shape
    Dp = pos_enc.shape[1]
    H = params["w_init_tok"].shape[0]
    Ep = params["s0"].shape[1]
    M = params["w1"].shape[1]
    dh = H // NH

    # Host-side (XLA) preprocessing: flatten tokens, pre-transpose all torch
    # [out, in] weights to [in, out], build constant 0/1 helper matrices.
    tok_flat = input_tokens.reshape(B * L, E)
    T = lambda w: jnp.swapaxes(w, -1, -2)
    pool = (jnp.arange(H)[:, None] // dh == jnp.arange(NH)[None, :]).astype(jnp.float32)
    expand = pool.T
    rep = (jnp.arange(B * L)[:, None] // L == jnp.arange(B)[None, :]).astype(jnp.float32)

    args = (
        tok_flat, pos_enc, pool, expand, rep,
        T(params["w_init_tok"]), T(params["w_init_pos"]), params["b_init"], params["s0"],
        T(params["wq"]), params["bq"], T(params["wv"]), params["bv"],
        T(params["wf"]), params["bf"], params["ln1g"], params["ln1b"],
        T(params["w1"]), params["b1"], T(params["w2"]), params["b2"],
        params["ln2g"], params["ln2b"], params["fng"], params["fnb"],
    )
    kernel = make_kernel(B, L, E, Dp, H, Ep, M, NH, AL)
    return pl.pallas_call(
        kernel,
        out_shape=jax.ShapeDtypeStruct((B, Ep), jnp.float32),
        in_specs=[pl.BlockSpec(memory_space=pltpu.MemorySpace.VMEM)] * len(args),
        out_specs=pl.BlockSpec(memory_space=pltpu.MemorySpace.VMEM),
        compiler_params=pltpu.CompilerParams(vmem_limit_bytes=32 * 1024 * 1024),
    )(*args)


# ----------------------- deterministic parameter init ---------------------- #
def init_params(key, E, Dp, H, Ep, M, NH, AL):
    def lin(k, out_f, in_f):
        kw, kb = jax.random.split(k)
        bound = 1.0 / math.sqrt(in_f)
        w = jax.random.uniform(kw, (out_f, in_f), jnp.float32, -bound, bound)
        b = jax.random.uniform(kb, (1, out_f), jnp.float32, -bound, bound)
        return w, b

    keys = jax.random.split(key, 2 + AL * 5)
    ki = iter(keys)

    w_init_full, b_init = lin(next(ki), H, E + Dp)
    s0 = jax.random.normal(next(ki), (1, Ep), jnp.float32)  # init_stream ~ randn

    wq, bq, wv, bv, wf, bf, w1, b1, w2, b2 = ([] for _ in range(10))
    for _ in range(AL):
        w, b = lin(next(ki), H, Ep); wq.append(w); bq.append(b)
        w, b = lin(next(ki), H, H);  wv.append(w); bv.append(b)
        w, b = lin(next(ki), H, H);  wf.append(w); bf.append(b)
        w, b = lin(next(ki), M, H);  w1.append(w); b1.append(b)
        w, b = lin(next(ki), Ep, M); w2.append(w); b2.append(b)

    stack = lambda xs: jnp.stack(xs, axis=0)
    return {
        "w_init_tok": w_init_full[:, :E], "w_init_pos": w_init_full[:, E:],
        "b_init": b_init, "s0": s0,
        "wq": stack(wq), "bq": stack(bq),
        "wv": stack(wv), "bv": stack(bv),
        "wf": stack(wf), "bf": stack(bf),
        "ln1g": jnp.ones((AL, 1, H), jnp.float32),
        "ln1b": jnp.zeros((AL, 1, H), jnp.float32),
        "w1": stack(w1), "b1": stack(b1),
        "w2": stack(w2), "b2": stack(b2),
        "ln2g": jnp.ones((AL, 1, Ep), jnp.float32),
        "ln2b": jnp.zeros((AL, 1, Ep), jnp.float32),
        "fng": jnp.ones((1, Ep), jnp.float32),
        "fnb": jnp.zeros((1, Ep), jnp.float32),
    }


# --------------------------- pure-JAX reference ----------------------------- #
def _ln_ref(x, g, b, eps=1e-5):
    mu = jnp.mean(x, axis=-1, keepdims=True)
    var = jnp.mean((x - mu) ** 2, axis=-1, keepdims=True)
    return (x - mu) / jnp.sqrt(var + eps) * g + b


def reference_forward(p, input_tokens, pos_enc, NH):
    B, L, E = input_tokens.shape
    pos_t = jnp.tile(pos_enc[None], (B, 1, 1))
    xcat = jnp.concatenate([input_tokens, pos_t], axis=2)
    w_init = jnp.concatenate([p["w_init_tok"], p["w_init_pos"]], axis=1)
    x = jnp.einsum("ble,he->blh", xcat, w_init) + p["b_init"][0]
    stream = jnp.tile(p["s0"], (B, 1))
    AL, H = p["wq"].shape[0], p["wq"].shape[1]
    dh = H // NH
    for l in range(AL):
        q = stream @ p["wq"][l].T + p["bq"][l][0]
        v = jnp.einsum("blh,oh->blo", x, p["wv"][l]) + p["bv"][l][0]
        qh = q.reshape(B, 1, NH, dh).transpose(0, 2, 1, 3)
        vh = v.reshape(B, L, NH, dh).transpose(0, 2, 1, 3)
        att = jnp.einsum("bnqd,bnkd->bnqk", qh, vh) / math.sqrt(dh)
        att = jax.nn.softmax(att, axis=-1)
        vs = jnp.einsum("bnqk,bnkd->bnqd", att, vh).transpose(0, 2, 1, 3).reshape(B, H)
        att_out = vs @ p["wf"][l].T + p["bf"][l][0]
        post_att = _ln_ref(att_out, p["ln1g"][l][0], p["ln1b"][l][0])
        h1 = jax.nn.relu(post_att @ p["w1"][l].T + p["b1"][l][0])
        ff = h1 @ p["w2"][l].T + p["b2"][l][0]
        post_ff = _ln_ref(ff, p["ln2g"][l][0], p["ln2b"][l][0])
        stream = stream + post_ff
    return _ln_ref(stream, p["fng"][0], p["fnb"][0])


if __name__ == "__main__":
    # small shapes consistent with the module
    B, L = 2, 8            # batch, number of tokens L'
    E, Dp = 16, 4          # input_token_dim, pos_enc_dim
    H, Ep, M = 32, 32, 48  # att_hidden_dim, stream_dim, att_mlp_hidden_dim
    NH, AL = 4, 2          # heads, attention layers

    key = jax.random.PRNGKey(0)
    k_in, k_pos, k_par = jax.random.split(key, 3)
    input_tokens = jax.random.normal(k_in, (B, L, E), jnp.float32)
    pos_enc = jax.random.normal(k_pos, (L, Dp), jnp.float32)
    params = init_params(k_par, E, Dp, H, Ep, M, NH, AL)

    out = syntax_builder_forward(params, input_tokens, pos_enc, NH=NH, AL=AL)
    out = jax.block_until_ready(out)
    assert out.shape == (B, Ep)

    with jax.default_matmul_precision("highest"):
        ref = jax.block_until_ready(reference_forward(params, input_tokens, pos_enc, NH))
    assert jnp.allclose(out, ref, atol=1e-4, rtol=1e-4), (out, ref)

    print("KERNEL_OK")
</pallas_src>

<mosaic_0001>
module attributes {stable_mosaic.version = 11 : i64} {
  func.func @kernel(%arg0: memref<16x16xf32, #tpu.memory_space<vmem>>, %arg1: memref<8x4xf32, #tpu.memory_space<vmem>>, %arg2: memref<32x4xf32, #tpu.memory_space<vmem>>, %arg3: memref<4x32xf32, #tpu.memory_space<vmem>>, %arg4: memref<16x2xf32, #tpu.memory_space<vmem>>, %arg5: memref<16x32xf32, #tpu.memory_space<vmem>>, %arg6: memref<4x32xf32, #tpu.memory_space<vmem>>, %arg7: memref<1x32xf32, #tpu.memory_space<vmem>>, %arg8: memref<1x32xf32, #tpu.memory_space<vmem>>, %arg9: memref<2x32x32xf32, #tpu.memory_space<vmem>>, %arg10: memref<2x1x32xf32, #tpu.memory_space<vmem>>, %arg11: memref<2x32x32xf32, #tpu.memory_space<vmem>>, %arg12: memref<2x1x32xf32, #tpu.memory_space<vmem>>, %arg13: memref<2x32x32xf32, #tpu.memory_space<vmem>>, %arg14: memref<2x1x32xf32, #tpu.memory_space<vmem>>, %arg15: memref<2x1x32xf32, #tpu.memory_space<vmem>>, %arg16: memref<2x1x32xf32, #tpu.memory_space<vmem>>, %arg17: memref<2x32x48xf32, #tpu.memory_space<vmem>>, %arg18: memref<2x1x48xf32, #tpu.memory_space<vmem>>, %arg19: memref<2x48x32xf32, #tpu.memory_space<vmem>>, %arg20: memref<2x1x32xf32, #tpu.memory_space<vmem>>, %arg21: memref<2x1x32xf32, #tpu.memory_space<vmem>>, %arg22: memref<2x1x32xf32, #tpu.memory_space<vmem>>, %arg23: memref<1x32xf32, #tpu.memory_space<vmem>>, %arg24: memref<1x32xf32, #tpu.memory_space<vmem>>, %arg25: memref<2x32xf32, #tpu.memory_space<vmem>>) attributes {dimension_semantics = [], scalar_prefetch = 0 : i64, scratch_operands = 0 : i64, tpu.core_type = #tpu.core_type<tc>} {
    %c0 = arith.constant 0 : index
    %c0_0 = arith.constant 0 : index
    %0 = vector.load %arg2[%c0, %c0_0] : memref<32x4xf32, #tpu.memory_space<vmem>>, vector<32x4xf32>
    %c0_1 = arith.constant 0 : index
    %c0_2 = arith.constant 0 : index
    %1 = vector.load %arg3[%c0_1, %c0_2] : memref<4x32xf32, #tpu.memory_space<vmem>>, vector<4x32xf32>
    %c0_3 = arith.constant 0 : index
    %c0_4 = arith.constant 0 : index
    %2 = vector.load %arg4[%c0_3, %c0_4] : memref<16x2xf32, #tpu.memory_space<vmem>>, vector<16x2xf32>
    %c0_5 = arith.constant 0 : index
    %c0_6 = arith.constant 0 : index
    %3 = vector.load %arg0[%c0_5, %c0_6] : memref<16x16xf32, #tpu.memory_space<vmem>>, vector<16x16xf32>
    %c0_7 = arith.constant 0 : index
    %c0_8 = arith.constant 0 : index
    %4 = vector.load %arg5[%c0_7, %c0_8] : memref<16x32xf32, #tpu.memory_space<vmem>>, vector<16x32xf32>
    %cst = arith.constant dense<0.000000e+00> : vector<16x32xf32>
    %5 = tpu.matmul %3, %4, %cst {dimension_numbers = #tpu.dot_dimension_numbers<[1], [0], [0], [1], [0, 0, 1, 1], [], []>, precision = #tpu.contract_precision<fp32>} : vector<16x16xf32>, vector<16x32xf32>, vector<16x32xf32> -> vector<16x32xf32>
    %c0_9 = arith.constant 0 : index
    %c0_10 = arith.constant 0 : index
    %6 = vector.load %arg1[%c0_9, %c0_10] : memref<8x4xf32, #tpu.memory_space<vmem>>, vector<8x4xf32>
    %c0_11 = arith.constant 0 : index
    %c0_12 = arith.constant 0 : index
    %7 = vector.load %arg6[%c0_11, %c0_12] : memref<4x32xf32, #tpu.memory_space<vmem>>, vector<4x32xf32>
    %cst_13 = arith.constant dense<0.000000e+00> : vector<8x32xf32>
    %8 = tpu.matmul %6, %7, %cst_13 {dimension_numbers = #tpu.dot_dimension_numbers<[1], [0], [0], [1], [0, 0, 1, 1], [], []>, precision = #tpu.contract_precision<fp32>} : vector<8x4xf32>, vector<4x32xf32>, vector<8x32xf32> -> vector<8x32xf32>
    %9 = vector.shape_cast %5 : vector<16x32xf32> to vector<2x8x32xf32>
    %10 = vector.shape_cast %8 : vector<8x32xf32> to vector<1x8x32xf32>
    %11 = vector.broadcast %10 : vector<1x8x32xf32> to vector<2x8x32xf32>
    %12 = arith.addf %9, %11 : vector<2x8x32xf32>
    %c0_14 = arith.constant 0 : index
    %c0_15 = arith.constant 0 : index
    %13 = vector.load %arg7[%c0_14, %c0_15] : memref<1x32xf32, #tpu.memory_space<vmem>>, vector<1x32xf32>
    %14 = vector.shape_cast %13 : vector<1x32xf32> to vector<1x1x32xf32>
    %15 = vector.broadcast %14 : vector<1x1x32xf32> to vector<2x8x32xf32>
    %16 = arith.addf %12, %15 : vector<2x8x32xf32>
    %17 = vector.shape_cast %16 : vector<2x8x32xf32> to vector<16x32xf32>
    %c0_16 = arith.constant 0 : index
    %c0_17 = arith.constant 0 : index
    %18 = vector.load %arg8[%c0_16, %c0_17] : memref<1x32xf32, #tpu.memory_space<vmem>>, vector<1x32xf32>
    %19 = vector.shape_cast %18 : vector<1x32xf32> to vector<1x32xf32>
    %20 = vector.broadcast %19 : vector<1x32xf32> to vector<2x32xf32>
    %c0_18 = arith.constant 0 : index
    %c0_19 = arith.constant 0 : index
    %c0_20 = arith.constant 0 : index
    %21 = vector.load %arg9[%c0_18, %c0_19, %c0_20] : memref<2x32x32xf32, #tpu.memory_space<vmem>>, vector<1x32x32xf32>
    %22 = vector.shape_cast %21 : vector<1x32x32xf32> to vector<32x32xf32>
    %cst_21 = arith.constant dense<0.000000e+00> : vector<2x32xf32>
    %23 = tpu.matmul %20, %22, %cst_21 {dimension_numbers = #tpu.dot_dimension_numbers<[1], [0], [0], [1], [0, 0, 1, 1], [], []>, precision = #tpu.contract_precision<fp32>} : vector<2x32xf32>, vector<32x32xf32>, vector<2x32xf32> -> vector<2x32xf32>
    %c0_22 = arith.constant 0 : index
    %c0_23 = arith.constant 0 : index
    %c0_24 = arith.constant 0 : index
    %24 = vector.load %arg10[%c0_22, %c0_23, %c0_24] : memref<2x1x32xf32, #tpu.memory_space<vmem>>, vector<1x1x32xf32>
    %25 = vector.shape_cast %24 : vector<1x1x32xf32> to vector<1x32xf32>
    %26 = vector.broadcast %25 : vector<1x32xf32> to vector<2x32xf32>
    %27 = arith.addf %23, %26 : vector<2x32xf32>
    %cst_25 = arith.constant 0.353553385 : f32
    %28 = vector.broadcast %cst_25 : f32 to vector<2x32xf32>
    %29 = arith.mulf %27, %28 : vector<2x32xf32>
    %c0_26 = arith.constant 0 : index
    %c0_27 = arith.constant 0 : index
    %c0_28 = arith.constant 0 : index
    %30 = vector.load %arg11[%c0_26, %c0_27, %c0_28] : memref<2x32x32xf32, #tpu.memory_space<vmem>>, vector<1x32x32xf32>
    %31 = vector.shape_cast %30 : vector<1x32x32xf32> to vector<32x32xf32>
    %cst_29 = arith.constant dense<0.000000e+00> : vector<16x32xf32>
    %32 = tpu.matmul %17, %31, %cst_29 {dimension_numbers = #tpu.dot_dimension_numbers<[1], [0], [0], [1], [0, 0, 1, 1], [], []>, precision = #tpu.contract_precision<fp32>} : vector<16x32xf32>, vector<32x32xf32>, vector<16x32xf32> -> vector<16x32xf32>
    %c0_30 = arith.constant 0 : index
    %c0_31 = arith.constant 0 : index
    %c0_32 = arith.constant 0 : index
    %33 = vector.load %arg12[%c0_30, %c0_31, %c0_32] : memref<2x1x32xf32, #tpu.memory_space<vmem>>, vector<1x1x32xf32>
    %34 = vector.shape_cast %33 : vector<1x1x32xf32> to vector<1x32xf32>
    %35 = vector.broadcast %34 : vector<1x32xf32> to vector<16x32xf32>
    %36 = arith.addf %32, %35 : vector<16x32xf32>
    %cst_33 = arith.constant dense<0.000000e+00> : vector<16x32xf32>
    %37 = tpu.matmul %2, %29, %cst_33 {dimension_numbers = #tpu.dot_dimension_numbers<[1], [0], [0], [1], [0, 0, 1, 1], [], []>, precision = #tpu.contract_precision<fp32>} : vector<16x2xf32>, vector<2x32xf32>, vector<16x32xf32> -> vector<16x32xf32>
    %38 = arith.mulf %37, %36 : vector<16x32xf32>
    %cst_34 = arith.constant dense<0.000000e+00> : vector<16x4xf32>
    %39 = tpu.matmul %38, %0, %cst_34 {dimension_numbers = #tpu.dot_dimension_numbers<[1], [0], [0], [1], [0, 0, 1, 1], [], []>, precision = #tpu.contract_precision<fp32>} : vector<16x32xf32>, vector<32x4xf32>, vector<16x4xf32> -> vector<16x4xf32>
    %40 = vector.shape_cast %39 : vector<16x4xf32> to vector<2x8x4xf32>
    %cst_35 = arith.constant dense<0xFF800000> : vector<2x4xf32>
    %41 = vector.multi_reduction <maximumf>, %40, %cst_35 [1] : vector<2x8x4xf32> to vector<2x4xf32>
    %42 = vector.shape_cast %41 : vector<2x4xf32> to vector<2x1x4xf32>
    %43 = vector.broadcast %42 : vector<2x1x4xf32> to vector<2x8x4xf32>
    %44 = arith.subf %40, %43 : vector<2x8x4xf32>
    %45 = math.exp %44 : vector<2x8x4xf32>
    %cst_36 = arith.constant dense<0.000000e+00> : vector<2x4xf32>
    %46 = vector.multi_reduction <add>, %45, %cst_36 [1] : vector<2x8x4xf32> to vector<2x4xf32>
    %47 = vector.shape_cast %46 : vector<2x4xf32> to vector<2x1x4xf32>
    %48 = tpu.reciprocal %47 {approx = true} : vector<2x1x4xf32> -> vector<2x1x4xf32>
    %49 = arith.mulf %47, %48 : vector<2x1x4xf32>
    %cst_37 = arith.constant 2.000000e+00 : f32
    %50 = vector.broadcast %cst_37 : f32 to vector<2x1x4xf32>
    %51 = arith.subf %50, %49 : vector<2x1x4xf32>
    %52 = arith.mulf %48, %51 : vector<2x1x4xf32>
    %53 = vector.broadcast %52 : vector<2x1x4xf32> to vector<2x8x4xf32>
    %54 = arith.mulf %45, %53 : vector<2x8x4xf32>
    %55 = vector.shape_cast %54 : vector<2x8x4xf32> to vector<16x4xf32>
    %cst_38 = arith.constant dense<0.000000e+00> : vector<16x32xf32>
    %56 = tpu.matmul %55, %1, %cst_38 {dimension_numbers = #tpu.dot_dimension_numbers<[1], [0], [0], [1], [0, 0, 1, 1], [], []>, precision = #tpu.contract_precision<fp32>} : vector<16x4xf32>, vector<4x32xf32>, vector<16x32xf32> -> vector<16x32xf32>
    %57 = arith.mulf %56, %36 : vector<16x32xf32>
    %58 = vector.shape_cast %57 : vector<16x32xf32> to vector<2x8x32xf32>
    %cst_39 = arith.constant dense<0.000000e+00> : vector<2x32xf32>
    %59 = vector.multi_reduction <add>, %58, %cst_39 [1] : vector<2x8x32xf32> to vector<2x32xf32>
    %c0_40 = arith.constant 0 : index
    %c0_41 = arith.constant 0 : index
    %c0_42 = arith.constant 0 : index
    %60 = vector.load %arg13[%c0_40, %c0_41, %c0_42] : memref<2x32x32xf32, #tpu.memory_space<vmem>>, vector<1x32x32xf32>
    %61 = vector.shape_cast %60 : vector<1x32x32xf32> to vector<32x32xf32>
    %cst_43 = arith.constant dense<0.000000e+00> : vector<2x32xf32>
    %62 = tpu.matmul %59, %61, %cst_43 {dimension_numbers = #tpu.dot_dimension_numbers<[1], [0], [0], [1], [0, 0, 1, 1], [], []>, precision = #tpu.contract_precision<fp32>} : vector<2x32xf32>, vector<32x32xf32>, vector<2x32xf32> -> vector<2x32xf32>
    %c0_44 = arith.constant 0 : index
    %c0_45 = arith.constant 0 : index
    %c0_46 = arith.constant 0 : index
    %63 = vector.load %arg14[%c0_44, %c0_45, %c0_46] : memref<2x1x32xf32, #tpu.memory_space<vmem>>, vector<1x1x32xf32>
    %64 = vector.shape_cast %63 : vector<1x1x32xf32> to vector<1x32xf32>
    %65 = vector.broadcast %64 : vector<1x32xf32> to vector<2x32xf32>
    %66 = arith.addf %62, %65 : vector<2x32xf32>
    %c0_47 = arith.constant 0 : index
    %c0_48 = arith.constant 0 : index
    %c0_49 = arith.constant 0 : index
    %67 = vector.load %arg15[%c0_47, %c0_48, %c0_49] : memref<2x1x32xf32, #tpu.memory_space<vmem>>, vector<1x1x32xf32>
    %68 = vector.shape_cast %67 : vector<1x1x32xf32> to vector<1x32xf32>
    %c0_50 = arith.constant 0 : index
    %c0_51 = arith.constant 0 : index
    %c0_52 = arith.constant 0 : index
    %69 = vector.load %arg16[%c0_50, %c0_51, %c0_52] : memref<2x1x32xf32, #tpu.memory_space<vmem>>, vector<1x1x32xf32>
    %70 = vector.shape_cast %69 : vector<1x1x32xf32> to vector<1x32xf32>
    %cst_53 = arith.constant dense<0.000000e+00> : vector<2xf32>
    %71 = vector.multi_reduction <add>, %66, %cst_53 [1] : vector<2x32xf32> to vector<2xf32>
    %72 = vector.shape_cast %71 : vector<2xf32> to vector<2x1xf32>
    %cst_54 = arith.constant 3.200000e+01 : f32
    %73 = vector.broadcast %cst_54 : f32 to vector<2x1xf32>
    %74 = arith.divf %72, %73 : vector<2x1xf32>
    %75 = vector.broadcast %74 : vector<2x1xf32> to vector<2x32xf32>
    %76 = arith.subf %66, %75 : vector<2x32xf32>
    %77 = arith.mulf %76, %76 : vector<2x32xf32>
    %cst_55 = arith.constant dense<0.000000e+00> : vector<2xf32>
    %78 = vector.multi_reduction <add>, %77, %cst_55 [1] : vector<2x32xf32> to vector<2xf32>
    %79 = vector.shape_cast %78 : vector<2xf32> to vector<2x1xf32>
    %cst_56 = arith.constant 3.200000e+01 : f32
    %80 = vector.broadcast %cst_56 : f32 to vector<2x1xf32>
    %81 = arith.divf %79, %80 : vector<2x1xf32>
    %82 = vector.broadcast %74 : vector<2x1xf32> to vector<2x32xf32>
    %83 = arith.subf %66, %82 : vector<2x32xf32>
    %cst_57 = arith.constant 9.99999974E-6 : f32
    %84 = vector.broadcast %cst_57 : f32 to vector<2x1xf32>
    %85 = arith.addf %81, %84 : vector<2x1xf32>
    %86 = math.rsqrt %85 : vector<2x1xf32>
    %87 = vector.broadcast %86 : vector<2x1xf32> to vector<2x32xf32>
    %88 = arith.mulf %83, %87 : vector<2x32xf32>
    %89 = vector.broadcast %68 : vector<1x32xf32> to vector<2x32xf32>
    %90 = arith.mulf %88, %89 : vector<2x32xf32>
    %91 = vector.broadcast %70 : vector<1x32xf32> to vector<2x32xf32>
    %92 = arith.addf %90, %91 : vector<2x32xf32>
    %c0_58 = arith.constant 0 : index
    %c0_59 = arith.constant 0 : index
    %c0_60 = arith.constant 0 : index
    %93 = vector.load %arg17[%c0_58, %c0_59, %c0_60] : memref<2x32x48xf32, #tpu.memory_space<vmem>>, vector<1x32x48xf32>
    %94 = vector.shape_cast %93 : vector<1x32x48xf32> to vector<32x48xf32>
    %cst_61 = arith.constant dense<0.000000e+00> : vector<2x48xf32>
    %95 = tpu.matmul %92, %94, %cst_61 {dimension_numbers = #tpu.dot_dimension_numbers<[1], [0], [0], [1], [0, 0, 1, 1], [], []>, precision = #tpu.contract_precision<fp32>} : vector<2x32xf32>, vector<32x48xf32>, vector<2x48xf32> -> vector<2x48xf32>
    %c0_62 = arith.constant 0 : index
    %c0_63 = arith.constant 0 : index
    %c0_64 = arith.constant 0 : index
    %96 = vector.load %arg18[%c0_62, %c0_63, %c0_64] : memref<2x1x48xf32, #tpu.memory_space<vmem>>, vector<1x1x48xf32>
    %97 = vector.shape_cast %96 : vector<1x1x48xf32> to vector<1x48xf32>
    %98 = vector.broadcast %97 : vector<1x48xf32> to vector<2x48xf32>
    %99 = arith.addf %95, %98 : vector<2x48xf32>
    %cst_65 = arith.constant 0.000000e+00 : f32
    %100 = vector.broadcast %cst_65 : f32 to vector<2x48xf32>
    %101 = arith.maximumf %99, %100 : vector<2x48xf32>
    %c0_66 = arith.constant 0 : index
    %c0_67 = arith.constant 0 : index
    %c0_68 = arith.constant 0 : index
    %102 = vector.load %arg19[%c0_66, %c0_67, %c0_68] : memref<2x48x32xf32, #tpu.memory_space<vmem>>, vector<1x48x32xf32>
    %103 = vector.shape_cast %102 : vector<1x48x32xf32> to vector<48x32xf32>
    %cst_69 = arith.constant dense<0.000000e+00> : vector<2x32xf32>
    %104 = tpu.matmul %101, %103, %cst_69 {dimension_numbers = #tpu.dot_dimension_numbers<[1], [0], [0], [1], [0, 0, 1, 1], [], []>, precision = #tpu.contract_precision<fp32>} : vector<2x48xf32>, vector<48x32xf32>, vector<2x32xf32> -> vector<2x32xf32>
    %c0_70 = arith.constant 0 : index
    %c0_71 = arith.constant 0 : index
    %c0_72 = arith.constant 0 : index
    %105 = vector.load %arg20[%c0_70, %c0_71, %c0_72] : memref<2x1x32xf32, #tpu.memory_space<vmem>>, vector<1x1x32xf32>
    %106 = vector.shape_cast %105 : vector<1x1x32xf32> to vector<1x32xf32>
    %107 = vector.broadcast %106 : vector<1x32xf32> to vector<2x32xf32>
    %108 = arith.addf %104, %107 : vector<2x32xf32>
    %c0_73 = arith.constant 0 : index
    %c0_74 = arith.constant 0 : index
    %c0_75 = arith.constant 0 : index
    %109 = vector.load %arg21[%c0_73, %c0_74, %c0_75] : memref<2x1x32xf32, #tpu.memory_space<vmem>>, vector<1x1x32xf32>
    %110 = vector.shape_cast %109 : vector<1x1x32xf32> to vector<1x32xf32>
    %c0_76 = arith.constant 0 : index
    %c0_77 = arith.constant 0 : index
    %c0_78 = arith.constant 0 : index
    %111 = vector.load %arg22[%c0_76, %c0_77, %c0_78] : memref<2x1x32xf32, #tpu.memory_space<vmem>>, vector<1x1x32xf32>
    %112 = vector.shape_cast %111 : vector<1x1x32xf32> to vector<1x32xf32>
    %cst_79 = arith.constant dense<0.000000e+00> : vector<2xf32>
    %113 = vector.multi_reduction <add>, %108, %cst_79 [1] : vector<2x32xf32> to vector<2xf32>
    %114 = vector.shape_cast %113 : vector<2xf32> to vector<2x1xf32>
    %cst_80 = arith.constant 3.200000e+01 : f32
    %115 = vector.broadcast %cst_80 : f32 to vector<2x1xf32>
    %116 = arith.divf %114, %115 : vector<2x1xf32>
    %117 = vector.broadcast %116 : vector<2x1xf32> to vector<2x32xf32>
    %118 = arith.subf %108, %117 : vector<2x32xf32>
    %119 = arith.mulf %118, %118 : vector<2x32xf32>
    %cst_81 = arith.constant dense<0.000000e+00> : vector<2xf32>
    %120 = vector.multi_reduction <add>, %119, %cst_81 [1] : vector<2x32xf32> to vector<2xf32>
    %121 = vector.shape_cast %120 : vector<2xf32> to vector<2x1xf32>
    %cst_82 = arith.constant 3.200000e+01 : f32
    %122 = vector.broadcast %cst_82 : f32 to vector<2x1xf32>
    %123 = arith.divf %121, %122 : vector<2x1xf32>
    %124 = vector.broadcast %116 : vector<2x1xf32> to vector<2x32xf32>
    %125 = arith.subf %108, %124 : vector<2x32xf32>
    %cst_83 = arith.constant 9.99999974E-6 : f32
    %126 = vector.broadcast %cst_83 : f32 to vector<2x1xf32>
    %127 = arith.addf %123, %126 : vector<2x1xf32>
    %128 = math.rsqrt %127 : vector<2x1xf32>
    %129 = vector.broadcast %128 : vector<2x1xf32> to vector<2x32xf32>
    %130 = arith.mulf %125, %129 : vector<2x32xf32>
    %131 = vector.broadcast %110 : vector<1x32xf32> to vector<2x32xf32>
    %132 = arith.mulf %130, %131 : vector<2x32xf32>
    %133 = vector.broadcast %112 : vector<1x32xf32> to vector<2x32xf32>
    %134 = arith.addf %132, %133 : vector<2x32xf32>
    %135 = arith.addf %20, %134 : vector<2x32xf32>
    %c1 = arith.constant 1 : index
    %c0_84 = arith.constant 0 : index
    %c0_85 = arith.constant 0 : index
    %136 = vector.load %arg9[%c1, %c0_84, %c0_85] : memref<2x32x32xf32, #tpu.memory_space<vmem>>, vector<1x32x32xf32>
    %137 = vector.shape_cast %136 : vector<1x32x32xf32> to vector<32x32xf32>
    %cst_86 = arith.constant dense<0.000000e+00> : vector<2x32xf32>
    %138 = tpu.matmul %135, %137, %cst_86 {dimension_numbers = #tpu.dot_dimension_numbers<[1], [0], [0], [1], [0, 0, 1, 1], [], []>, precision = #tpu.contract_precision<fp32>} : vector<2x32xf32>, vector<32x32xf32>, vector<2x32xf32> -> vector<2x32xf32>
    %c1_87 = arith.constant 1 : index
    %c0_88 = arith.constant 0 : index
    %c0_89 = arith.constant 0 : index
    %139 = vector.load %arg10[%c1_87, %c0_88, %c0_89] : memref<2x1x32xf32, #tpu.memory_space<vmem>>, vector<1x1x32xf32>
    %140 = vector.shape_cast %139 : vector<1x1x32xf32> to vector<1x32xf32>
    %141 = vector.broadcast %140 : vector<1x32xf32> to vector<2x32xf32>
    %142 = arith.addf %138, %141 : vector<2x32xf32>
    %cst_90 = arith.constant 0.353553385 : f32
    %143 = vector.broadcast %cst_90 : f32 to vector<2x32xf32>
    %144 = arith.mulf %142, %143 : vector<2x32xf32>
    %c1_91 = arith.constant 1 : index
    %c0_92 = arith.constant 0 : index
    %c0_93 = arith.constant 0 : index
    %145 = vector.load %arg11[%c1_91, %c0_92, %c0_93] : memref<2x32x32xf32, #tpu.memory_space<vmem>>, vector<1x32x32xf32>
    %146 = vector.shape_cast %145 : vector<1x32x32xf32> to vector<32x32xf32>
    %cst_94 = arith.constant dense<0.000000e+00> : vector<16x32xf32>
    %147 = tpu.matmul %17, %146, %cst_94 {dimension_numbers = #tpu.dot_dimension_numbers<[1], [0], [0], [1], [0, 0, 1, 1], [], []>, precision = #tpu.contract_precision<fp32>} : vector<16x32xf32>, vector<32x32xf32>, vector<16x32xf32> -> vector<16x32xf32>
    %c1_95 = arith.constant 1 : index
    %c0_96 = arith.constant 0 : index
    %c0_97 = arith.constant 0 : index
    %148 = vector.load %arg12[%c1_95, %c0_96, %c0_97] : memref<2x1x32xf32, #tpu.memory_space<vmem>>, vector<1x1x32xf32>
    %149 = vector.shape_cast %148 : vector<1x1x32xf32> to vector<1x32xf32>
    %150 = vector.broadcast %149 : vector<1x32xf32> to vector<16x32xf32>
    %151 = arith.addf %147, %150 : vector<16x32xf32>
    %cst_98 = arith.constant dense<0.000000e+00> : vector<16x32xf32>
    %152 = tpu.matmul %2, %144, %cst_98 {dimension_numbers = #tpu.dot_dimension_numbers<[1], [0], [0], [1], [0, 0, 1, 1], [], []>, precision = #tpu.contract_precision<fp32>} : vector<16x2xf32>, vector<2x32xf32>, vector<16x32xf32> -> vector<16x32xf32>
    %153 = arith.mulf %152, %151 : vector<16x32xf32>
    %cst_99 = arith.constant dense<0.000000e+00> : vector<16x4xf32>
    %154 = tpu.matmul %153, %0, %cst_99 {dimension_numbers = #tpu.dot_dimension_numbers<[1], [0], [0], [1], [0, 0, 1, 1], [], []>, precision = #tpu.contract_precision<fp32>} : vector<16x32xf32>, vector<32x4xf32>, vector<16x4xf32> -> vector<16x4xf32>
    %155 = vector.shape_cast %154 : vector<16x4xf32> to vector<2x8x4xf32>
    %cst_100 = arith.constant dense<0xFF800000> : vector<2x4xf32>
    %156 = vector.multi_reduction <maximumf>, %155, %cst_100 [1] : vector<2x8x4xf32> to vector<2x4xf32>
    %157 = vector.shape_cast %156 : vector<2x4xf32> to vector<2x1x4xf32>
    %158 = vector.broadcast %157 : vector<2x1x4xf32> to vector<2x8x4xf32>
    %159 = arith.subf %155, %158 : vector<2x8x4xf32>
    %160 = math.exp %159 : vector<2x8x4xf32>
    %cst_101 = arith.constant dense<0.000000e+00> : vector<2x4xf32>
    %161 = vector.multi_reduction <add>, %160, %cst_101 [1] : vector<2x8x4xf32> to vector<2x4xf32>
    %162 = vector.shape_cast %161 : vector<2x4xf32> to vector<2x1x4xf32>
    %163 = tpu.reciprocal %162 {approx = true} : vector<2x1x4xf32> -> vector<2x1x4xf32>
    %164 = arith.mulf %162, %163 : vector<2x1x4xf32>
    %cst_102 = arith.constant 2.000000e+00 : f32
    %165 = vector.broadcast %cst_102 : f32 to vector<2x1x4xf32>
    %166 = arith.subf %165, %164 : vector<2x1x4xf32>
    %167 = arith.mulf %163, %166 : vector<2x1x4xf32>
    %168 = vector.broadcast %167 : vector<2x1x4xf32> to vector<2x8x4xf32>
    %169 = arith.mulf %160, %168 : vector<2x8x4xf32>
    %170 = vector.shape_cast %169 : vector<2x8x4xf32> to vector<16x4xf32>
    %cst_103 = arith.constant dense<0.000000e+00> : vector<16x32xf32>
    %171 = tpu.matmul %170, %1, %cst_103 {dimension_numbers = #tpu.dot_dimension_numbers<[1], [0], [0], [1], [0, 0, 1, 1], [], []>, precision = #tpu.contract_precision<fp32>} : vector<16x4xf32>, vector<4x32xf32>, vector<16x32xf32> -> vector<16x32xf32>
    %172 = arith.mulf %171, %151 : vector<16x32xf32>
    %173 = vector.shape_cast %172 : vector<16x32xf32> to vector<2x8x32xf32>
    %cst_104 = arith.constant dense<0.000000e+00> : vector<2x32xf32>
    %174 = vector.multi_reduction <add>, %173, %cst_104 [1] : vector<2x8x32xf32> to vector<2x32xf32>
    %c1_105 = arith.constant 1 : index
    %c0_106 = arith.constant 0 : index
    %c0_107 = arith.constant 0 : index
    %175 = vector.load %arg13[%c1_105, %c0_106, %c0_107] : memref<2x32x32xf32, #tpu.memory_space<vmem>>, vector<1x32x32xf32>
    %176 = vector.shape_cast %175 : vector<1x32x32xf32> to vector<32x32xf32>
    %cst_108 = arith.constant dense<0.000000e+00> : vector<2x32xf32>
    %177 = tpu.matmul %174, %176, %cst_108 {dimension_numbers = #tpu.dot_dimension_numbers<[1], [0], [0], [1], [0, 0, 1, 1], [], []>, precision = #tpu.contract_precision<fp32>} : vector<2x32xf32>, vector<32x32xf32>, vector<2x32xf32> -> vector<2x32xf32>
    %c1_109 = arith.constant 1 : index
    %c0_110 = arith.constant 0 : index
    %c0_111 = arith.constant 0 : index
    %178 = vector.load %arg14[%c1_109, %c0_110, %c0_111] : memref<2x1x32xf32, #tpu.memory_space<vmem>>, vector<1x1x32xf32>
    %179 = vector.shape_cast %178 : vector<1x1x32xf32> to vector<1x32xf32>
    %180 = vector.broadcast %179 : vector<1x32xf32> to vector<2x32xf32>
    %181 = arith.addf %177, %180 : vector<2x32xf32>
    %c1_112 = arith.constant 1 : index
    %c0_113 = arith.constant 0 : index
    %c0_114 = arith.constant 0 : index
    %182 = vector.load %arg15[%c1_112, %c0_113, %c0_114] : memref<2x1x32xf32, #tpu.memory_space<vmem>>, vector<1x1x32xf32>
    %183 = vector.shape_cast %182 : vector<1x1x32xf32> to vector<1x32xf32>
    %c1_115 = arith.constant 1 : index
    %c0_116 = arith.constant 0 : index
    %c0_117 = arith.constant 0 : index
    %184 = vector.load %arg16[%c1_115, %c0_116, %c0_117] : memref<2x1x32xf32, #tpu.memory_space<vmem>>, vector<1x1x32xf32>
    %185 = vector.shape_cast %184 : vector<1x1x32xf32> to vector<1x32xf32>
    %cst_118 = arith.constant dense<0.000000e+00> : vector<2xf32>
    %186 = vector.multi_reduction <add>, %181, %cst_118 [1] : vector<2x32xf32> to vector<2xf32>
    %187 = vector.shape_cast %186 : vector<2xf32> to vector<2x1xf32>
    %cst_119 = arith.constant 3.200000e+01 : f32
    %188 = vector.broadcast %cst_119 : f32 to vector<2x1xf32>
    %189 = arith.divf %187, %188 : vector<2x1xf32>
    %190 = vector.broadcast %189 : vector<2x1xf32> to vector<2x32xf32>
    %191 = arith.subf %181, %190 : vector<2x32xf32>
    %192 = arith.mulf %191, %191 : vector<2x32xf32>
    %cst_120 = arith.constant dense<0.000000e+00> : vector<2xf32>
    %193 = vector.multi_reduction <add>, %192, %cst_120 [1] : vector<2x32xf32> to vector<2xf32>
    %194 = vector.shape_cast %193 : vector<2xf32> to vector<2x1xf32>
    %cst_121 = arith.constant 3.200000e+01 : f32
    %195 = vector.broadcast %cst_121 : f32 to vector<2x1xf32>
    %196 = arith.divf %194, %195 : vector<2x1xf32>
    %197 = vector.broadcast %189 : vector<2x1xf32> to vector<2x32xf32>
    %198 = arith.subf %181, %197 : vector<2x32xf32>
    %cst_122 = arith.constant 9.99999974E-6 : f32
    %199 = vector.broadcast %cst_122 : f32 to vector<2x1xf32>
    %200 = arith.addf %196, %199 : vector<2x1xf32>
    %201 = math.rsqrt %200 : vector<2x1xf32>
    %202 = vector.broadcast %201 : vector<2x1xf32> to vector<2x32xf32>
    %203 = arith.mulf %198, %202 : vector<2x32xf32>
    %204 = vector.broadcast %183 : vector<1x32xf32> to vector<2x32xf32>
    %205 = arith.mulf %203, %204 : vector<2x32xf32>
    %206 = vector.broadcast %185 : vector<1x32xf32> to vector<2x32xf32>
    %207 = arith.addf %205, %206 : vector<2x32xf32>
    %c1_123 = arith.constant 1 : index
    %c0_124 = arith.constant 0 : index
    %c0_125 = arith.constant 0 : index
    %208 = vector.load %arg17[%c1_123, %c0_124, %c0_125] : memref<2x32x48xf32, #tpu.memory_space<vmem>>, vector<1x32x48xf32>
    %209 = vector.shape_cast %208 : vector<1x32x48xf32> to vector<32x48xf32>
    %cst_126 = arith.constant dense<0.000000e+00> : vector<2x48xf32>
    %210 = tpu.matmul %207, %209, %cst_126 {dimension_numbers = #tpu.dot_dimension_numbers<[1], [0], [0], [1], [0, 0, 1, 1], [], []>, precision = #tpu.contract_precision<fp32>} : vector<2x32xf32>, vector<32x48xf32>, vector<2x48xf32> -> vector<2x48xf32>
    %c1_127 = arith.constant 1 : index
    %c0_128 = arith.constant 0 : index
    %c0_129 = arith.constant 0 : index
    %211 = vector.load %arg18[%c1_127, %c0_128, %c0_129] : memref<2x1x48xf32, #tpu.memory_space<vmem>>, vector<1x1x48xf32>
    %212 = vector.shape_cast %211 : vector<1x1x48xf32> to vector<1x48xf32>
    %213 = vector.broadcast %212 : vector<1x48xf32> to vector<2x48xf32>
    %214 = arith.addf %210, %213 : vector<2x48xf32>
    %cst_130 = arith.constant 0.000000e+00 : f32
    %215 = vector.broadcast %cst_130 : f32 to vector<2x48xf32>
    %216 = arith.maximumf %214, %215 : vector<2x48xf32>
    %c1_131 = arith.constant 1 : index
    %c0_132 = arith.constant 0 : index
    %c0_133 = arith.constant 0 : index
    %217 = vector.load %arg19[%c1_131, %c0_132, %c0_133] : memref<2x48x32xf32, #tpu.memory_space<vmem>>, vector<1x48x32xf32>
    %218 = vector.shape_cast %217 : vector<1x48x32xf32> to vector<48x32xf32>
    %cst_134 = arith.constant dense<0.000000e+00> : vector<2x32xf32>
    %219 = tpu.matmul %216, %218, %cst_134 {dimension_numbers = #tpu.dot_dimension_numbers<[1], [0], [0], [1], [0, 0, 1, 1], [], []>, precision = #tpu.contract_precision<fp32>} : vector<2x48xf32>, vector<48x32xf32>, vector<2x32xf32> -> vector<2x32xf32>
    %c1_135 = arith.constant 1 : index
    %c0_136 = arith.constant 0 : index
    %c0_137 = arith.constant 0 : index
    %220 = vector.load %arg20[%c1_135, %c0_136, %c0_137] : memref<2x1x32xf32, #tpu.memory_space<vmem>>, vector<1x1x32xf32>
    %221 = vector.shape_cast %220 : vector<1x1x32xf32> to vector<1x32xf32>
    %222 = vector.broadcast %221 : vector<1x32xf32> to vector<2x32xf32>
    %223 = arith.addf %219, %222 : vector<2x32xf32>
    %c1_138 = arith.constant 1 : index
    %c0_139 = arith.constant 0 : index
    %c0_140 = arith.constant 0 : index
    %224 = vector.load %arg21[%c1_138, %c0_139, %c0_140] : memref<2x1x32xf32, #tpu.memory_space<vmem>>, vector<1x1x32xf32>
    %225 = vector.shape_cast %224 : vector<1x1x32xf32> to vector<1x32xf32>
    %c1_141 = arith.constant 1 : index
    %c0_142 = arith.constant 0 : index
    %c0_143 = arith.constant 0 : index
    %226 = vector.load %arg22[%c1_141, %c0_142, %c0_143] : memref<2x1x32xf32, #tpu.memory_space<vmem>>, vector<1x1x32xf32>
    %227 = vector.shape_cast %226 : vector<1x1x32xf32> to vector<1x32xf32>
    %cst_144 = arith.constant dense<0.000000e+00> : vector<2xf32>
    %228 = vector.multi_reduction <add>, %223, %cst_144 [1] : vector<2x32xf32> to vector<2xf32>
    %229 = vector.shape_cast %228 : vector<2xf32> to vector<2x1xf32>
    %cst_145 = arith.constant 3.200000e+01 : f32
    %230 = vector.broadcast %cst_145 : f32 to vector<2x1xf32>
    %231 = arith.divf %229, %230 : vector<2x1xf32>
    %232 = vector.broadcast %231 : vector<2x1xf32> to vector<2x32xf32>
    %233 = arith.subf %223, %232 : vector<2x32xf32>
    %234 = arith.mulf %233, %233 : vector<2x32xf32>
    %cst_146 = arith.constant dense<0.000000e+00> : vector<2xf32>
    %235 = vector.multi_reduction <add>, %234, %cst_146 [1] : vector<2x32xf32> to vector<2xf32>
    %236 = vector.shape_cast %235 : vector<2xf32> to vector<2x1xf32>
    %cst_147 = arith.constant 3.200000e+01 : f32
    %237 = vector.broadcast %cst_147 : f32 to vector<2x1xf32>
    %238 = arith.divf %236, %237 : vector<2x1xf32>
    %239 = vector.broadcast %231 : vector<2x1xf32> to vector<2x32xf32>
    %240 = arith.subf %223, %239 : vector<2x32xf32>
    %cst_148 = arith.constant 9.99999974E-6 : f32
    %241 = vector.broadcast %cst_148 : f32 to vector<2x1xf32>
    %242 = arith.addf %238, %241 : vector<2x1xf32>
    %243 = math.rsqrt %242 : vector<2x1xf32>
    %244 = vector.broadcast %243 : vector<2x1xf32> to vector<2x32xf32>
    %245 = arith.mulf %240, %244 : vector<2x32xf32>
    %246 = vector.broadcast %225 : vector<1x32xf32> to vector<2x32xf32>
    %247 = arith.mulf %245, %246 : vector<2x32xf32>
    %248 = vector.broadcast %227 : vector<1x32xf32> to vector<2x32xf32>
    %249 = arith.addf %247, %248 : vector<2x32xf32>
    %250 = arith.addf %135, %249 : vector<2x32xf32>
    %c0_149 = arith.constant 0 : index
    %c0_150 = arith.constant 0 : index
    %251 = vector.load %arg23[%c0_149, %c0_150] : memref<1x32xf32, #tpu.memory_space<vmem>>, vector<1x32xf32>
    %c0_151 = arith.constant 0 : index
    %c0_152 = arith.constant 0 : index
    %252 = vector.load %arg24[%c0_151, %c0_152] : memref<1x32xf32, #tpu.memory_space<vmem>>, vector<1x32xf32>
    %cst_153 = arith.constant dense<0.000000e+00> : vector<2xf32>
    %253 = vector.multi_reduction <add>, %250, %cst_153 [1] : vector<2x32xf32> to vector<2xf32>
    %254 = vector.shape_cast %253 : vector<2xf32> to vector<2x1xf32>
    %cst_154 = arith.constant 3.200000e+01 : f32
    %255 = vector.broadcast %cst_154 : f32 to vector<2x1xf32>
    %256 = arith.divf %254, %255 : vector<2x1xf32>
    %257 = vector.broadcast %256 : vector<2x1xf32> to vector<2x32xf32>
    %258 = arith.subf %250, %257 : vector<2x32xf32>
    %259 = arith.mulf %258, %258 : vector<2x32xf32>
    %cst_155 = arith.constant dense<0.000000e+00> : vector<2xf32>
    %260 = vector.multi_reduction <add>, %259, %cst_155 [1] : vector<2x32xf32> to vector<2xf32>
    %261 = vector.shape_cast %260 : vector<2xf32> to vector<2x1xf32>
    %cst_156 = arith.constant 3.200000e+01 : f32
    %262 = vector.broadcast %cst_156 : f32 to vector<2x1xf32>
    %263 = arith.divf %261, %262 : vector<2x1xf32>
    %264 = vector.broadcast %256 : vector<2x1xf32> to vector<2x32xf32>
    %265 = arith.subf %250, %264 : vector<2x32xf32>
    %cst_157 = arith.constant 9.99999974E-6 : f32
    %266 = vector.broadcast %cst_157 : f32 to vector<2x1xf32>
    %267 = arith.addf %263, %266 : vector<2x1xf32>
    %268 = math.rsqrt %267 : vector<2x1xf32>
    %269 = vector.broadcast %268 : vector<2x1xf32> to vector<2x32xf32>
    %270 = arith.mulf %265, %269 : vector<2x32xf32>
    %271 = vector.broadcast %251 : vector<1x32xf32> to vector<2x32xf32>
    %272 = arith.mulf %270, %271 : vector<2x32xf32>
    %273 = vector.broadcast %252 : vector<1x32xf32> to vector<2x32xf32>
    %274 = arith.addf %272, %273 : vector<2x32xf32>
    %c0_158 = arith.constant 0 : index
    %c0_159 = arith.constant 0 : index
    %275 = vector.load %arg25[%c0_158, %c0_159] : memref<2x32xf32, #tpu.memory_space<vmem>>, vector<2x32xf32>
    tpu.vector_store %arg25[%c0_158, %c0_159], %274 {strides = array<i32>} : memref<2x32xf32, #tpu.memory_space<vmem>>, vector<2x32xf32>,
    return
  }
}

</mosaic_0001>

<bundles_post_ra>
// kernel: tpu_custom_call.1
= control target key start
LH: loop header
LB: loop body
LE: loop exit
PB: predicated region body
PF: predicated region fallthrough
CT: control target
= control target key end

     0   :  { %s13503_s0 = inlined_call_operand.hbm [shape: f32[16,16], index: 0, kind: input, shape index: {}]   ;;  %s13504_s1 = inlined_call_operand.vmem [shape: f32[8,4], index: 1, kind: input, shape index: {}]   ;;  %s13505_s2 = inlined_call_operand.vmem [shape: f32[32,4], index: 2, kind: input, shape index: {}]   ;;  %s13506_s3 = inlined_call_operand.vmem [shape: f32[4,32], index: 3, kind: input, shape index: {}]   ;;  %s13507_s4 = inlined_call_operand.vmem [shape: f32[16,2], index: 4, kind: input, shape index: {}]   ;;  %s13508_s5 = inlined_call_operand.hbm [shape: f32[16,32], index: 5, kind: input, shape index: {}]   ;;  %s13509_s6 = inlined_call_operand.hbm [shape: f32[4,32], index: 6, kind: input, shape index: {}]   ;;  %s13510_s7 = inlined_call_operand.hbm [shape: f32[1,32], index: 7, kind: input, shape index: {}]   ;;  %s13511_s8 = inlined_call_operand.hbm [shape: f32[1,32], index: 8, kind: input, shape index: {}]   ;;  %s13512_s9 = inlined_call_operand.vmem [shape: f32[2,32,32], index: 9, kind: input, shape index: {}]   ;;  %s13513_s10 = inlined_call_operand.hbm [shape: f32[2,1,32], index: 10, kind: input, shape index: {}]   ;;  %s13514_s11 = inlined_call_operand.vmem [shape: f32[2,32,32], index: 11, kind: input, shape index: {}]   ;;  %s13515_s12 = inlined_call_operand.hbm [shape: f32[2,1,32], index: 12, kind: input, shape index: {}]   ;;  %s13516_s13 = inlined_call_operand.vmem [shape: f32[2,32,32], index: 13, kind: input, shape index: {}]   ;;  %s13517_s14 = inlined_call_operand.hbm [shape: f32[2,1,32], index: 14, kind: input, shape index: {}]   ;;  %s13518_s15 = inlined_call_operand.hbm [shape: f32[2,1,32], index: 15, kind: input, shape index: {}]   ;;  %s13519_s16 = inlined_call_operand.hbm [shape: f32[2,1,32], index: 16, kind: input, shape index: {}]   ;;  %s13520_s17 = inlined_call_operand.hbm [shape: f32[2,32,48], index: 17, kind: input, shape index: {}]   ;;  %s13521_s18 = inlined_call_operand.hbm [shape: f32[2,1,48], index: 18, kind: input, shape index: {}]   ;;  %s13522_s19 = inlined_call_operand.vmem [shape: f32[2,48,32], index: 19, kind: input, shape index: {}]   ;;  %s13523_s20 = inlined_call_operand.vmem [shape: f32[2,1,32], index: 20, kind: input, shape index: {}]   ;;  %s13524_s21 = inlined_call_operand.hbm [shape: f32[2,1,32], index: 21, kind: input, shape index: {}]   ;;  %s13525_s22 = inlined_call_operand.vmem [shape: f32[2,1,32], index: 22, kind: input, shape index: {}]   ;;  %s13526_s23 = inlined_call_operand.vmem [shape: f32[1,32], index: 23, kind: input, shape index: {}]   ;;  %s13527_s24 = inlined_call_operand.vmem [shape: f32[1,32], index: 24, kind: input, shape index: {}]   ;;  %s13528_s25 = inlined_call_operand.hbm [shape: f32[2,32], index: 25, kind: output, shape index: {}]  }
   0x1   :  { %13556 = sst [smem:[#allocation38_spill]] %s13503_s0 }
   0x2   :  { %13557 = sst [smem:[#allocation39_spill]] %s13504_s1 }
   0x3   :  { %13558 = sst [smem:[#allocation40_spill]] %s13505_s2 }
   0x4   :  { %13559 = sst [smem:[#allocation41_spill]] %s13506_s3 }
   0x5   :  { %13560 = sst [smem:[#allocation42_spill]] %s13507_s4 }
   0x6   :  { %13561 = sst [smem:[#allocation43_spill]] %s13508_s5 }
   0x7   :  { %13562 = sst [smem:[#allocation44_spill]] %s13509_s6 }
   0x8   :  { %13563 = sst [smem:[#allocation45_spill]] %s13510_s7 }
   0x9   :  { %13564 = sst [smem:[#allocation46_spill]] %s13511_s8 }
   0xa   :  { %13565 = sst [smem:[#allocation47_spill]] %s13512_s9 }
   0xb   :  { %30 = vsyncpa [#allocation3], 0 }
   0xc   :  { %31 = vsyncpa [#allocation6], 0 }
   0xd   :  { %32 = vsyncpa [#allocation9], 0 }
   0xe   :  { %33 = vsyncpa [#allocation12], 0 }
   0xf   :  { %34 = vsyncpa [#allocation15], 0 }
  0x10   :  { %35 = vsyncpa [#allocation18], 0 }
  0x11   :  { %36 = vsyncpa [#allocation21], 0 }
  0x12   :  { %37 = vsyncpa [#allocation4], 0  ;;  %s11682_s29 = smov [#allocation5]   ;;  %s11683_s6 = smov [#allocation8]  }
  0x13   :  { %s63_s2 = sshll.u32 %s11682_s29, 4  ;;  %s86_s30 = sshll.u32 %s11683_s6, 4  ;;  %s64_s2 = int_to_ptr.vmem [resolvable:$true] %s63_s2  ;;  %s87_s30 = int_to_ptr.vmem [resolvable:$true] %s86_s30 }
  0x14   :  { %s11394_s7 = scalar_lea.vmem %s64_s2, 256  ;;  %p11399_p1 = scmp.lt.s32.totalorder %s64_s2, %s64_s2 }
  0x15   :  { %p11395_p0 = scmp.ne.s32.totalorder %s64_s2, %s11394_s7  ;;  %p11400_p2 = scmp.lt.s32.totalorder %s11394_s7, %s11394_s7 }
  0x17   :  { %p11401_p3 = por %p11400_p2, %p11399_p1 }
  0x19   :  { %p11402_p4 = pnand %p11401_p3, %p11395_p0 }
  0x1b   :  { %11405 = shalt.err (!%p11402_p4)
}
  0x1c   :  { %s11684_s3 = smov 128   ;;  %s11685_s26 = smov 8  }
  0x1d   :  { %s13566_s27 = sld [smem:[#allocation43_spill]]  ;;  %s11414_s4 = scalar_lea.vmem %s87_s30, 16 }
  0x1e   :  { %p11415_p5 = scmp.ne.s32.totalorder %s87_s30, %s11414_s4  ;;  %s11418_s28 = scalar_lea.vmem %s87_s30, 32 }
  0x1f   :  { %p11419_p6 = scmp.lt.s32.totalorder %s87_s30, %s87_s30  ;;  %p11420_p7 = scmp.lt.s32.totalorder %s11418_s28, %s11414_s4 }
  0x21   :  { %p11421_p8 = por %p11420_p7, %p11419_p6 }
  0x23   :  { %69 = dma.hbm_to_vmem [thread:$0]  %s13566_s27, 256, %s64_s2, [#allocation6], %s11684_s3, %s11684_s3, %s11685_s26  }
  0x24   :  { %p11422_p9 = pnand %p11421_p8, %p11415_p5 }
  0x26   :  { %11425 = shalt.err (!%p11422_p9)
}
  0x27   :  { %s13567_s0 = sld [smem:[#allocation45_spill]]  ;;  %s11686_s29 = smov [#allocation11]  }
  0x28   :  { %s107_s6 = sshll.u32 %s11686_s29, 4  ;;  %s108_s6 = int_to_ptr.vmem [resolvable:$true] %s107_s6 }
  0x29   :  { %s11434_s7 = scalar_lea.vmem %s108_s6, 32  ;;  %p11439_p11 = scmp.lt.s32.totalorder %s108_s6, %s108_s6 }
  0x2a   :  { %p11435_p10 = scmp.ne.s32.totalorder %s108_s6, %s11434_s7  ;;  %p11440_p12 = scmp.lt.s32.totalorder %s11434_s7, %s11434_s7 }
  0x2c   :  { %p11441_p13 = por %p11440_p12, %p11439_p11 }
  0x2d   :  { %89 = dma.hbm_to_vmem [thread:$0]  %s13567_s0, 16, %s87_s30, [#allocation9]  }
  0x2e   :  { %p11442_p0 = pnand %p11441_p13, %p11435_p10 }
  0x30   :  { %11445 = shalt.err (!%p11442_p0)
}
  0x31   :  { %s11687_s2 = smov 16   ;;  %s11688_s1 = smov 1  }
  0x32   :  { %113 = dma.hbm_to_vmem [thread:$0]  %s13513_s10, 32, %s108_s6, [#allocation12], %s11687_s2, %s11687_s2, %s11688_s1  }
  0x33   :  { %s11689_s30 = smov [#allocation14]   ;;  %s11690_s28 = smov [#allocation17]  }
  0x34   :  { %s135_s4 = sshll.u32 %s11689_s30, 4  ;;  %s159_s9 = sshll.u32 %s11690_s28, 4  ;;  %s136_s4 = int_to_ptr.vmem [resolvable:$true] %s135_s4  ;;  %s160_s9 = int_to_ptr.vmem [resolvable:$true] %s159_s9 }
  0x35   :  { %s11454_s5 = scalar_lea.vmem %s136_s4, 32  ;;  %p11459_p2 = scmp.lt.s32.totalorder %s136_s4, %s136_s4 }
  0x36   :  { %p11455_p1 = scmp.ne.s32.totalorder %s136_s4, %s11454_s5  ;;  %p11460_p3 = scmp.lt.s32.totalorder %s11454_s5, %s11454_s5 }
  0x38   :  { %p11461_p4 = por %p11460_p3, %p11459_p2 }
  0x3a   :  { %p11462_p5 = pnand %p11461_p4, %p11455_p1 }
  0x3c   :  { %11465 = shalt.err (!%p11462_p5)
}
  0x3d   :  { %141 = dma.hbm_to_vmem [thread:$0]  %s13517_s14, 32, %s136_s4, [#allocation15], %s11687_s2, %s11687_s2, %s11688_s1  }
  0x3e   :  { %s11474_s10 = scalar_lea.vmem %s160_s9, 32  ;;  %p11479_p7 = scmp.lt.s32.totalorder %s160_s9, %s160_s9 }
  0x3f   :  { %p11475_p6 = scmp.ne.s32.totalorder %s160_s9, %s11474_s10  ;;  %p11480_p8 = scmp.lt.s32.totalorder %s11474_s10, %s11474_s10 }
  0x41   :  { %p11481_p9 = por %p11480_p8, %p11479_p7 }
  0x43   :  { %p11482_p10 = pnand %p11481_p9, %p11475_p6 }
  0x45   :  { %11485 = shalt.err (!%p11482_p10)
}
  0x46   :  { %165 = dma.hbm_to_vmem [thread:$0]  %s13519_s16, 32, %s160_s9, [#allocation18], %s11687_s2, %s11687_s2, %s11688_s1  }
  0x47   :  { %s11691_s8 = smov [#allocation20]   ;;  %s11692_s30 = smov [#allocation2]  }
  0x48   :  { %s183_s27 = sshll.u32 %s11691_s8, 4  ;;  %s43_s14 = sshll.u32 %s11692_s30, 4  ;;  %s184_s27 = int_to_ptr.vmem [resolvable:$true] %s183_s27  ;;  %s44_s14 = int_to_ptr.vmem [resolvable:$true] %s43_s14 }
  0x49   :  { %s11494_s4 = scalar_lea.vmem %s184_s27, 32  ;;  %p11499_p12 = scmp.lt.s32.totalorder %s184_s27, %s184_s27 }
  0x4a   :  { %p11495_p11 = scmp.ne.s32.totalorder %s184_s27, %s11494_s4  ;;  %p11500_p13 = scmp.lt.s32.totalorder %s11494_s4, %s11494_s4 }
  0x4c   :  { %p11501_p0 = por %p11500_p13, %p11499_p12 }
  0x4e   :  { %p11502_p1 = pnand %p11501_p0, %p11495_p11 }
  0x50   :  { %11505 = shalt.err (!%p11502_p1)
}
  0x51   :  { %189 = dma.hbm_to_vmem [thread:$0]  %s13521_s18, 32, %s184_s27, [#allocation21], %s11687_s2, %s11687_s2, %s11688_s1  }
  0x52   :  { %s11514_s16 = scalar_lea.vmem %s44_s14, 256  ;;  %p11519_p3 = scmp.lt.s32.totalorder %s44_s14, %s44_s14 }
  0x53   :  { %p11515_p2 = scmp.ne.s32.totalorder %s44_s14, %s11514_s16  ;;  %p11520_p4 = scmp.lt.s32.totalorder %s11514_s16, %s11514_s16 }
  0x55   :  { %p11521_p5 = por %p11520_p4, %p11519_p3 }
  0x57   :  { %p11522_p6 = pnand %p11521_p5, %p11515_p2 }
  0x59   :  { %11525 = shalt.err (!%p11522_p6)
}
  0x5a   :  { %s13568_s29 = sld [smem:[#allocation38_spill]]  ;;  %s11693_s10 = smov [#allocation7]  }
  0x5b   :  { %s76_s6 = sshll.u32 %s11693_s10, 4  ;;  %s11694_s7 = smov [#allocation10]   ;;  %s77_s6 = int_to_ptr.vmem [resolvable:$true] %s76_s6 }
  0x5c   :  { %s96_s18 = sshll.u32 %s11694_s7, 4  ;;  %s11534_s8 = scalar_lea.vmem %s77_s6, 64  ;;  %s97_s18 = int_to_ptr.vmem [resolvable:$true] %s96_s18 }
  0x5d   :  { %p11535_p7 = scmp.ne.s32.totalorder %s77_s6, %s11534_s8  ;;  %p11539_p8 = scmp.lt.s32.totalorder %s77_s6, %s77_s6 }
  0x5e   :  { %p11540_p9 = scmp.lt.s32.totalorder %s11534_s8, %s11534_s8 }
  0x60   :  { %49 = dma.hbm_to_vmem [thread:$0]  %s13568_s29, 256, %s44_s14, [#allocation3], %s11684_s3, %s11684_s3, %s11685_s26  }
  0x61   :  { %p11541_p10 = por %p11540_p9, %p11539_p8 }
  0x63   :  { %p11542_p11 = pnand %p11541_p10, %p11535_p7 }
  0x65   :  { %11545 = shalt.err (!%p11542_p11)
}
  0x66   :  { %s13569_s4 = sld [smem:[#allocation44_spill]]  ;;  %s11554_s28 = scalar_lea.vmem %s97_s18, 16 }
  0x67   :  { %p11555_p12 = scmp.ne.s32.totalorder %s97_s18, %s11554_s28  ;;  %s11558_s14 = scalar_lea.vmem %s97_s18, 32 }
  0x68   :  { %p11559_p13 = scmp.lt.s32.totalorder %s97_s18, %s97_s18  ;;  %p11560_p0 = scmp.lt.s32.totalorder %s11558_s14, %s11554_s28 }
  0x6a   :  { %p11561_p1 = por %p11560_p0, %p11559_p13 }
  0x6c   :  { %79 = dma.hbm_to_vmem [thread:$0]  %s13569_s4, 64, %s77_s6, [#allocation6]  }
  0x6d   :  { %p11562_p2 = pnand %p11561_p1, %p11555_p12 }
  0x6f   :  { %11565 = shalt.err (!%p11562_p2)
}
  0x70   :  { %s13570_s9 = sld [smem:[#allocation46_spill]]  ;;  %s11695_s0 = smov [#allocation13]  }
  0x71   :  { %s121_s29 = sshll.u32 %s11695_s0, 4  ;;  %s11696_s10 = smov [#allocation16]   ;;  %s122_s29 = int_to_ptr.vmem [resolvable:$true] %s121_s29 }
  0x72   :  { %s147_s7 = sshll.u32 %s11696_s10, 4  ;;  %s11574_s8 = scalar_lea.vmem %s122_s29, 32  ;;  %s148_s7 = int_to_ptr.vmem [resolvable:$true] %s147_s7 }
  0x73   :  { %p11575_p3 = scmp.ne.s32.totalorder %s122_s29, %s11574_s8  ;;  %p11579_p4 = scmp.lt.s32.totalorder %s122_s29, %s122_s29 }
  0x74   :  { %p11580_p5 = scmp.lt.s32.totalorder %s11574_s8, %s11574_s8 }
  0x76   :  { %99 = dma.hbm_to_vmem [thread:$0]  %s13570_s9, 16, %s97_s18, [#allocation9]  }
  0x77   :  { %p11581_p6 = por %p11580_p5, %p11579_p4 }
  0x79   :  { %p11582_p7 = pnand %p11581_p6, %p11575_p3 }
  0x7b   :  { %11585 = shalt.err (!%p11582_p7)
}
  0x7c   :  { %127 = dma.hbm_to_vmem [thread:$0]  %s13515_s12, 32, %s122_s29, [#allocation12], %s11687_s2, %s11687_s2, %s11688_s1  }
  0x7d   :  { %s11594_s18 = scalar_lea.vmem %s148_s7, 32  ;;  %p11599_p9 = scmp.lt.s32.totalorder %s148_s7, %s148_s7 }
  0x7e   :  { %p11595_p8 = scmp.ne.s32.totalorder %s148_s7, %s11594_s18  ;;  %p11600_p10 = scmp.lt.s32.totalorder %s11594_s18, %s11594_s18 }
  0x80   :  { %p11601_p11 = por %p11600_p10, %p11599_p9 }
  0x82   :  { %p11602_p12 = pnand %p11601_p11, %p11595_p8 }
  0x84   :  { %11605 = shalt.err (!%p11602_p12)
}
  0x85   :  { %153 = dma.hbm_to_vmem [thread:$0]  %s13518_s15, 32, %s148_s7, [#allocation15], %s11687_s2, %s11687_s2, %s11688_s1  }
  0x86   :  { %s11697_s28 = smov [#allocation19]   ;;  %s11698_s5 = smov [#allocation22]  }
  0x87   :  { %s171_s14 = sshll.u32 %s11697_s28, 4  ;;  %s199_s12 = sshll.u32 %s11698_s5, 4  ;;  %s172_s14 = int_to_ptr.vmem [resolvable:$true] %s171_s14  ;;  %s200_s12 = int_to_ptr.vmem [resolvable:$true] %s199_s12 }
  0x88   :  { %s11614_s16 = scalar_lea.vmem %s172_s14, 1024  ;;  %p11619_p0 = scmp.lt.s32.totalorder %s172_s14, %s172_s14 }
  0x89   :  { %p11615_p13 = scmp.ne.s32.totalorder %s172_s14, %s11614_s16  ;;  %p11620_p1 = scmp.lt.s32.totalorder %s11614_s16, %s11614_s16 }
  0x8b   :  { %p11621_p2 = por %p11620_p1, %p11619_p0 }
  0x8d   :  { %p11622_p3 = pnand %p11621_p2, %p11615_p13 }
  0x8f   :  { %11625 = shalt.err (!%p11622_p3)
}
  0x90   :  { %177 = dma.hbm_to_vmem [thread:$0]  %s13520_s17, 1024, %s172_s14, [#allocation18], %s11684_s3, %s11684_s3, %s11685_s26  }
  0x91   :  { %s11634_s15 = scalar_lea.vmem %s200_s12, 32  ;;  %p11639_p5 = scmp.lt.s32.totalorder %s200_s12, %s200_s12 }
  0x92   :  { %p11635_p4 = scmp.ne.s32.totalorder %s200_s12, %s11634_s15  ;;  %p11640_p6 = scmp.lt.s32.totalorder %s11634_s15, %s11634_s15 }
  0x94   :  { %p11641_p7 = por %p11640_p6, %p11639_p5 }
  0x96   :  { %p11642_p8 = pnand %p11641_p7, %p11635_p4 }
  0x98   :  { %11645 = shalt.err (!%p11642_p8)
}
  0x99   :  { %205 = dma.hbm_to_vmem [thread:$0]  %s13524_s21, 32, %s200_s12, [#allocation21], %s11687_s2, %s11687_s2, %s11688_s1  }
  0x9a   :  { %11666 = dma.done.wait [#allocation3], 256  }
  0x9b   :  { %11667 = vsyncadd [#allocation3], 4294967040 }
  0x9c   :  { %11668 = dma.done.wait [#allocation6], 320  }
  0x9d   :  { %11669 = vsyncadd [#allocation6], 4294966976 }
  0x9e   :  { %11670 = dma.done.wait [#allocation9], 32  }
  0x9f   :  { %11671 = vsyncadd [#allocation9], 4294967264 }
  0xa0   :  { %11672 = dma.done.wait [#allocation12], 64  }
  0xa1   :  { %11673 = vsyncadd [#allocation12], 4294967232 }
  0xa2   :  { %11674 = dma.done.wait [#allocation15], 64  }
  0xa3   :  { %11675 = vsyncadd [#allocation15], 4294967232 }
  0xa4   :  { %11676 = dma.done.wait [#allocation18], 1056  }
  0xa5   :  { %11677 = vsyncadd [#allocation18], 4294966240 }
  0xa6   :  { %11678 = dma.done.wait [#allocation21], 64  }
  0xa7   :  { %11679 = vsyncadd [#allocation21], 4294967232  ;;  %vm262_vm0 = vcmask 130048   ;;  %v261_v0 = vld [vmem:[#allocation5 + $0x8] sm:$0xff]  ;;  %v260_v1 = vld [vmem:[#allocation5] sm:$0xff]  ;;  %s13571_s3 = sld [smem:[#allocation39_spill]] }
  0xa8   :  { %v258_v2 = vld [vmem:[#allocation2] sm:$0xff]  ;;  %v11901_v3 = vand.u32 4294901760, %v261_v0  ;;  %v11903_v4 = vand.u32 4294901760, %v260_v1  ;;  %v259_v5 = vld [vmem:[#allocation2 + $0x8] sm:$0xff]  ;;  %vm773_vm1 = vcmask 31744   ;;  %vm777_vm2 = vcmask 1043456  }
  0xa9   :  { %v264_v6 = vsel %vm262_vm0, %v258_v2, 0  ;;  %v267_v7 = vsel %vm262_vm0, %v259_v5, 0  ;;  %v772_v13 = vld [vmem:[#allocation7] sm:$0xf]  ;;  %s13572_s1 = sld [smem:[#allocation47_spill]]  ;;  %vm1256_vm3 = vcmask 261120  }
  0xaa   :  { %v11905_v8 = vand.u32 4294901760, %v264_v6  ;;  %10307 = vmatprep.subr.mxu0 %v11901_v3  ;;  %v386_v10 = vsub.f32 %v261_v0, %v11901_v3  ;;  %v11912_v11 = vand.u32 4294901760, %v267_v7  ;;  %v393_v12 = vsub.f32 %v260_v1, %v11903_v4  ;;  %v9750_v39 = vld [vmem:[#allocation10] ss:$0 sm:$0xff]  ;;  %s13573_s10 = sld [smem:[#allocation42_spill]] }
  0xab   :  { %10308 = vmatpush3.msra.mxu0 %v11901_v3  ;;  %v779_v20 = vsel %vm777_vm2, %v772_v13, 0  ;;  %v1257_v44 = vsel %vm1256_vm3, %v9750_v39, 0  ;;  %v13532_v50 = vmov 0.0   ;;  %vm11700_vm4 = vmmov 0   ;;  %v1746_v13 = vld [vmem:[%s13514_s11 + $0x8] sm:$0xff]  ;;  %s13574_s2 = sld [smem:[#allocation40_spill]] }
  0xac   :  { %v337_v14 = vsub.f32 %v264_v6, %v11905_v8  ;;  %10318 = vmatprep.mubr.f32.mxu1 %v11905_v8  ;;  %10309 = vmatprep.subr.mxu0 %v11903_v4  ;;  %v387_v15 = vand.u32 4294901760, %v386_v10  ;;  %v347_v16 = vsub.f32 %v267_v7, %v11912_v11  ;;  %v394_v17 = vand.u32 4294901760, %v393_v12  ;;  %s13578_s14 = sld [smem:[#allocation41_spill]] }
  0xad   :  { %v771_v9 = vld [vmem:[%s13571_s3] sm:$0xff]  ;;  %10310 = vmatpush3.msra.mxu0 %v11903_v4  ;;  %v11925_v29 = vand.u32 4294901760, %v779_v20  ;;  %v11975_v51 = vand.u32 4294901760, %v1257_v44  ;;  %vm2290_vm5 = vcmask 15360   ;;  %vm2297_vm6 = vcmask 1041408  }
  0xae   :  { %v775_v18 = vsel %vm773_vm1, %v771_v9, 0  ;;  %v338_v19 = vand.u32 4294901760, %v337_v14  ;;  %v388_v21 = vsub.f32 %v386_v10, %v387_v15  ;;  %v348_v22 = vand.u32 4294901760, %v347_v16  ;;  %10321 = vmatprep.subr.mxu0 %v386_v10 }
  0xaf   :  { %v395_v23 = vsub.f32 %v393_v12, %v394_v17  ;;  %v11923_v25 = vand.u32 4294901760, %v775_v18  ;;  %v11931_v33 = vsub.f32 %v779_v20, %v11925_v29  ;;  %v1248_v36 = vld [vmem:[%s13572_s1 + $0x18] sm:$0xff]  ;;  %v1247_v38 = vld [vmem:[%s13572_s1 + $0x10] sm:$0xff]  ;;  %v1246_v42 = vld [vmem:[%s13572_s1 + $0x8] sm:$0xff]  ;;  %v11995_v56 = vsub.f32 %v1257_v44, %v11975_v51 }
  0xb0   :  { %v339_v24 = vsub.f32 %v337_v14, %v338_v19  ;;  %v389_v26 = vand.u32 4294901760, %v388_v21  ;;  %v349_v27 = vsub.f32 %v347_v16, %v348_v22  ;;  %v11950_v41 = vand.u32 4294901760, %v1248_v36  ;;  %v1245_v46 = vld [vmem:[%s13572_s1] sm:$0xff] }
  0xb1   :  { %v396_v28 = vand.u32 4294901760, %v395_v23  ;;  %v11928_v32 = vsub.f32 %v775_v18, %v11923_v25  ;;  %v890_v35 = vand.u32 4294901760, %v11931_v33  ;;  %v11958_v43 = vand.u32 4294901760, %v1247_v38 }
  0xb2   :  { %v340_v30 = vand.u32 4294901760, %v339_v24  ;;  %10314 = vmatprep.subr.mxu1 %v389_v26  ;;  %v350_v31 = vand.u32 4294901760, %v349_v27  ;;  %v11969_v48 = vsub.f32 %v1248_v36, %v11950_v41  ;;  %v11971_v49 = vand.u32 4294901760, %v1246_v42 }
  0xb3   :  { %10315 = vmatpush3.msra.mxu1 %v389_v26  ;;  %v849_v34 = vand.u32 4294901760, %v11928_v32  ;;  %v891_v40 = vsub.f32 %v11931_v33, %v890_v35  ;;  %v11981_v52 = vsub.f32 %v1247_v38, %v11958_v43  ;;  %v11983_v53 = vand.u32 4294901760, %v1245_v46 }
  0xb4   :  { %10311 = vmatprep.mubr.f32.mxu0 %v340_v30  ;;  %10316 = vmatprep.subr.mxu1 %v396_v28  ;;  %v1365_v54 = vand.u32 4294901760, %v11969_v48  ;;  %v11990_v55 = vsub.f32 %v1246_v42, %v11971_v49  ;;  %v1330_v61 = vand.u32 4294901760, %v11995_v56  ;;  %vm3897_vm7 = vcmask 1041409  }
  0xb5   :  { %10312 = vmatmul.mubr.f32.vlgmr.msra.gmra.mxu0 %v350_v31  ;;  %10317 = vmatpush3.msra.mxu1 %v396_v28  ;;  %v850_v37 = vsub.f32 %v11928_v32, %v849_v34  ;;  %v892_v47 = vand.u32 4294901760, %v891_v40  ;;  %v1372_v57 = vand.u32 4294901760, %v11981_v52  ;;  %v12002_v58 = vsub.f32 %v1245_v46, %v11983_v53 }
  0xb6   :  { %10322 = vmatpush3.msra.mxu0 %v386_v10  ;;  %10319 = vmatmul.mubr.f32.vlgmr.msra.gmra.mxu1 %v11912_v11  ;;  %v1366_v59 = vsub.f32 %v11969_v48, %v1365_v54  ;;  %v1379_v60 = vand.u32 4294901760, %v11990_v55  ;;  %v1331_v2 = vsub.f32 %v11995_v56, %v1330_v61  ;;  %v1747_v10 = vld [vmem:[%s13514_s11 + $0x10] sm:$0xff]  ;;  %vm4388_vm8 = vcmask 254976  }
  0xb7   :  { %10323 = vmatprep.subr.mxu0 %v393_v12  ;;  %10328 = vmatprep.subr.mxu1 %v11901_v3  ;;  %v851_v45 = vand.u32 4294901760, %v850_v37  ;;  %v1373_v62 = vsub.f32 %v11981_v52, %v1372_v57  ;;  %v1386_v63 = vand.u32 4294901760, %v12002_v58  ;;  %vm4930_vm9 = vcmask 392192  }
  0xb8   :  { %10324 = vmatpush3.msra.mxu0 %v393_v12  ;;  %10325 = vmatprep.mubr.f32.mxu0 %v337_v14  ;;  %v1367_v0 = vand.u32 4294901760, %v1366_v59  ;;  %v1380_v1 = vsub.f32 %v11990_v55, %v1379_v60  ;;  %v1332_v6 = vand.u32 4294901760, %v1331_v2  ;;  %v12111_v12 = vand.u32 4294901760, %v1747_v10 }
  0xb9   :  { %10329 = vmatpush3.msra.mxu1 %v11901_v3  ;;  %10326 = vmatmul.mubr.f32.vlgmr.msra.gmra.mxu0 %v347_v16  ;;  %v12124_v16 = vand.u32 4294901760, %v1746_v13 }
  0xba   :  { %10330 = vmatprep.subr.mxu1 %v11903_v4  ;;  %10335 = vmatprep.subr.mxu0 %v387_v15  ;;  %v1381_v5 = vand.u32 4294901760, %v1380_v1 }
  0xbb   :  { %10331 = vmatpush3.msra.mxu1 %v11903_v4  ;;  %10332 = vmatprep.mubr.f32.mxu1 %v338_v19  ;;  %v12137_v20 = vsub.f32 %v1746_v13, %v12124_v16 }
  0xbc   :  { %10336 = vmatpush3.msra.mxu0 %v387_v15  ;;  %10333 = vmatmul.mubr.f32.vlgmr.msra.gmra.mxu1 %v348_v22  ;;  %v12122_v15 = vsub.f32 %v1747_v10, %v12111_v12 }
  0xbd   :  { %10337 = vmatprep.subr.mxu0 %v394_v17  ;;  %10342 = vmatprep.subr.mxu1 %v11901_v3  ;;  %v12146_v24 = vand.u32 4294901760, %v12137_v20 }
  0xbe   :  { %10338 = vmatpush3.msra.mxu0 %v394_v17  ;;  %10339 = vmatprep.mubr.f32.mxu0 %v11905_v8  ;;  %v1745_v17 = vld [vmem:[%s13514_s11] sm:$0xff]  ;;  %v12134_v19 = vand.u32 4294901760, %v12122_v15 }
  0xbf   :  { %10343 = vmatpush3.msra.mxu1 %v11901_v3  ;;  %10340 = vmatmul.mubr.f32.vlgmr.msra.gmra.mxu0 %v11912_v11  ;;  %v1374_v3 = vand.u32 4294901760, %v1373_v62  ;;  %v12139_v21 = vand.u32 4294901760, %v1745_v17  ;;  %v1893_v27 = vsub.f32 %v12137_v20, %v12146_v24 }
  0xc0   :  { %10344 = vmatprep.subr.mxu1 %v11903_v4  ;;  %10346 = vmatprep.mubr.f32.mxu1 %v11905_v8  ;;  %v1748_v8 = vld [vmem:[%s13514_s11 + $0x18] sm:$0xff]  ;;  %v1886_v23 = vsub.f32 %v12122_v15, %v12134_v19 }
  0xc1   :  { %10345 = vmatpush3.msra.mxu1 %v11903_v4  ;;  %10349 = vmatprep.subr.mxu0 %v13532_v50  ;;  %v1387_v4 = vsub.f32 %v12002_v58, %v1386_v63  ;;  %v12103_v9 = vand.u32 4294901760, %v1748_v8 }
  0xc2   :  { %10347 = vmatmul.mubr.f32.vlgmr.msra.gmra.mxu1 %v11912_v11  ;;  %10350 = vmatpush3.msra.mxu0 %v11925_v29  ;;  %v1887_v26 = vand.u32 4294901760, %v1886_v23 }
  0xc3   :  { %10351 = vmatprep.mubr.msk.f32.mxu0 %vm11700_vm4, %v13532_v50  ;;  %10354 = vmatprep.subr.mxu1 %v13532_v50  ;;  %v1388_v7 = vand.u32 4294901760, %v1387_v4  ;;  %v12109_v11 = vsub.f32 %v1748_v8, %v12103_v9 }
  0xc4   :  { %10352 = vmatmul.mubr.f32.vlgmr.msra.gmra.mxu0 %v851_v45  ;;  %10355 = vmatpush3.msra.mxu1 %v892_v47 }
  0xc5   :  { %10356 = vmatprep.mubr.msk.f32.mxu1 %vm11700_vm4, %v13532_v50  ;;  %10359 = vmatprep.subr.mxu0 %v13532_v50  ;;  %v12119_v14 = vand.u32 4294901760, %v12109_v11 }
  0xc6   :  { %10357 = vmatmul.mubr.f32.vlgmr.msra.gmra.mxu1 %v11923_v25  ;;  %10360 = vmatpush3.msra.mxu0 %v11931_v33 }
  0xc7   :  { %10361 = vmatprep.mubr.msk.f32.mxu0 %vm11700_vm4, %v13532_v50  ;;  %10364 = vmatprep.subr.mxu1 %v13532_v50  ;;  %v1879_v18 = vsub.f32 %v12109_v11, %v12119_v14 }
  0xc8   :  { %10362 = vmatmul.mubr.f32.vlgmr.msra.gmra.mxu0 %v11928_v32  ;;  %10365 = vmatpush3.msra.mxu1 %v11925_v29 }
  0xc9   :  { %10366 = vmatprep.mubr.msk.f32.mxu1 %vm11700_vm4, %v13532_v50  ;;  %10369 = vmatprep.subr.mxu0 %v13532_v50  ;;  %v1880_v22 = vand.u32 4294901760, %v1879_v18 }
  0xca   :  { %10367 = vmatmul.mubr.f32.vlgmr.msra.gmra.mxu1 %v849_v34  ;;  %10370 = vmatpush3.msra.mxu0 %v890_v35 }
  0xcb   :  { %10371 = vmatprep.mubr.msk.f32.mxu0 %vm11700_vm4, %v13532_v50  ;;  %10374 = vmatprep.subr.mxu1 %v13532_v50 }
  0xcc   :  { %10379 = vmatprep.subr.mxu0 %v13532_v50  ;;  %10372 = vmatmul.mubr.f32.vlgmr.msra.gmra.mxu0 %v11923_v25 }
  0xcd   :  { %10375 = vmatpush3.msra.mxu1 %v11925_v29  ;;  %10380 = vmatpush3.msra.mxu0 %v11950_v41  ;;  %v1894_v29 = vand.u32 4294901760, %v1893_v27 }
  0xce   :  { %10376 = vmatprep.mubr.msk.f32.mxu1 %vm11700_vm4, %v13532_v50  ;;  %10381 = vmatprep.subr.mxu0 %v13532_v50 }
  0xcf   :  { %10390 = vmatprep.subr.mxu1 %v13532_v50  ;;  %10377 = vmatmul.mubr.f32.vlgmr.msra.gmra.mxu1 %v11923_v25  ;;  %v12149_v25 = vsub.f32 %v1745_v17, %v12139_v21 }
  0xd0   :  { %10382 = vmatpush3.msra.mxu0 %v11958_v43  ;;  %10391 = vmatpush3.msra.mxu1 %v1367_v0 }
  0xd1   :  { %10383 = vmatprep.subr.mxu0 %v13532_v50  ;;  %10392 = vmatprep.subr.mxu1 %v13532_v50  ;;  %v12156_v28 = vand.u32 4294901760, %v12149_v25 }
  0xd2   :  { %10384 = vmatpush3.msra.mxu0 %v11971_v49  ;;  %10393 = vmatpush3.msra.mxu1 %v1374_v3 }
  0xd3   :  { %10385 = vmatprep.subr.mxu0 %v13532_v50  ;;  %10394 = vmatprep.subr.mxu1 %v13532_v50  ;;  %v1900_v30 = vsub.f32 %v12149_v25, %v12156_v28 }
  0xd4   :  { %10386 = vmatpush3.msra.mxu0 %v11983_v53  ;;  %10387 = vmatprep.mubr.msk.f32.mxu0 %vm11700_vm4, %v13532_v50 }
  0xd5   :  { %10395 = vmatpush3.msra.mxu1 %v1381_v5  ;;  %10388 = vmatmul.mubr.f32.vlgmr.msra.gmra.mxu0 %v1332_v6  ;;  %v1901_v31 = vand.u32 4294901760, %v1900_v30 }
  0xd6   :  { %10396 = vmatprep.subr.mxu1 %v13532_v50  ;;  %10401 = vmatprep.subr.mxu0 %v13532_v50 }
  0xd7   :  { %10397 = vmatpush3.msra.mxu1 %v1388_v7  ;;  %10398 = vmatprep.mubr.msk.f32.mxu1 %vm11700_vm4, %v13532_v50  ;;  %v9749_v7 = vld [vmem:[#allocation8] ss:$0 sm:$0xff] }
  0xd8   :  { %10402 = vmatpush3.msra.mxu0 %v11969_v48  ;;  %10399 = vmatmul.mubr.f32.vlgmr.msra.gmra.mxu1 %v11975_v51 }
  0xd9   :  { %10403 = vmatprep.subr.mxu0 %v13532_v50  ;;  %10412 = vmatprep.subr.mxu1 %v13532_v50 }
  0xda   :  { %10404 = vmatpush3.msra.mxu0 %v11981_v52  ;;  %10413 = vmatpush3.msra.mxu1 %v11950_v41 }
  0xdb   :  { %10405 = vmatprep.subr.mxu0 %v13532_v50  ;;  %10414 = vmatprep.subr.mxu1 %v13532_v50 }
  0xdc   :  { %10406 = vmatpush3.msra.mxu0 %v11990_v55  ;;  %10415 = vmatpush3.msra.mxu1 %v11958_v43 }
  0xdd   :  { %10407 = vmatprep.subr.mxu0 %v13532_v50  ;;  %10416 = vmatprep.subr.mxu1 %v13532_v50 }
  0xde   :  { %10408 = vmatpush3.msra.mxu0 %v12002_v58  ;;  %10409 = vmatprep.mubr.msk.f32.mxu0 %vm11700_vm4, %v13532_v50 }
  0xdf   :  { %10417 = vmatpush3.msra.mxu1 %v11971_v49  ;;  %10410 = vmatmul.mubr.f32.vlgmr.msra.gmra.mxu0 %v11995_v56 }
  0xe0   :  { %10418 = vmatprep.subr.mxu1 %v13532_v50  ;;  %10423 = vmatprep.subr.mxu0 %v13532_v50 }
  0xe1   :  { %10419 = vmatpush3.msra.mxu1 %v11983_v53  ;;  %10420 = vmatprep.mubr.msk.f32.mxu1 %vm11700_vm4, %v13532_v50 }
  0xe2   :  { %10424 = vmatpush3.msra.mxu0 %v1365_v54  ;;  %10421 = vmatmul.mubr.f32.vlgmr.msra.gmra.mxu1 %v1330_v61 }
  0xe3   :  { %10425 = vmatprep.subr.mxu0 %v13532_v50  ;;  %10434 = vmatprep.subr.mxu1 %v13532_v50 }
  0xe4   :  { %10426 = vmatpush3.msra.mxu0 %v1372_v57  ;;  %10435 = vmatpush3.msra.mxu1 %v11950_v41 }
  0xe5   :  { %10427 = vmatprep.subr.mxu0 %v13532_v50  ;;  %10436 = vmatprep.subr.mxu1 %v13532_v50 }
  0xe6   :  { %10428 = vmatpush3.msra.mxu0 %v1379_v60  ;;  %10437 = vmatpush3.msra.mxu1 %v11958_v43 }
  0xe7   :  { %10429 = vmatprep.subr.mxu0 %v13532_v50  ;;  %10438 = vmatprep.subr.mxu1 %v13532_v50 }
  0xe8   :  { %10430 = vmatpush3.msra.mxu0 %v1386_v63  ;;  %10431 = vmatprep.mubr.msk.f32.mxu0 %vm11700_vm4, %v13532_v50 }
  0xe9   :  { %10439 = vmatpush3.msra.mxu1 %v11971_v49  ;;  %10432 = vmatmul.mubr.f32.vlgmr.msra.gmra.mxu0 %v11975_v51 }
  0xea   :  { %10440 = vmatprep.subr.mxu1 %v13532_v50  ;;  %10442 = vmatprep.mubr.msk.f32.mxu1 %vm11700_vm4, %v13532_v50 }
  0xeb   :  { %10441 = vmatpush3.msra.mxu1 %v11983_v53  ;;  %10445 = vmatprep.subr.mxu0 %v12103_v9 }
  0xec   :  { %10443 = vmatmul.mubr.f32.vlgmr.msra.gmra.mxu1 %v11975_v51  ;;  %10446 = vmatpush3.msra.mxu0 %v12103_v9 }
  0xed   :  { %10447 = vmatprep.subr.mxu0 %v12111_v12  ;;  %10456 = vmatprep.subr.mxu1 %v1880_v22 }
  0xee   :  { %10448 = vmatpush3.msra.mxu0 %v12111_v12  ;;  %10457 = vmatpush3.msra.mxu1 %v1880_v22 }
  0xef   :  { %10449 = vmatprep.subr.mxu0 %v12124_v16  ;;  %10458 = vmatprep.subr.mxu1 %v1887_v26 }
  0xf0   :  { %10450 = vmatpush3.msra.mxu0 %v12124_v16  ;;  %10459 = vmatpush3.msra.mxu1 %v1887_v26 }
  0xf1   :  { %10451 = vmatprep.subr.mxu0 %v12139_v21  ;;  %10460 = vmatprep.subr.mxu1 %v1894_v29 }
  0xf2   :  { %10452 = vmatpush3.msra.mxu0 %v12139_v21  ;;  %10461 = vmatpush3.msra.mxu1 %v1894_v29 }
  0xf3   :  { %10467 = vmatprep.subr.mxu0 %v12109_v11  ;;  %10462 = vmatprep.subr.mxu1 %v1901_v31 }
  0xf4   :  { %10463 = vmatpush3.msra.mxu1 %v1901_v31 }
  0xf5   :  { %10478 = vmatprep.subr.mxu1 %v12103_v9 }
 0x175   :  { %v10313_v32 = vpop.f32.mrf.mxu0 }
 0x176   :  { %v10320_v34 = vpop.f32.mrf.mxu1 }
 0x177   :  { %v342_v33 = vpop.f32.mrf.mxu0  ;;  %v440_v41 = vadd.f32 %v10320_v34, %v10313_v32 }
 0x178   :  { %v433_v35 = vpop.f32.mrf.mxu1 }
 0x179   :  { %v10327_v36 = vpop.f32.mrf.mxu0  ;;  %v434_v42 = vadd.f32 %v433_v35, %v342_v33  ;;  %v9751_v35 = vld [vmem:[#allocation11] ss:$0 sm:$0xff] }
 0x17a   :  { %v523_v47 = vadd.f32 %v10327_v36, %v440_v41 }
 0x17b   :  { %v515_v37 = vpop.f32.mrf.mxu0 }
 0x17c   :  { %v10334_v38 = vpop.f32.mrf.mxu1  ;;  %v516_v48 = vadd.f32 %v515_v37, %v434_v42  ;;  %v257_v42 = vld [vmem:[%s13573_s10 + $0x8] sm:$0xff] }
 0x17d   :  { %v606_v55 = vadd.f32 %v10334_v38, %v523_v47  ;;  %v256_v38 = vld [vmem:[%s13573_s10] sm:$0xff] }
 0x17e   :  { %v597_v39 = vpop.f32.mrf.mxu1 }
 0x17f   :  { %v10341_v40 = vpop.f32.mrf.mxu0  ;;  %v598_v56 = vadd.f32 %v597_v39, %v516_v48  ;;  %v2295_v48 = vsel %vm2290_vm5, %v257_v42, 0 }
 0x180   :  { %v689_v62 = vadd.f32 %v10341_v40, %v606_v55  ;;  %v12215_v55 = vand.u32 4294901760, %v2295_v48 }
 0x181   :  { %v682_v43 = vpop.f32.mrf.mxu0 }
 0x182   :  { %v10348_v44 = vpop.f32.mrf.mxu1  ;;  %v683_v63 = vadd.f32 %v682_v43, %v598_v56  ;;  %v2292_v43 = vsel %vm2290_vm5, %v256_v38, 0 }
 0x183   :  { %v768_v4 = vadd.f32 %v10348_v44, %v689_v62 }
 0x184   :  { %v761_v45 = vpop.f32.mrf.mxu1  ;;  %v853_v46 = vpop.f32.mrf.mxu0 }
 0x185   :  { %v762_v5 = vadd.f32 %v761_v45, %v683_v63 }
 0x186   :  { %v10353_v49 = vpop.f32.mrf.mxu0  ;;  %v929_v51 = vpop.f32.mrf.mxu1 }
 0x187   :  { %v930_v52 = vadd.f32 %v929_v51, %v853_v46  ;;  %v12207_v49 = vand.u32 4294901760, %v2292_v43 }
 0x188   :  { %v10358_v53 = vpop.f32.mrf.mxu1  ;;  %v1003_v54 = vpop.f32.mrf.mxu0 }
 0x189   :  { %v1004_v57 = vadd.f32 %v1003_v54, %v930_v52  ;;  %v12220_v56 = vsub.f32 %v2292_v43, %v12207_v49 }
 0x18a   :  { %v10363_v58 = vpop.f32.mrf.mxu0  ;;  %v1077_v59 = vpop.f32.mrf.mxu1 }
 0x18b   :  { %v1078_v60 = vadd.f32 %v1077_v59, %v1004_v57  ;;  %v12234_v58 = vand.u32 4294901760, %v12220_v56 }
 0x18c   :  { %v10368_v61 = vpop.f32.mrf.mxu1  ;;  %v1151_v0 = vpop.f32.mrf.mxu0 }
 0x18d   :  { %v1152_v1 = vadd.f32 %v1151_v0, %v1078_v60 }
 0x18e   :  { %v10373_v2 = vpop.f32.mrf.mxu0 }
 0x18f   :  { %v1223_v3 = vpop.f32.mrf.mxu1 }
 0x190   :  { %v1224_v6 = vadd.f32 %v1223_v3, %v1152_v1 }
 0x191   :  { %v10378_v8 = vpop.f32.mrf.mxu1 }
 0x192   :  { %v1227_v10 = vadd.f32 %v1224_v6, %v762_v5  ;;  %v1228_v13 = vadd.f32 %v1224_v6, %v768_v4  ;;  %v253_v4 = vld [vmem:[%s13574_s2 + $0x10] sm:$0xff] }
 0x193   :  { %v12286_v6 = vand.u32 4294901760, %v253_v4 }
 0x194   :  { %v1236_v17 = vadd.f32 %v9749_v7, %v1227_v10  ;;  %v1237_v18 = vadd.f32 %v9749_v7, %v1228_v13  ;;  %v252_v7 = vld [vmem:[%s13574_s2 + $0x8] sm:$0xff] }
 0x195   :  { %v1334_v22 = vpop.f32.mrf.mxu0  ;;  %v12297_v10 = vsub.f32 %v253_v4, %v12286_v6  ;;  %v12299_v13 = vand.u32 4294901760, %v252_v7 }
 0x196   :  { %v1757_v23 = vsel %vm1256_vm3, %v1236_v17, 0  ;;  %v1760_v26 = vsel %vm1256_vm3, %v1237_v18, 0  ;;  %v1335_v41 = vadd.f32 %v9751_v35, %v1334_v22  ;;  %v251_v17 = vld [vmem:[%s13574_s2] sm:$0xff] }
 0x197   :  { %v12164_v27 = vand.u32 4294901760, %v1757_v23  ;;  %v12166_v29 = vand.u32 4294901760, %v1760_v26  ;;  %v10389_v30 = vpop.f32.mrf.mxu0  ;;  %v12309_v22 = vand.u32 4294901760, %v12297_v10 }
 0x198   :  { %v1425_v31 = vpop.f32.mrf.mxu1 }
 0x199   :  { %v12169_v32 = vsub.f32 %v1757_v23, %v12164_v27  ;;  %v12172_v33 = vsub.f32 %v1760_v26, %v12166_v29  ;;  %10464 = vmatprep.mubr.f32.mxu1 %v12164_v27  ;;  %v1426_v51 = vadd.f32 %v1425_v31, %v1335_v41  ;;  %v12312_v23 = vsub.f32 %v252_v7, %v12299_v13 }
 0x19a   :  { %v10400_v34 = vpop.f32.mrf.mxu1  ;;  %10465 = vmatmul.mubr.f32.vlgmr.msra.gmra.mxu1 %v12166_v29  ;;  %v12314_v26 = vand.u32 4294901760, %v251_v17  ;;  %v2922_v31 = vsub.f32 %v12297_v10, %v12309_v22 }
 0x19b   :  { %10479 = vmatpush3.msra.mxu1 %v12103_v9  ;;  %v12178_v36 = vand.u32 4294901760, %v12169_v32  ;;  %v12181_v37 = vand.u32 4294901760, %v12172_v33  ;;  %v12323_v34 = vand.u32 4294901760, %v12312_v23 }
 0x19c   :  { %10480 = vmatprep.subr.mxu1 %v12111_v12  ;;  %v12326_v35 = vsub.f32 %v251_v17, %v12314_v26  ;;  %v12331_v38 = vand.u32 4294901760, %v2922_v31 }
 0x19d   :  { %10481 = vmatpush3.msra.mxu1 %v12111_v12  ;;  %10486 = vmatprep.mubr.f32.mxu1 %v12178_v36  ;;  %v1834_v39 = vsub.f32 %v12169_v32, %v12178_v36  ;;  %v1844_v40 = vsub.f32 %v12172_v33, %v12181_v37  ;;  %13575 = vst [vmem:[#allocation32_spill] sm:$0xff] %v12323_v34 }
 0x19e   :  { %10482 = vmatprep.subr.mxu1 %v12124_v16 }
 0x19f   :  { %v1505_v44 = vpop.f32.mrf.mxu0  ;;  %10483 = vmatpush3.msra.mxu1 %v12124_v16  ;;  %v12199_v45 = vand.u32 4294901760, %v1834_v39  ;;  %v12201_v46 = vand.u32 4294901760, %v1844_v40  ;;  %v2929_v39 = vsub.f32 %v12312_v23, %v12323_v34  ;;  %v12336_v40 = vand.u32 4294901760, %v12326_v35 }
 0x1a0   :  { %10484 = vmatprep.subr.mxu1 %v12139_v21  ;;  %v1506_v53 = vadd.f32 %v1505_v44, %v1426_v51 }
 0x1a1   :  { %v10411_v47 = vpop.f32.mrf.mxu0  ;;  %10485 = vmatpush3.msra.mxu1 %v12139_v21  ;;  %10453 = vmatprep.mubr.f32.mxu0 %v12199_v45  ;;  %13576 = vst [vmem:[#allocation33_spill] sm:$0xff] %v12336_v40  ;;  %v12341_v41 = vand.u32 4294901760, %v2929_v39  ;;  %v2936_v42 = vsub.f32 %v12326_v35, %v12336_v40 }
 0x1a2   :  { %v1582_v52 = vpop.f32.mrf.mxu1  ;;  %10487 = vmatmul.mubr.f32.vlgmr.msra.gmra.mxu1 %v12181_v37  ;;  %10500 = vmatprep.subr.mxu1 %v12103_v9 }
 0x1a3   :  { %10454 = vmatmul.mubr.f32.vlgmr.msra.gmra.mxu0 %v12201_v46  ;;  %10501 = vmatpush3.msra.mxu1 %v12103_v9  ;;  %v1583_v9 = vadd.f32 %v1582_v52, %v1506_v53  ;;  %v12347_v43 = vand.u32 4294901760, %v2936_v42 }
 0x1a4   :  { %v10422_v54 = vpop.f32.mrf.mxu1  ;;  %10468 = vmatpush3.msra.mxu0 %v12109_v11  ;;  %10508 = vmatprep.mubr.f32.mxu1 %v12164_v27  ;;  %v12229_v11 = vsub.f32 %v2295_v48, %v12215_v55 }
 0x1a5   :  { %10469 = vmatprep.subr.mxu0 %v12122_v15  ;;  %10475 = vmatprep.mubr.f32.mxu0 %v12169_v32  ;;  %13577 = vst [vmem:[#allocation34_spill] sm:$0xff] %v12347_v43 }
 0x1a6   :  { %10502 = vmatprep.subr.mxu1 %v12111_v12  ;;  %10470 = vmatpush3.msra.mxu0 %v12122_v15 }
 0x1a7   :  { %10503 = vmatpush3.msra.mxu1 %v12111_v12  ;;  %10471 = vmatprep.subr.mxu0 %v12137_v20 }
 0x1a8   :  { %10504 = vmatprep.subr.mxu1 %v12124_v16  ;;  %10472 = vmatpush3.msra.mxu0 %v12137_v20 }
 0x1a9   :  { %v1665_v57 = vpop.f32.mrf.mxu0  ;;  %10505 = vmatpush3.msra.mxu1 %v12124_v16  ;;  %10473 = vmatprep.subr.mxu0 %v12149_v25  ;;  %v12243_v16 = vand.u32 4294901760, %v12229_v11 }
 0x1aa   :  { %v1666_v15 = vadd.f32 %v1665_v57, %v1583_v9  ;;  %10506 = vmatprep.subr.mxu1 %v12139_v21  ;;  %10474 = vmatpush3.msra.mxu0 %v12149_v25  ;;  %v2370_v25 = vsub.f32 %v12220_v56, %v12234_v58  ;;  %v9752_v9 = vld [vmem:[#allocation13] ss:$0 sm:$0xff] }
 0x1ab   :  { %v10433_v12 = vpop.f32.mrf.mxu0  ;;  %10507 = vmatpush3.msra.mxu1 %v12139_v21  ;;  %10476 = vmatmul.mubr.f32.vlgmr.msra.gmra.mxu0 %v12172_v33  ;;  %v2380_v62 = vsub.f32 %v12229_v11, %v12243_v16 }
 0x1ac   :  { %v1740_v59 = vpop.f32.mrf.mxu1  ;;  %10489 = vmatprep.subr.mxu0 %v12119_v14  ;;  %10509 = vmatmul.mubr.f32.vlgmr.msra.gmra.mxu1 %v12166_v29  ;;  %v12257_v63 = vand.u32 4294901760, %v2370_v25 }
 0x1ad   :  { %v1741_v20 = vadd.f32 %v1740_v59, %v1666_v15  ;;  %10490 = vmatpush3.msra.mxu0 %v12119_v14  ;;  %10497 = vmatprep.mubr.f32.mxu0 %v12164_v27 }
 0x1ae   :  { %v10444_v60 = vpop.f32.mrf.mxu1  ;;  %10491 = vmatprep.subr.mxu0 %v12134_v19  ;;  %10518 = vmatprep.mubr.f32.mxu1 %v12207_v49 }
 0x1af   :  { %v1744_v21 = vmul.f32 0.35355338, %v1741_v20  ;;  %10492 = vmatpush3.msra.mxu0 %v12134_v19  ;;  %v12262_v19 = vand.u32 4294901760, %v2380_v62 }
 0x1b0   :  { %10493 = vmatprep.subr.mxu0 %v12146_v24 }
 0x1b1   :  { %v2299_v61 = vsel %vm2297_vm6, %v1744_v21, 0  ;;  %10494 = vmatpush3.msra.mxu0 %v12146_v24 }
 0x1b2   :  { %v2332_v14 = vand.u32 4294901760, %v2299_v61  ;;  %10495 = vmatprep.subr.mxu0 %v12156_v28 }
 0x1b3   :  { %10496 = vmatpush3.msra.mxu0 %v12156_v28  ;;  %v254_v28 = vld [vmem:[%s13574_s2 + $0x18] sm:$0xff] }
 0x1b4   :  { %v2419_v0 = vsub.f32 %v2299_v61, %v2332_v14  ;;  %10498 = vmatmul.mubr.f32.vlgmr.msra.gmra.mxu0 %v12166_v29  ;;  %10511 = vmatprep.subr.mxu0 %v2332_v14  ;;  %v12278_v3 = vand.u32 4294901760, %v254_v28 }
 0x1b5   :  { %10512 = vmatpush3.msra.mxu0 %v2332_v14  ;;  %10513 = vmatprep.mubr.f32.mxu0 %v12257_v63 }
 0x1b6   :  { %v2420_v1 = vand.u32 4294901760, %v2419_v0  ;;  %10521 = vmatprep.subr.mxu0 %v2419_v0  ;;  %v12284_v5 = vsub.f32 %v254_v28, %v12278_v3 }
 0x1b8   :  { %v2421_v2 = vsub.f32 %v2419_v0, %v2420_v1  ;;  %10514 = vmatmul.mubr.f32.vlgmr.msra.gmra.mxu0 %v12262_v19  ;;  %v12294_v8 = vand.u32 4294901760, %v12284_v5 }
 0x1b9   :  { %10522 = vmatpush3.msra.mxu0 %v2419_v0  ;;  %10523 = vmatprep.mubr.f32.mxu0 %v12220_v56 }
 0x1ba   :  { %v2422_v24 = vand.u32 4294901760, %v2421_v2  ;;  %10531 = vmatprep.subr.mxu0 %v2420_v1  ;;  %v2915_v18 = vsub.f32 %v12284_v5, %v12294_v8 }
 0x1bc   :  { %10516 = vmatprep.subr.mxu1 %v2422_v24  ;;  %10524 = vmatmul.mubr.f32.vlgmr.msra.gmra.mxu0 %v12229_v11  ;;  %v12318_v30 = vand.u32 4294901760, %v2915_v18 }
 0x1bd   :  { %10517 = vmatpush3.msra.mxu1 %v2422_v24  ;;  %10532 = vmatpush3.msra.mxu0 %v2420_v1 }
 0x1be   :  { %10519 = vmatmul.mubr.f32.vlgmr.msra.gmra.mxu1 %v12215_v55  ;;  %10526 = vmatprep.subr.mxu1 %v2332_v14 }
 0x1bf   :  { %10527 = vmatpush3.msra.mxu1 %v2332_v14  ;;  %10528 = vmatprep.mubr.f32.mxu1 %v12234_v58 }
 0x1c0   :  { %10536 = vmatprep.subr.mxu1 %v2332_v14  ;;  %10533 = vmatprep.mubr.f32.mxu0 %v12207_v49 }
 0x1c1   :  { %10534 = vmatmul.mubr.f32.vlgmr.msra.gmra.mxu0 %v12215_v55  ;;  %10541 = vmatprep.subr.mxu0 %v12278_v3 }
 0x1c2   :  { %10529 = vmatmul.mubr.f32.vlgmr.msra.gmra.mxu1 %v12243_v16  ;;  %10542 = vmatpush3.msra.mxu0 %v12278_v3 }
 0x1c3   :  { %10537 = vmatpush3.msra.mxu1 %v2332_v14  ;;  %10538 = vmatprep.mubr.f32.mxu1 %v12207_v49 }
 0x1c4   :  { %10543 = vmatprep.subr.mxu0 %v12286_v6  ;;  %10552 = vmatprep.subr.mxu1 %v12318_v30 }
 0x1c5   :  { %10544 = vmatpush3.msra.mxu0 %v12286_v6 }
 0x1c6   :  { %10539 = vmatmul.mubr.f32.vlgmr.msra.gmra.mxu1 %v12215_v55  ;;  %10545 = vmatprep.subr.mxu0 %v12299_v13 }
 0x1c7   :  { %10546 = vmatpush3.msra.mxu0 %v12299_v13  ;;  %10553 = vmatpush3.msra.mxu1 %v12318_v30 }
 0x1c8   :  { %10547 = vmatprep.subr.mxu0 %v12314_v26  ;;  %10554 = vmatprep.subr.mxu1 %v12331_v38 }
 0x1c9   :  { %10548 = vmatpush3.msra.mxu0 %v12314_v26  ;;  %10555 = vmatpush3.msra.mxu1 %v12331_v38 }
 0x1ca   :  { %10563 = vmatprep.subr.mxu0 %v12284_v5  ;;  %10556 = vmatprep.subr.mxu1 %v12341_v41 }
 0x1cb   :  { %10557 = vmatpush3.msra.mxu1 %v12341_v41 }
 0x1cc   :  { %10558 = vmatprep.subr.mxu1 %v12347_v43 }
 0x1cd   :  { %10559 = vmatpush3.msra.mxu1 %v12347_v43 }
 0x1ce   :  { %10574 = vmatprep.subr.mxu1 %v12278_v3 }
 0x25a   :  { %v10466_v47 = vpop.f32.mrf.mxu1 }
 0x25c   :  { %v1938_v52 = vpop.f32.mrf.mxu1 }
 0x262   :  { %v10488_v53 = vpop.f32.mrf.mxu1 }
 0x263   :  { %v10455_v44 = vpop.f32.mrf.mxu0 }
 0x264   :  { %v2108_v15 = vpop.f32.mrf.mxu1  ;;  %v1848_v12 = vadd.f32 %v10455_v44, %v9752_v9 }
 0x265   :  { %v1837_v48 = vpop.f32.mrf.mxu0 }
 0x266   :  { %v1838_v60 = vadd.f32 %v9752_v9, %v1837_v48  ;;  %v1945_v21 = vadd.f32 %v10466_v47, %v1848_v12 }
 0x268   :  { %v1939_v0 = vadd.f32 %v1938_v52, %v1838_v60 }
 0x26b   :  { %v10477_v51 = vpop.f32.mrf.mxu0 }
 0x26c   :  { %v10510_v20 = vpop.f32.mrf.mxu1  ;;  %v2032_v14 = vadd.f32 %v10477_v51, %v1945_v21 }
 0x26d   :  { %v2024_v54 = vpop.f32.mrf.mxu0 }
 0x26e   :  { %v2280_v62 = vpop.f32.mrf.mxu1  ;;  %v2025_v24 = vadd.f32 %v2024_v54, %v1939_v0  ;;  %v2117_v17 = vadd.f32 %v10488_v53, %v2032_v14 }
 0x270   :  { %v2109_v50 = vadd.f32 %v2108_v15, %v2025_v24 }
 0x274   :  { %v10499_v57 = vpop.f32.mrf.mxu0 }
 0x275   :  { %v2206_v44 = vadd.f32 %v10499_v57, %v2117_v17  ;;  %v255_v17 = vld [vmem:[%s13578_s14] sm:$0xf] }
 0x276   :  { %v2199_v59 = vpop.f32.mrf.mxu0 }
 0x277   :  { %v2200_v43 = vadd.f32 %v2199_v59, %v2109_v50  ;;  %v12353_v21 = vadd.f32 %v10510_v20, %v2206_v44 }
 0x278   :  { %v10515_v25 = vpop.f32.mrf.mxu0 }
 0x279   :  { %v12355_v53 = vadd.f32 %v2280_v62, %v2200_v43 }
 0x27a   :  { %v2373_v61 = vpop.f32.mrf.mxu0 }
 0x27c   :  { %v10525_v1 = vpop.f32.mrf.mxu0 }
 0x27e   :  { %v10520_v2 = vpop.f32.mrf.mxu1  ;;  %v2539_v4 = vpop.f32.mrf.mxu0 }
 0x27f   :  { %v2466_v28 = vadd.f32 %v10520_v2, %v10515_v25 }
 0x280   :  { %v2459_v7 = vpop.f32.mrf.mxu1 }
 0x281   :  { %v2547_v18 = vadd.f32 %v10525_v1, %v2466_v28  ;;  %v2460_v31 = vadd.f32 %v2459_v7, %v2373_v61  ;;  %v10535_v42 = vpop.f32.mrf.mxu0 }
 0x282   :  { %v10530_v39 = vpop.f32.mrf.mxu1 }
 0x283   :  { %v2540_v48 = vadd.f32 %v2539_v4, %v2460_v31  ;;  %v2629_v9 = vadd.f32 %v10530_v39, %v2547_v18  ;;  %v2702_v12 = vpop.f32.mrf.mxu0  ;;  %v3377_v18 = vsel %vm777_vm2, %v255_v17, 0 }
 0x284   :  { %v2620_v47 = vpop.f32.mrf.mxu1  ;;  %v12391_v31 = vand.u32 4294901760, %v3377_v18 }
 0x285   :  { %v2709_v51 = vadd.f32 %v10535_v42, %v2629_v9  ;;  %v2621_v52 = vadd.f32 %v2620_v47, %v2540_v48 }
 0x286   :  { %v10540_v60 = vpop.f32.mrf.mxu1  ;;  %13579 = vst [vmem:[#allocation35_spill] sm:$0xff] %v12391_v31  ;;  %v12398_v39 = vsub.f32 %v3377_v18, %v12391_v31 }
 0x287   :  { %v2703_v54 = vadd.f32 %v2702_v12, %v2621_v52  ;;  %v2787_v25 = vadd.f32 %v10540_v60, %v2709_v51 }
 0x288   :  { %v2780_v0 = vpop.f32.mrf.mxu1  ;;  %13580 = vst [vmem:[#allocation36_spill] sm:$0xff] %v12398_v39  ;;  %v12404_v42 = vand.u32 4294901760, %v12398_v39 }
 0x289   :  { %v2791_v61 = vmul.f32 %v2787_v25, %v12353_v21  ;;  %v2781_v14 = vadd.f32 %v2780_v0, %v2703_v54 }
 0x28a   :  { %13581 = vst [vmem:[#allocation37_spill] sm:$0xff] %v12404_v42  ;;  %v3499_v44 = vsub.f32 %v12398_v39, %v12404_v42 }
 0x28b   :  { %v2796_v57 = vsel %vm1256_vm3, %v2791_v61, 0  ;;  %v2790_v15 = vmul.f32 %v2781_v14, %v12355_v53 }
 0x28c   :  { %v2877_v1 = vand.u32 4294901760, %v2796_v57  ;;  %v12408_v48 = vand.u32 4294901760, %v3499_v44 }
 0x28d   :  { %v2793_v50 = vsel %vm1256_vm3, %v2790_v15, 0 }
 0x28e   :  { %v2878_v59 = vsub.f32 %v2796_v57, %v2877_v1  ;;  %v2867_v2 = vand.u32 4294901760, %v2793_v50 }
 0x290   :  { %v2868_v24 = vsub.f32 %v2793_v50, %v2867_v2  ;;  %10560 = vmatprep.mubr.f32.mxu1 %v2867_v2  ;;  %v2879_v20 = vand.u32 4294901760, %v2878_v59 }
 0x291   :  { %10561 = vmatmul.mubr.f32.vlgmr.msra.gmra.mxu1 %v2877_v1 }
 0x292   :  { %10575 = vmatpush3.msra.mxu1 %v12278_v3  ;;  %v2869_v43 = vand.u32 4294901760, %v2868_v24  ;;  %v2880_v28 = vsub.f32 %v2878_v59, %v2879_v20 }
 0x293   :  { %10576 = vmatprep.subr.mxu1 %v12286_v6 }
 0x294   :  { %10577 = vmatpush3.msra.mxu1 %v12286_v6  ;;  %10582 = vmatprep.mubr.f32.mxu1 %v2869_v43  ;;  %v2870_v62 = vsub.f32 %v2868_v24, %v2869_v43  ;;  %v2881_v7 = vand.u32 4294901760, %v2880_v28 }
 0x295   :  { %10578 = vmatprep.subr.mxu1 %v12299_v13 }
 0x296   :  { %10579 = vmatpush3.msra.mxu1 %v12299_v13  ;;  %v2871_v4 = vand.u32 4294901760, %v2870_v62 }
 0x297   :  { %10580 = vmatprep.subr.mxu1 %v12314_v26 }
 0x298   :  { %10581 = vmatpush3.msra.mxu1 %v12314_v26  ;;  %10549 = vmatprep.mubr.f32.mxu0 %v2871_v4 }
 0x299   :  { %10583 = vmatmul.mubr.f32.vlgmr.msra.gmra.mxu1 %v2879_v20  ;;  %10596 = vmatprep.subr.mxu1 %v12278_v3 }
 0x29a   :  { %10550 = vmatmul.mubr.f32.vlgmr.msra.gmra.mxu0 %v2881_v7  ;;  %10597 = vmatpush3.msra.mxu1 %v12278_v3 }
 0x29b   :  { %10564 = vmatpush3.msra.mxu0 %v12284_v5  ;;  %10604 = vmatprep.mubr.f32.mxu1 %v2867_v2 }
 0x29c   :  { %10565 = vmatprep.subr.mxu0 %v12297_v10  ;;  %10571 = vmatprep.mubr.f32.mxu0 %v2868_v24 }
 0x29d   :  { %10598 = vmatprep.subr.mxu1 %v12286_v6  ;;  %10566 = vmatpush3.msra.mxu0 %v12297_v10 }
 0x29e   :  { %10599 = vmatpush3.msra.mxu1 %v12286_v6  ;;  %10567 = vmatprep.subr.mxu0 %v12312_v23 }
 0x29f   :  { %10600 = vmatprep.subr.mxu1 %v12299_v13  ;;  %10568 = vmatpush3.msra.mxu0 %v12312_v23 }
 0x2a0   :  { %10601 = vmatpush3.msra.mxu1 %v12299_v13  ;;  %10569 = vmatprep.subr.mxu0 %v12326_v35 }
 0x2a1   :  { %10602 = vmatprep.subr.mxu1 %v12314_v26  ;;  %10570 = vmatpush3.msra.mxu0 %v12326_v35 }
 0x2a2   :  { %10603 = vmatpush3.msra.mxu1 %v12314_v26  ;;  %10572 = vmatmul.mubr.f32.vlgmr.msra.gmra.mxu0 %v2878_v59 }
 0x2a3   :  { %10585 = vmatprep.subr.mxu0 %v12294_v8  ;;  %10605 = vmatmul.mubr.f32.vlgmr.msra.gmra.mxu1 %v2877_v1 }
 0x2a4   :  { %10586 = vmatpush3.msra.mxu0 %v12294_v8  ;;  %10593 = vmatprep.mubr.f32.mxu0 %v2867_v2 }
 0x2a5   :  { %10587 = vmatprep.subr.mxu0 %v12309_v22  ;;  %10612 = vmatprep.subr.mxu1 %v12408_v48 }
 0x2a6   :  { %10588 = vmatpush3.msra.mxu0 %v12309_v22  ;;  %10613 = vmatpush3.msra.mxu1 %v12408_v48 }
 0x2a7   :  { %10589 = vmatprep.subr.mxu0 %v12323_v34  ;;  %10622 = vmatprep.subr.mxu1 %v12391_v31 }
 0x2a8   :  { %10590 = vmatpush3.msra.mxu0 %v12323_v34 }
 0x2a9   :  { %10591 = vmatprep.subr.mxu0 %v12336_v40 }
 0x2aa   :  { %10592 = vmatpush3.msra.mxu0 %v12336_v40 }
 0x2ab   :  { %10594 = vmatmul.mubr.f32.vlgmr.msra.gmra.mxu0 %v2877_v1  ;;  %10607 = vmatprep.subr.mxu0 %v12391_v31 }
 0x2ac   :  { %10608 = vmatpush3.msra.mxu0 %v12391_v31 }
 0x2ad   :  { %10617 = vmatprep.subr.mxu0 %v12398_v39 }
 0x351   :  { %v10562_v47 = vpop.f32.mrf.mxu1 }
 0x353   :  { %v2974_v52 = vpop.f32.mrf.mxu1 }
 0x359   :  { %v10584_v54 = vpop.f32.mrf.mxu1 }
 0x35a   :  { %v10551_v9 = vpop.f32.mrf.mxu0 }
 0x35b   :  { %v2981_v60 = vadd.f32 %v10562_v47, %v10551_v9  ;;  %v3144_v57 = vpop.f32.mrf.mxu1 }
 0x35c   :  { %v2873_v12 = vpop.f32.mrf.mxu0 }
 0x35d   :  { %v2975_v0 = vadd.f32 %v2974_v52, %v2873_v12 }
 0x362   :  { %v10573_v51 = vpop.f32.mrf.mxu0 }
 0x363   :  { %v3068_v61 = vadd.f32 %v10573_v51, %v2981_v60  ;;  %v10606_v1 = vpop.f32.mrf.mxu1 }
 0x364   :  { %v3060_v25 = vpop.f32.mrf.mxu0 }
 0x365   :  { %v3061_v14 = vadd.f32 %v3060_v25, %v2975_v0  ;;  %v3153_v15 = vadd.f32 %v10584_v54, %v3068_v61  ;;  %v3316_v62 = vpop.f32.mrf.mxu1 }
 0x367   :  { %v3145_v2 = vadd.f32 %v3144_v57, %v3061_v14 }
 0x36b   :  { %v10595_v50 = vpop.f32.mrf.mxu0 }
 0x36c   :  { %v3242_v59 = vadd.f32 %v10595_v50, %v3153_v15 }
 0x36d   :  { %v3235_v24 = vpop.f32.mrf.mxu0 }
 0x36e   :  { %v3323_v20 = vadd.f32 %v10606_v1, %v3242_v59  ;;  %v3236_v43 = vadd.f32 %v3235_v24, %v3145_v2 }
 0x370   :  { %v3333_v28 = vsel %vm773_vm1, %v3323_v20, -inf  ;;  %v3317_v4 = vadd.f32 %v3316_v62, %v3236_v43 }
 0x371   :  { %v3334_v7 = vrot.slane %v3333_v28, 4 }
 0x372   :  { %v3326_v17 = vsel %vm773_vm1, %v3317_v4, -inf }
 0x373   :  { %v3335_v18 = vmax.f32 %v3333_v28, %v3334_v7  ;;  %v3327_v44 = vrot.slane %v3326_v17, 4 }
 0x375   :  { %v3336_v9 = vrot.slane %v3335_v18, 2  ;;  %v3328_v47 = vmax.f32 %v3326_v17, %v3327_v44 }
 0x377   :  { %v3337_v12 = vmax.f32 %v3335_v18, %v3336_v9  ;;  %v3329_v51 = vrot.slane %v3328_v47, 2 }
 0x379   :  { %v3338_v52 = vrot.slane %v3337_v12, 1  ;;  %v3330_v60 = vmax.f32 %v3328_v47, %v3329_v51 }
 0x37b   :  { %v3339_v54 = vmax.f32 %v3337_v12, %v3338_v52  ;;  %v3331_v25 = vrot.slane %v3330_v60, 1 }
 0x37d   :  { %v3341_v0 = vsub.f32 %v3323_v20, %v3339_v54  ;;  %v3332_v61 = vmax.f32 %v3330_v60, %v3331_v25 }
 0x37f   :  { %v3344_v14 = vmul.f32 1.442695, %v3341_v0  ;;  %v3340_v57 = vsub.f32 %v3317_v4, %v3332_v61 }
 0x381   :  { %11359 = vpow2.f32 %v3344_v14  ;;  %v3342_v15 = vmul.f32 1.442695, %v3340_v57 }
 0x383   :  { %11361 = vpow2.f32 %v3342_v15 }
 0x38e   :  { %v11360_v1 = vpop.eup %11359 }
 0x38f   :  { %v3353_v50 = vsel %vm773_vm1, %v11360_v1, 0.0 }
 0x390   :  { %v11362_v59 = vpop.eup %11361  ;;  %v3354_v2 = vrot.slane %v3353_v50, 4 }
 0x391   :  { %v3346_v24 = vsel %vm773_vm1, %v11362_v59, 0.0 }
 0x392   :  { %v3355_v43 = vadd.f32 %v3354_v2, %v3353_v50  ;;  %v3347_v62 = vrot.slane %v3346_v24, 4 }
 0x394   :  { %v3348_v28 = vadd.f32 %v3347_v62, %v3346_v24  ;;  %v3356_v7 = vrot.slane %v3355_v43, 2 }
 0x396   :  { %v3349_v17 = vrot.slane %v3348_v28, 2  ;;  %v3357_v18 = vadd.f32 %v3356_v7, %v3355_v43 }
 0x398   :  { %v3350_v20 = vadd.f32 %v3349_v17, %v3348_v28  ;;  %v3358_v44 = vrot.slane %v3357_v18, 1 }
 0x39a   :  { %v3351_v9 = vrot.slane %v3350_v20, 1  ;;  %v3359_v4 = vadd.f32 %v3358_v44, %v3357_v18  ;;  %v3887_v44 = vld [vmem:[%s13516_s13 + $0x18] sm:$0xff] }
 0x39c   :  { %v3352_v47 = vadd.f32 %v3351_v9, %v3350_v20  ;;  %11363 = vrcp.f32 %v3359_v4  ;;  %v13582_v20 = vmov 0.0   ;;  %v12434_v9 = vand.u32 4294901760, %v3887_v44 }
 0x39e   :  { %11365 = vrcp.f32 %v3352_v47 }
 0x3a9   :  { %v11364_v12 = vpop.eup %11363 }
 0x3aa   :  { %v3363_v51 = vmul.f32 %v11364_v12, %v3359_v4  ;;  %v3886_v4 = vld [vmem:[%s13516_s13 + $0x10] sm:$0xff] }
 0x3ab   :  { %v11366_v52 = vpop.eup %11365 }
 0x3ac   :  { %v3362_v60 = vmul.f32 %v11366_v52, %v3352_v47  ;;  %v3365_v54 = vsub.f32 2.0, %v3363_v51  ;;  %v12440_v47 = vsub.f32 %v3887_v44, %v12434_v9  ;;  %v3885_v51 = vld [vmem:[%s13516_s13 + $0x8] sm:$0xff] }
 0x3ae   :  { %v3364_v25 = vsub.f32 2.0, %v3362_v60  ;;  %v3367_v0 = vmul.f32 %v11364_v12, %v3365_v54  ;;  %v12442_v12 = vand.u32 4294901760, %v3886_v4  ;;  %v12453_v54 = vand.u32 4294901760, %v3885_v51 }
 0x3b0   :  { %v3366_v61 = vmul.f32 %v11366_v52, %v3364_v25  ;;  %v3369_v14 = vmul.f32 %v11360_v1, %v3367_v0  ;;  %v13539_v52 = vand.u32 4294901760, %v12440_v47  ;;  %v12451_v60 = vsub.f32 %v3886_v4, %v12442_v12  ;;  %v3884_v25 = vld [vmem:[%s13516_s13] sm:$0xff] }
 0x3b2   :  { %v3368_v57 = vmul.f32 %v11362_v59, %v3366_v61  ;;  %v3374_v15 = vsel %vm773_vm1, %v3369_v14, 0  ;;  %v4008_v0 = vsub.f32 %v12440_v47, %v13539_v52  ;;  %v13538_v61 = vand.u32 4294901760, %v12451_v60 }
 0x3b3   :  { %v3455_v50 = vand.u32 4294901760, %v3374_v15  ;;  %v12465_v14 = vsub.f32 %v3885_v51, %v12453_v54 }
 0x3b4   :  { %v3371_v2 = vsel %vm773_vm1, %v3368_v57, 0  ;;  %v12467_v57 = vand.u32 4294901760, %v3884_v25 }
 0x3b5   :  { %v3445_v24 = vand.u32 4294901760, %v3371_v2  ;;  %v3456_v43 = vsub.f32 %v3374_v15, %v3455_v50  ;;  %v4009_v15 = vand.u32 4294901760, %v4008_v0 }
 0x3b7   :  { %10614 = vmatprep.mubr.f32.mxu1 %v3445_v24  ;;  %v3446_v62 = vsub.f32 %v3371_v2, %v3445_v24  ;;  %v3457_v28 = vand.u32 4294901760, %v3456_v43  ;;  %v13537_v2 = vand.u32 4294901760, %v12465_v14 }
 0x3b8   :  { %10615 = vmatmul.mubr.f32.vlgmr.msra.gmra.mxu1 %v3455_v50 }
 0x3b9   :  { %10623 = vmatpush3.msra.mxu1 %v12391_v31  ;;  %v3447_v7 = vand.u32 4294901760, %v3446_v62  ;;  %v3458_v17 = vsub.f32 %v3456_v43, %v3457_v28 }
 0x3ba   :  { %10632 = vmatprep.subr.mxu1 %v12391_v31 }
 0x3bb   :  { %10624 = vmatprep.mubr.f32.mxu1 %v3447_v7  ;;  %v3448_v1 = vsub.f32 %v3446_v62, %v3447_v7  ;;  %v3459_v18 = vand.u32 4294901760, %v3458_v17 }
 0x3bc   :  { %10625 = vmatmul.mubr.f32.vlgmr.msra.gmra.mxu1 %v3457_v28 }
 0x3bd   :  { %10634 = vmatprep.mubr.f32.mxu1 %v3445_v24  ;;  %v3449_v59 = vand.u32 4294901760, %v3448_v1  ;;  %10633 = vmatpush3.msra.mxu1 %v12391_v31 }
 0x3be   :  { %10648 = vmatprep.subr.mxu1 %v13582_v20 }
 0x3bf   :  { %10609 = vmatprep.mubr.f32.mxu0 %v3449_v59 }
 0x3c0   :  { %10610 = vmatmul.mubr.f32.vlgmr.msra.gmra.mxu0 %v3459_v18  ;;  %10635 = vmatmul.mubr.f32.vlgmr.msra.gmra.mxu1 %v3455_v50 }
 0x3c1   :  { %10619 = vmatprep.mubr.f32.mxu0 %v3446_v62  ;;  %10618 = vmatpush3.msra.mxu0 %v12398_v39  ;;  %v4022_v62 = vsub.f32 %v12465_v14, %v13537_v2 }
 0x3c2   :  { %10627 = vmatprep.subr.mxu0 %v12404_v42  ;;  %10656 = vmatprep.mubr.msk.f32.mxu1 %vm11700_vm4, %v13582_v20 }
 0x3c3   :  { %10649 = vmatpush3.msra.mxu1 %v4009_v15  ;;  %v4023_v7 = vand.u32 4294901760, %v4022_v62 }
 0x3c4   :  { %10620 = vmatmul.mubr.f32.vlgmr.msra.gmra.mxu0 %v3456_v43  ;;  %10650 = vmatprep.subr.mxu1 %v13582_v20 }
 0x3c5   :  { %10629 = vmatprep.mubr.f32.mxu0 %v3445_v24  ;;  %10628 = vmatpush3.msra.mxu0 %v12404_v42  ;;  %v12476_v24 = vsub.f32 %v3884_v25, %v12467_v57 }
 0x3c6   :  { %10637 = vmatprep.subr.mxu0 %v13582_v20 }
 0x3c7   :  { %v13536_v28 = vand.u32 4294901760, %v12476_v24 }
 0x3c8   :  { %10630 = vmatmul.mubr.f32.vlgmr.msra.gmra.mxu0 %v3455_v50  ;;  %v4015_v50 = vsub.f32 %v12451_v60, %v13538_v61 }
 0x3c9   :  { %10645 = vmatprep.mubr.msk.f32.mxu0 %vm11700_vm4, %v13582_v20  ;;  %10638 = vmatpush3.msra.mxu0 %v12434_v9  ;;  %v4029_v17 = vsub.f32 %v12476_v24, %v13536_v28 }
 0x3ca   :  { %10639 = vmatprep.subr.mxu0 %v13582_v20  ;;  %v4016_v43 = vand.u32 4294901760, %v4015_v50 }
 0x3cb   :  { %10640 = vmatpush3.msra.mxu0 %v12442_v12  ;;  %v4030_v1 = vand.u32 4294901760, %v4029_v17 }
 0x3cc   :  { %10641 = vmatprep.subr.mxu0 %v13582_v20  ;;  %10651 = vmatpush3.msra.mxu1 %v4016_v43 }
 0x3cd   :  { %10642 = vmatpush3.msra.mxu0 %v12453_v54  ;;  %10652 = vmatprep.subr.mxu1 %v13582_v20 }
 0x3ce   :  { %10643 = vmatprep.subr.mxu0 %v13582_v20  ;;  %10653 = vmatpush3.msra.mxu1 %v4023_v7 }
 0x3cf   :  { %10644 = vmatpush3.msra.mxu0 %v12467_v57  ;;  %10654 = vmatprep.subr.mxu1 %v13582_v20 }
 0x3d0   :  { %10659 = vmatprep.subr.mxu0 %v13582_v20  ;;  %10655 = vmatpush3.msra.mxu1 %v4030_v1 }
 0x3d1   :  { %10670 = vmatprep.subr.mxu1 %v13582_v20 }
 0x478   :  { %v10616_v59 = vpop.f32.mrf.mxu1 }
 0x47a   :  { %v3537_v18 = vpop.f32.mrf.mxu1 }
 0x47c   :  { %v10626_v44 = vpop.f32.mrf.mxu1 }
 0x47e   :  { %v3698_v0 = vpop.f32.mrf.mxu1 }
 0x480   :  { %v10611_v4 = vpop.f32.mrf.mxu0  ;;  %v10636_v7 = vpop.f32.mrf.mxu1 }
 0x481   :  { %v3544_v25 = vadd.f32 %v10616_v59, %v10611_v4 }
 0x482   :  { %v3451_v51 = vpop.f32.mrf.mxu0  ;;  %v3858_v40 = vpop.f32.mrf.mxu1 }
 0x483   :  { %v3538_v50 = vadd.f32 %v3537_v18, %v3451_v51 }
 0x484   :  { %v10621_v15 = vpop.f32.mrf.mxu0 }
 0x485   :  { %v3625_v43 = vadd.f32 %v10621_v15, %v3544_v25 }
 0x486   :  { %v3617_v62 = vpop.f32.mrf.mxu0 }
 0x487   :  { %v3618_v28 = vadd.f32 %v3617_v62, %v3538_v50  ;;  %v3707_v2 = vadd.f32 %v10626_v44, %v3625_v43 }
 0x488   :  { %v10631_v17 = vpop.f32.mrf.mxu0 }
 0x489   :  { %v3787_v61 = vadd.f32 %v10631_v17, %v3707_v2  ;;  %v3699_v52 = vadd.f32 %v3698_v0, %v3618_v28 }
 0x48a   :  { %v3780_v1 = vpop.f32.mrf.mxu0 }
 0x48b   :  { %v3865_v42 = vadd.f32 %v10636_v7, %v3787_v61  ;;  %v3781_v39 = vadd.f32 %v3780_v1, %v3699_v52 }
 0x48d   :  { %v3869_v31 = vmul.f32 %v3865_v42, %v12353_v21  ;;  %v3859_v34 = vadd.f32 %v3858_v40, %v3781_v39 }
 0x48f   :  { %v3877_v59 = vsel %vm1256_vm3, %v3869_v31, 0.0  ;;  %v3868_v4 = vmul.f32 %v3859_v34, %v12355_v53 }
 0x490   :  { %v3878_v18 = vrot.slane %v3877_v59, 4 }
 0x491   :  { %v3870_v51 = vsel %vm1256_vm3, %v3868_v4, 0.0  ;;  %v9753_v4 = vld [vmem:[#allocation14] ss:$0 sm:$0xff] }
 0x492   :  { %v3879_v25 = vadd.f32 %v3878_v18, %v3877_v59  ;;  %v3871_v44 = vrot.slane %v3870_v51, 4 }
 0x494   :  { %v3880_v15 = vrot.slane %v3879_v25, 2  ;;  %v3872_v50 = vadd.f32 %v3871_v44, %v3870_v51 }
 0x496   :  { %v3881_v2 = vadd.f32 %v3880_v15, %v3879_v25  ;;  %v3873_v28 = vrot.slane %v3872_v50, 2 }
 0x498   :  { %v3882_v0 = vrot.slane %v3881_v2, 1  ;;  %v3874_v61 = vadd.f32 %v3873_v28, %v3872_v50 }
 0x49a   :  { %v3875_v52 = vrot.slane %v3874_v61, 1  ;;  %v3883_v43 = vadd.f32 %v3882_v0, %v3881_v2 }
 0x49c   :  { %v3876_v21 = vadd.f32 %v3875_v52, %v3874_v61 }
 0x49e   :  { %v3898_v40 = vsel %vm3897_vm7, %v3883_v43, %v3876_v21 }
 0x49f   :  { %v3899_v31 = vsel %vm1256_vm3, %v3898_v40, 0 }
 0x4a0   :  { %v3970_v34 = vand.u32 4294901760, %v3899_v31 }
 0x4a2   :  { %v3971_v53 = vsub.f32 %v3899_v31, %v3970_v34  ;;  %10657 = vmatmul.mubr.f32.vlgmr.msra.gmra.mxu1 %v3970_v34 }
 0x4a3   :  { %10671 = vmatpush3.msra.mxu1 %v12434_v9  ;;  %10678 = vmatprep.mubr.msk.f32.mxu1 %vm11700_vm4, %v13582_v20 }
 0x4a4   :  { %10672 = vmatprep.subr.mxu1 %v13582_v20  ;;  %v3972_v39 = vand.u32 4294901760, %v3971_v53 }
 0x4a5   :  { %10673 = vmatpush3.msra.mxu1 %v12442_v12 }
 0x4a6   :  { %10674 = vmatprep.subr.mxu1 %v13582_v20  ;;  %v3973_v42 = vsub.f32 %v3971_v53, %v3972_v39 }
 0x4a7   :  { %10675 = vmatpush3.msra.mxu1 %v12453_v54 }
 0x4a8   :  { %10676 = vmatprep.subr.mxu1 %v13582_v20  ;;  %v3974_v62 = vand.u32 4294901760, %v3973_v42  ;;  %v4418_v42 = vld [vmem:[#allocation19 + $0x8] sm:$0xff] }
 0x4a9   :  { %10677 = vmatpush3.msra.mxu1 %v12467_v57 }
 0x4aa   :  { %10679 = vmatmul.mubr.f32.vlgmr.msra.gmra.mxu1 %v3972_v39  ;;  %10692 = vmatprep.subr.mxu1 %v13582_v20  ;;  %v4419_v39 = vld [vmem:[#allocation19 + $0x10] sm:$0xff] }
 0x4ab   :  { %10646 = vmatmul.mubr.f32.vlgmr.msra.gmra.mxu0 %v3974_v62  ;;  %10693 = vmatpush3.msra.mxu1 %v12434_v9  ;;  %v13583_v9 = vand.u32 4294901760, %v12440_v47 }
 0x4ac   :  { %10660 = vmatpush3.msra.mxu0 %v12440_v47  ;;  %10694 = vmatprep.subr.mxu1 %v13582_v20  ;;  %v13586_v47 = vand.u32 4294901760, %v12476_v24 }
 0x4ad   :  { %10661 = vmatprep.subr.mxu0 %v13582_v20  ;;  %10695 = vmatpush3.msra.mxu1 %v12442_v12  ;;  %v13584_v12 = vand.u32 4294901760, %v12451_v60 }
 0x4ae   :  { %10662 = vmatpush3.msra.mxu0 %v12451_v60  ;;  %10696 = vmatprep.subr.mxu1 %v13582_v20 }
 0x4af   :  { %10663 = vmatprep.subr.mxu0 %v13582_v20  ;;  %10697 = vmatpush3.msra.mxu1 %v12453_v54  ;;  %v13585_v54 = vand.u32 4294901760, %v12465_v14 }
 0x4b0   :  { %10664 = vmatpush3.msra.mxu0 %v12465_v14  ;;  %10698 = vmatprep.subr.mxu1 %v13582_v20 }
 0x4b1   :  { %10665 = vmatprep.subr.mxu0 %v13582_v20  ;;  %10667 = vmatprep.mubr.msk.f32.mxu0 %vm11700_vm4, %v13582_v20 }
 0x4b2   :  { %10666 = vmatpush3.msra.mxu0 %v12476_v24  ;;  %10699 = vmatpush3.msra.mxu1 %v12467_v57 }
 0x4b3   :  { %10700 = vmatprep.mubr.msk.f32.mxu1 %vm11700_vm4, %v13582_v20  ;;  %10668 = vmatmul.mubr.f32.vlgmr.msra.gmra.mxu0 %v3971_v53  ;;  %v4420_v53 = vld [vmem:[#allocation19 + $0x18] sm:$0xff] }
 0x4b4   :  { %10681 = vmatprep.subr.mxu0 %v13582_v20  ;;  %10701 = vmatmul.mubr.f32.vlgmr.msra.gmra.mxu1 %v3970_v34  ;;  %v12547_v62 = vand.u32 4294901760, %v4420_v53 }
 0x4b5   :  { %10682 = vmatpush3.msra.mxu0 %v13583_v9  ;;  %10689 = vmatprep.mubr.msk.f32.mxu0 %vm11700_vm4, %v13582_v20  ;;  %v12549_v9 = vand.u32 4294901760, %v4419_v39 }
 0x4b6   :  { %10683 = vmatprep.subr.mxu0 %v13582_v20  ;;  %10714 = vmatprep.subr.mxu1 %v13582_v20 }
 0x4b7   :  { %10684 = vmatpush3.msra.mxu0 %v13584_v12  ;;  %10722 = vmatprep.mubr.msk.f32.mxu1 %vm11700_vm4, %v13582_v20  ;;  %v12551_v12 = vand.u32 4294901760, %v4418_v42 }
 0x4b8   :  { %10685 = vmatprep.subr.mxu0 %v13582_v20 }
 0x4b9   :  { %10686 = vmatpush3.msra.mxu0 %v13585_v54  ;;  %v4417_v54 = vld [vmem:[#allocation19] sm:$0xff] }
 0x4ba   :  { %10687 = vmatprep.subr.mxu0 %v13582_v20 }
 0x4bb   :  { %10688 = vmatpush3.msra.mxu0 %v13586_v47  ;;  %v12553_v47 = vand.u32 4294901760, %v4417_v54 }
 0x4bc   :  { %10690 = vmatmul.mubr.f32.vlgmr.msra.gmra.mxu0 %v3970_v34  ;;  %10703 = vmatprep.subr.mxu0 %v13582_v20 }
 0x4bd   :  { %10711 = vmatprep.mubr.msk.f32.mxu0 %vm11700_vm4, %v13582_v20  ;;  %10704 = vmatpush3.msra.mxu0 %v12547_v62 }
 0x4be   :  { %10705 = vmatprep.subr.mxu0 %v13582_v20 }
 0x4bf   :  { %10706 = vmatpush3.msra.mxu0 %v12549_v9 }
 0x4c0   :  { %10707 = vmatprep.subr.mxu0 %v13582_v20 }
 0x4c1   :  { %10708 = vmatpush3.msra.mxu0 %v12551_v12 }
 0x4c2   :  { %10709 = vmatprep.subr.mxu0 %v13582_v20 }
 0x4c3   :  { %10710 = vmatpush3.msra.mxu0 %v12553_v47 }
 0x4c4   :  { %10725 = vmatprep.subr.mxu0 %v13582_v20 }
 0x562   :  { %v4067_v60 = vpop.f32.mrf.mxu1 }
 0x564   :  { %v10658_v57 = vpop.f32.mrf.mxu1 }
 0x565   :  { %v12559_v57 = vsub.f32 %v4419_v39, %v12549_v9 }
 0x56a   :  { %v4224_v7 = vpop.f32.mrf.mxu1 }
 0x56b   :  { %v3976_v17 = vpop.f32.mrf.mxu0 }
 0x56c   :  { %v10680_v1 = vpop.f32.mrf.mxu1  ;;  %v3977_v14 = vadd.f32 %v9753_v4, %v3976_v17  ;;  %v12566_v17 = vsub.f32 %v4417_v54, %v12553_v47 }
 0x56d   :  { %v10647_v59 = vpop.f32.mrf.mxu0 }
 0x56e   :  { %v4068_v25 = vadd.f32 %v4067_v60, %v3977_v14  ;;  %v12556_v60 = vsub.f32 %v4420_v53, %v12547_v62  ;;  %v4544_v59 = vand.u32 4294901760, %v12559_v57  ;;  %v4558_v14 = vand.u32 4294901760, %v12566_v17 }
 0x570   :  { %v4537_v1 = vand.u32 4294901760, %v12556_v60 }
 0x573   :  { %v4147_v18 = vpop.f32.mrf.mxu0 }
 0x574   :  { %v4382_v51 = vpop.f32.mrf.mxu1  ;;  %v4148_v15 = vadd.f32 %v4147_v18, %v4068_v25  ;;  %v4538_v18 = vsub.f32 %v12556_v60, %v4537_v1 }
 0x575   :  { %v10669_v44 = vpop.f32.mrf.mxu0 }
 0x576   :  { %v10702_v24 = vpop.f32.mrf.mxu1  ;;  %v4225_v50 = vadd.f32 %v4224_v7, %v4148_v15  ;;  %v12562_v7 = vsub.f32 %v4418_v42, %v12551_v12  ;;  %v4539_v44 = vand.u32 4294901760, %v4538_v18  ;;  %v4559_v15 = vsub.f32 %v12566_v17, %v4558_v14 }
 0x578   :  { %v4551_v4 = vand.u32 4294901760, %v12562_v7  ;;  %10715 = vmatpush3.msra.mxu1 %v4539_v44 }
 0x579   :  { %10716 = vmatprep.subr.mxu1 %v13582_v20 }
 0x57a   :  { %v4552_v25 = vsub.f32 %v12562_v7, %v4551_v4 }
 0x57c   :  { %v4307_v2 = vpop.f32.mrf.mxu0 }
 0x57d   :  { %v4308_v28 = vadd.f32 %v4307_v2, %v4225_v50  ;;  %v4553_v50 = vand.u32 4294901760, %v4552_v25  ;;  %v4560_v2 = vand.u32 4294901760, %v4559_v15 }
 0x57e   :  { %v10691_v0 = vpop.f32.mrf.mxu0 }
 0x57f   :  { %v4383_v61 = vadd.f32 %v4382_v51, %v4308_v28  ;;  %v4545_v51 = vsub.f32 %v12559_v57, %v4544_v59 }
 0x581   :  { %v4389_v52 = vsel %vm4388_vm8, %v4383_v61, 0.0  ;;  %v4546_v24 = vand.u32 4294901760, %v4545_v51 }
 0x582   :  { %4390 = vadd.xlane.f32.xlu0 %v4389_v52 }
 0x583   :  { %10717 = vmatpush3.msra.mxu1 %v4546_v24  ;;  %v4918_v24 = vld [vmem:[%s13522_s19 + $0x8] sm:$0xff] }
 0x584   :  { %10718 = vmatprep.subr.mxu1 %v13582_v20 }
 0x585   :  { %10719 = vmatpush3.msra.mxu1 %v4553_v50 }
 0x586   :  { %10720 = vmatprep.subr.mxu1 %v13582_v20 }
 0x587   :  { %10721 = vmatpush3.msra.mxu1 %v4560_v2 }
 0x588   :  { %10736 = vmatprep.subr.mxu1 %v13582_v20 }
 0x60b   :  { %v4391_v43 = vpop.xlane.xlu0 %4390 }
 0x60c   :  { %v4393_v21 = vmul.f32 0.03125, %v4391_v43  ;;  %v9754_v43 = vld [vmem:[#allocation16] ss:$0 sm:$0xff] }
 0x60e   :  { %v4394_v40 = vsub.f32 %v4383_v61, %v4393_v21 }
 0x610   :  { %v4395_v31 = vmul.f32 %v4394_v40, %v4394_v40 }
 0x612   :  { %v4396_v34 = vsel %vm4388_vm8, %v4395_v31, 0.0  ;;  %v9755_v31 = vld [vmem:[#allocation17] ss:$0 sm:$0xff] }
 0x613   :  { %4397 = vadd.xlane.f32.xlu0 %v4396_v34 }
 0x69c   :  { %v4398_v28 = vpop.xlane.xlu0 %4397 }
 0x69d   :  { %v4399_v0 = vmul.f32 0.03125, %v4398_v28 }
 0x69f   :  { %v4400_v61 = vadd.f32 1e-05, %v4399_v0  ;;  %v12695_v0 = vand.u32 4294901760, %v4918_v24 }
 0x6a1   :  { %11367 = vrsqrt.f32 %v4400_v61  ;;  %v4917_v61 = vld [vmem:[%s13522_s19] sm:$0xff] }
 0x6ae   :  { %v11368_v52 = vpop.eup %11367 }
 0x6af   :  { %v4402_v21 = vmul.f32 %v11368_v52, %v4394_v40 }
 0x6b1   :  { %v4409_v34 = vmul.f32 %v9754_v43, %v4402_v21 }
 0x6b3   :  { %v4416_v53 = vadd.f32 %v9755_v31, %v4409_v34  ;;  %v12705_v31 = vand.u32 4294901760, %v4917_v61  ;;  %v12709_v34 = vsub.f32 %v4918_v24, %v12695_v0 }
 0x6b5   :  { %v4429_v39 = vsel %vm1256_vm3, %v4416_v53, 0 }
 0x6b6   :  { %v4500_v42 = vand.u32 4294901760, %v4429_v39 }
 0x6b8   :  { %v4501_v54 = vsub.f32 %v4429_v39, %v4500_v42  ;;  %10723 = vmatmul.mubr.f32.vlgmr.msra.gmra.mxu1 %v4500_v42 }
 0x6b9   :  { %10737 = vmatpush3.msra.mxu1 %v12547_v62  ;;  %10744 = vmatprep.mubr.msk.f32.mxu1 %vm11700_vm4, %v13582_v20 }
 0x6ba   :  { %10738 = vmatprep.subr.mxu1 %v13582_v20  ;;  %v4502_v18 = vand.u32 4294901760, %v4501_v54 }
 0x6bb   :  { %10739 = vmatpush3.msra.mxu1 %v12549_v9 }
 0x6bc   :  { %10740 = vmatprep.subr.mxu1 %v13582_v20  ;;  %v4503_v40 = vsub.f32 %v4501_v54, %v4502_v18 }
 0x6bd   :  { %10741 = vmatpush3.msra.mxu1 %v12551_v12 }
 0x6be   :  { %10742 = vmatprep.subr.mxu1 %v13582_v20  ;;  %v4504_v51 = vand.u32 4294901760, %v4503_v40 }
 0x6bf   :  { %10743 = vmatpush3.msra.mxu1 %v12553_v47 }
 0x6c0   :  { %10745 = vmatmul.mubr.f32.vlgmr.msra.gmra.mxu1 %v4502_v18  ;;  %10758 = vmatprep.subr.mxu1 %v13582_v20 }
 0x6c1   :  { %10712 = vmatmul.mubr.f32.vlgmr.msra.gmra.mxu0 %v4504_v51  ;;  %10759 = vmatpush3.msra.mxu1 %v12547_v62  ;;  %v4922_v62 = vld [vmem:[%s13522_s19 + $0x28] sm:$0xff] }
 0x6c2   :  { %10726 = vmatpush3.msra.mxu0 %v12556_v60  ;;  %10760 = vmatprep.subr.mxu1 %v13582_v20 }
 0x6c3   :  { %10727 = vmatprep.subr.mxu0 %v13582_v20  ;;  %10761 = vmatpush3.msra.mxu1 %v12549_v9  ;;  %v12647_v9 = vand.u32 4294901760, %v4922_v62 }
 0x6c4   :  { %10728 = vmatpush3.msra.mxu0 %v12559_v57  ;;  %10762 = vmatprep.subr.mxu1 %v13582_v20  ;;  %v4920_v57 = vld [vmem:[%s13522_s19 + $0x18] sm:$0xff] }
 0x6c5   :  { %10729 = vmatprep.subr.mxu0 %v13582_v20  ;;  %10763 = vmatpush3.msra.mxu1 %v12551_v12  ;;  %v4921_v12 = vld [vmem:[%s13522_s19 + $0x20] sm:$0xff] }
 0x6c6   :  { %10730 = vmatpush3.msra.mxu0 %v12562_v7  ;;  %10764 = vmatprep.subr.mxu1 %v13582_v20  ;;  %v12655_v60 = vand.u32 4294901760, %v4921_v12 }
 0x6c7   :  { %10731 = vmatprep.subr.mxu0 %v13582_v20  ;;  %10733 = vmatprep.mubr.msk.f32.mxu0 %vm11700_vm4, %v13582_v20 }
 0x6c8   :  { %10732 = vmatpush3.msra.mxu0 %v12566_v17  ;;  %10765 = vmatpush3.msra.mxu1 %v12553_v47  ;;  %v12653_v47 = vsub.f32 %v4922_v62, %v12647_v9  ;;  %v12664_v17 = vsub.f32 %v4921_v12, %v12655_v60 }
 0x6c9   :  { %10766 = vmatprep.mubr.msk.f32.mxu1 %vm11700_vm4, %v13582_v20  ;;  %10734 = vmatmul.mubr.f32.vlgmr.msra.gmra.mxu0 %v4501_v54  ;;  %v13551_v54 = vand.u32 4294901760, %v12709_v34 }
 0x6ca   :  { %10747 = vmatprep.subr.mxu0 %v13582_v20  ;;  %10767 = vmatmul.mubr.f32.vlgmr.msra.gmra.mxu1 %v4500_v42  ;;  %v13555_v7 = vand.u32 4294901760, %v12653_v47 }
 0x6cb   :  { %10748 = vmatpush3.msra.mxu0 %v4537_v1  ;;  %10755 = vmatprep.mubr.msk.f32.mxu0 %vm11700_vm4, %v13582_v20  ;;  %v12666_v1 = vand.u32 4294901760, %v4920_v57  ;;  %v5067_v51 = vsub.f32 %v12709_v34, %v13551_v54 }
 0x6cc   :  { %10749 = vmatprep.subr.mxu0 %v13582_v20  ;;  %10784 = vmatprep.subr.mxu1 %v13582_v20 }
 0x6cd   :  { %10750 = vmatpush3.msra.mxu0 %v4544_v59  ;;  %10796 = vmatprep.mubr.msk.f32.mxu1 %vm11700_vm4, %v13582_v20  ;;  %v4919_v59 = vld [vmem:[%s13522_s19 + $0x10] sm:$0xff]  ;;  %v12678_v25 = vsub.f32 %v4920_v57, %v12666_v1  ;;  %v5068_v12 = vand.u32 4294901760, %v5067_v51 }
 0x6ce   :  { %10751 = vmatprep.subr.mxu0 %v13582_v20  ;;  %v12680_v44 = vand.u32 4294901760, %v4919_v59 }
 0x6cf   :  { %10752 = vmatpush3.msra.mxu0 %v4551_v4  ;;  %v5039_v4 = vsub.f32 %v12653_v47, %v13555_v7  ;;  %v13553_v2 = vand.u32 4294901760, %v12678_v25 }
 0x6d0   :  { %10753 = vmatprep.subr.mxu0 %v13582_v20  ;;  %v12692_v28 = vsub.f32 %v4919_v59, %v12680_v44 }
 0x6d1   :  { %10754 = vmatpush3.msra.mxu0 %v4558_v14  ;;  %v13554_v14 = vand.u32 4294901760, %v12664_v17  ;;  %v5040_v15 = vand.u32 4294901760, %v5039_v4  ;;  %v5053_v43 = vsub.f32 %v12678_v25, %v13553_v2 }
 0x6d2   :  { %10756 = vmatmul.mubr.f32.vlgmr.msra.gmra.mxu0 %v4500_v42  ;;  %10769 = vmatprep.subr.mxu0 %v13582_v20  ;;  %v13552_v21 = vand.u32 4294901760, %v12692_v28  ;;  %v12716_v42 = vsub.f32 %v4917_v61, %v12705_v31 }
 0x6d3   :  { %10781 = vmatprep.mubr.msk.f32.mxu0 %vm11700_vm4, %v13582_v20  ;;  %10770 = vmatpush3.msra.mxu0 %v12647_v9  ;;  %v5046_v50 = vsub.f32 %v12664_v17, %v13554_v14  ;;  %v5054_v53 = vand.u32 4294901760, %v5053_v43 }
 0x6d4   :  { %10771 = vmatprep.subr.mxu0 %v13582_v20  ;;  %10785 = vmatpush3.msra.mxu1 %v5040_v15  ;;  %v5060_v39 = vsub.f32 %v12692_v28, %v13552_v21  ;;  %v13550_v40 = vand.u32 4294901760, %v12716_v42 }
 0x6d5   :  { %10772 = vmatpush3.msra.mxu0 %v12655_v60  ;;  %v5047_v52 = vand.u32 4294901760, %v5046_v50  ;;  %10786 = vmatprep.subr.mxu1 %v13582_v20 }
 0x6d6   :  { %10773 = vmatprep.subr.mxu0 %v13582_v20  ;;  %v5061_v18 = vand.u32 4294901760, %v5060_v39  ;;  %v5074_v62 = vsub.f32 %v12716_v42, %v13550_v40 }
 0x6d7   :  { %10774 = vmatpush3.msra.mxu0 %v12666_v1  ;;  %10787 = vmatpush3.msra.mxu1 %v5047_v52  ;;  %v9756_v52 = vld [vmem:[#allocation20] ss:$0 sm:$0xff] }
 0x6d8   :  { %10775 = vmatprep.subr.mxu0 %v13582_v20  ;;  %10788 = vmatprep.subr.mxu1 %v13582_v20  ;;  %v5075_v57 = vand.u32 4294901760, %v5074_v62 }
 0x6d9   :  { %10776 = vmatpush3.msra.mxu0 %v12680_v44  ;;  %10789 = vmatpush3.msra.mxu1 %v5054_v53 }
 0x6da   :  { %10777 = vmatprep.subr.mxu0 %v13582_v20  ;;  %10790 = vmatprep.subr.mxu1 %v13582_v20 }
 0x6db   :  { %10778 = vmatpush3.msra.mxu0 %v12695_v0  ;;  %10791 = vmatpush3.msra.mxu1 %v5061_v18 }
 0x6dc   :  { %10779 = vmatprep.subr.mxu0 %v13582_v20  ;;  %10792 = vmatprep.subr.mxu1 %v13582_v20 }
 0x6dd   :  { %10780 = vmatpush3.msra.mxu0 %v12705_v31  ;;  %10793 = vmatpush3.msra.mxu1 %v5068_v12 }
 0x6de   :  { %10799 = vmatprep.subr.mxu0 %v13582_v20  ;;  %10794 = vmatprep.subr.mxu1 %v13582_v20 }
 0x6df   :  { %10795 = vmatpush3.msra.mxu1 %v5075_v57 }
 0x6e0   :  { %10814 = vmatprep.subr.mxu1 %v13582_v20 }
 0x778   :  { %v4597_v59 = vpop.f32.mrf.mxu1 }
 0x77a   :  { %v10724_v4 = vpop.f32.mrf.mxu1 }
 0x780   :  { %v4754_v24 = vpop.f32.mrf.mxu1 }
 0x781   :  { %v4506_v15 = vpop.f32.mrf.mxu0 }
 0x782   :  { %v10746_v50 = vpop.f32.mrf.mxu1  ;;  %v4507_v43 = vadd.f32 %v9756_v52, %v4506_v15 }
 0x783   :  { %v10713_v61 = vpop.f32.mrf.mxu0 }
 0x784   :  { %v4598_v18 = vadd.f32 %v4597_v59, %v4507_v43 }
 0x789   :  { %v4677_v53 = vpop.f32.mrf.mxu0 }
 0x78a   :  { %v4912_v39 = vpop.f32.mrf.mxu1  ;;  %v4678_v62 = vadd.f32 %v4677_v53, %v4598_v18 }
 0x78b   :  { %v10735_v40 = vpop.f32.mrf.mxu0 }
 0x78c   :  { %v10768_v51 = vpop.f32.mrf.mxu1  ;;  %v4755_v12 = vadd.f32 %v4754_v24, %v4678_v62 }
 0x792   :  { %v4837_v54 = vpop.f32.mrf.mxu0 }
 0x793   :  { %v4838_v21 = vadd.f32 %v4837_v54, %v4755_v12 }
 0x794   :  { %v10757_v57 = vpop.f32.mrf.mxu0 }
 0x795   :  { %v4913_v2 = vadd.f32 %v4912_v39, %v4838_v21 }
 0x797   :  { %v4916_v14 = vmax.f32 %v4913_v2, 0.0 }
 0x799   :  { %v4932_v4 = vsel %vm4930_vm9, %v4916_v14, 0 }
 0x79a   :  { %v5005_v7 = vand.u32 4294901760, %v4932_v4 }
 0x79c   :  { %v5006_v50 = vsub.f32 %v4932_v4, %v5005_v7  ;;  %10797 = vmatmul.mubr.f32.vlgmr.msra.gmra.mxu1 %v5005_v7 }
 0x79d   :  { %10815 = vmatpush3.msra.mxu1 %v12647_v9  ;;  %10826 = vmatprep.mubr.msk.f32.mxu1 %vm11700_vm4, %v13582_v20 }
 0x79e   :  { %10816 = vmatprep.subr.mxu1 %v13582_v20  ;;  %v5007_v40 = vand.u32 4294901760, %v5006_v50 }
 0x79f   :  { %10817 = vmatpush3.msra.mxu1 %v12655_v60 }
 0x7a0   :  { %10818 = vmatprep.subr.mxu1 %v13582_v20  ;;  %v5008_v21 = vsub.f32 %v5006_v50, %v5007_v40 }
 0x7a1   :  { %10819 = vmatpush3.msra.mxu1 %v12666_v1 }
 0x7a2   :  { %10820 = vmatprep.subr.mxu1 %v13582_v20  ;;  %v5009_v14 = vand.u32 4294901760, %v5008_v21  ;;  %v9763_v21 = vld [vmem:[%s13572_s1 + $0x38] sm:$0xff] }
 0x7a3   :  { %10821 = vmatpush3.msra.mxu1 %v12680_v44 }
 0x7a4   :  { %10822 = vmatprep.subr.mxu1 %v13582_v20  ;;  %10782 = vmatmul.mubr.f32.vlgmr.msra.gmra.mxu0 %v5009_v14  ;;  %v12809_v14 = vand.u32 4294901760, %v9763_v21 }
 0x7a5   :  { %10800 = vmatpush3.msra.mxu0 %v12653_v47  ;;  %10823 = vmatpush3.msra.mxu1 %v12695_v0 }
 0x7a6   :  { %10801 = vmatprep.subr.mxu0 %v13582_v20  ;;  %10824 = vmatprep.subr.mxu1 %v13582_v20 }
 0x7a7   :  { %10802 = vmatpush3.msra.mxu0 %v12664_v17  ;;  %10825 = vmatpush3.msra.mxu1 %v12705_v31 }
 0x7a8   :  { %10803 = vmatprep.subr.mxu0 %v13582_v20  ;;  %10827 = vmatmul.mubr.f32.vlgmr.msra.gmra.mxu1 %v5007_v40 }
 0x7a9   :  { %10844 = vmatprep.subr.mxu1 %v13582_v20  ;;  %10804 = vmatpush3.msra.mxu0 %v12678_v25 }
 0x7aa   :  { %10845 = vmatpush3.msra.mxu1 %v12647_v9  ;;  %10805 = vmatprep.subr.mxu0 %v13582_v20  ;;  %v13587_v9 = vand.u32 4294901760, %v12653_v47  ;;  %v13589_v47 = vand.u32 4294901760, %v12678_v25  ;;  %v13592_v25 = vand.u32 4294901760, %v12716_v42 }
 0x7ab   :  { %10846 = vmatprep.subr.mxu1 %v13582_v20  ;;  %10806 = vmatpush3.msra.mxu0 %v12692_v28 }
 0x7ac   :  { %10847 = vmatpush3.msra.mxu1 %v12655_v60  ;;  %10807 = vmatprep.subr.mxu0 %v13582_v20  ;;  %v13588_v60 = vand.u32 4294901760, %v12664_v17  ;;  %v13590_v17 = vand.u32 4294901760, %v12692_v28 }
 0x7ad   :  { %10848 = vmatprep.subr.mxu1 %v13582_v20  ;;  %10808 = vmatpush3.msra.mxu0 %v12709_v34 }
 0x7ae   :  { %10849 = vmatpush3.msra.mxu1 %v12666_v1  ;;  %10809 = vmatprep.subr.mxu0 %v13582_v20  ;;  %v13591_v1 = vand.u32 4294901760, %v12709_v34  ;;  %v9757_v34 = vld [vmem:[%s13523_s20] ss:$0 sm:$0xff] }
 0x7af   :  { %10850 = vmatprep.subr.mxu1 %v13582_v20  ;;  %10810 = vmatpush3.msra.mxu0 %v12716_v42 }
 0x7b0   :  { %10811 = vmatprep.mubr.msk.f32.mxu0 %vm11700_vm4, %v13582_v20  ;;  %10851 = vmatpush3.msra.mxu1 %v12680_v44 }
 0x7b1   :  { %10812 = vmatmul.mubr.f32.vlgmr.msra.gmra.mxu0 %v5006_v50  ;;  %10829 = vmatprep.subr.mxu0 %v13582_v20 }
 0x7b2   :  { %10852 = vmatprep.subr.mxu1 %v13582_v20  ;;  %10830 = vmatpush3.msra.mxu0 %v13587_v9  ;;  %v9762_v9 = vld [vmem:[%s13572_s1 + $0x30] sm:$0xff] }
 0x7b3   :  { %10853 = vmatpush3.msra.mxu1 %v12695_v0  ;;  %10831 = vmatprep.subr.mxu0 %v13582_v20 }
 0x7b4   :  { %10854 = vmatprep.subr.mxu1 %v13582_v20  ;;  %10832 = vmatpush3.msra.mxu0 %v13588_v60  ;;  %v12815_v60 = vsub.f32 %v9763_v21, %v12809_v14 }
 0x7b5   :  { %10855 = vmatpush3.msra.mxu1 %v12705_v31  ;;  %10856 = vmatprep.mubr.msk.f32.mxu1 %vm11700_vm4, %v13582_v20 }
 0x7b6   :  { %10833 = vmatprep.subr.mxu0 %v13582_v20  ;;  %10857 = vmatmul.mubr.f32.vlgmr.msra.gmra.mxu1 %v5005_v7 }
 0x7b7   :  { %10834 = vmatpush3.msra.mxu0 %v13589_v47  ;;  %10841 = vmatprep.mubr.msk.f32.mxu0 %vm11700_vm4, %v13582_v20  ;;  %v12817_v47 = vand.u32 4294901760, %v9762_v9 }
 0x7b8   :  { %10835 = vmatprep.subr.mxu0 %v13582_v20  ;;  %10870 = vmatprep.subr.mxu1 %v13582_v20 }
 0x7b9   :  { %10836 = vmatpush3.msra.mxu0 %v13590_v17  ;;  %10878 = vmatprep.mubr.msk.f32.mxu1 %vm11700_vm4, %v13582_v20  ;;  %v9761_v17 = vld [vmem:[%s13572_s1 + $0x28] sm:$0xff] }
 0x7ba   :  { %10837 = vmatprep.subr.mxu0 %v13582_v20 }
 0x7bb   :  { %10838 = vmatpush3.msra.mxu0 %v13591_v1  ;;  %v5597_v1 = vand.u32 4294901760, %v12815_v60 }
 0x7bc   :  { %10839 = vmatprep.subr.mxu0 %v13582_v20 }
 0x7bd   :  { %10840 = vmatpush3.msra.mxu0 %v13592_v25  ;;  %v12826_v25 = vsub.f32 %v9762_v9, %v12817_v47  ;;  %v11385_v9 = vld [vmem:[#allocation10] ss:$0 sm:$0xff] }
 0x7be   :  { %10842 = vmatmul.mubr.f32.vlgmr.msra.gmra.mxu0 %v5005_v7  ;;  %10859 = vmatprep.subr.mxu0 %v13582_v20 }
 0x7bf   :  { %10867 = vmatprep.mubr.msk.f32.mxu0 %vm11700_vm4, %v13582_v20  ;;  %10860 = vmatpush3.msra.mxu0 %v12809_v14 }
 0x7c0   :  { %10861 = vmatprep.subr.mxu0 %v13582_v20 }
 0x7c1   :  { %10862 = vmatpush3.msra.mxu0 %v12817_v47 }
 0x7c2   :  { %10863 = vmatprep.subr.mxu0 %v13582_v20 }
 0x85c   :  { %v5112_v44 = vpop.f32.mrf.mxu1 }
 0x85e   :  { %v10798_v2 = vpop.f32.mrf.mxu1 }
 0x85f   :  { %v9760_v2 = vld [vmem:[%s13572_s1 + $0x20] sm:$0xff] }
 0x864   :  { %v5011_v28 = vpop.f32.mrf.mxu0 }
 0x865   :  { %v5012_v24 = vadd.f32 %v9757_v34, %v5011_v28  ;;  %v5598_v28 = vsub.f32 %v12815_v60, %v5597_v1 }
 0x866   :  { %v10783_v0 = vpop.f32.mrf.mxu0 }
 0x867   :  { %v5113_v7 = vadd.f32 %v5112_v44, %v5012_v24  ;;  %v12828_v44 = vand.u32 4294901760, %v9761_v17  ;;  %v5604_v0 = vand.u32 4294901760, %v12826_v25  ;;  %v5599_v34 = vand.u32 4294901760, %v5598_v28 }
 0x868   :  { %v5275_v31 = vpop.f32.mrf.mxu1 }
 0x869   :  { %10864 = vmatpush3.msra.mxu0 %v12828_v44  ;;  %10871 = vmatpush3.msra.mxu1 %v5599_v34 }
 0x86a   :  { %v10828_v54 = vpop.f32.mrf.mxu1  ;;  %10865 = vmatprep.subr.mxu0 %v13582_v20  ;;  %10872 = vmatprep.subr.mxu1 %v13582_v20 }
 0x86b   :  { %v12842_v54 = vand.u32 4294901760, %v9760_v2 }
 0x86d   :  { %10866 = vmatpush3.msra.mxu0 %v12842_v54 }
 0x86e   :  { %10881 = vmatprep.subr.mxu0 %v13582_v20 }
 0x871   :  { %v5196_v59 = vpop.f32.mrf.mxu0 }
 0x872   :  { %v5197_v52 = vadd.f32 %v5196_v59, %v5113_v7  ;;  %v5605_v59 = vsub.f32 %v12826_v25, %v5604_v0 }
 0x873   :  { %v10813_v42 = vpop.f32.mrf.mxu0 }
 0x874   :  { %v5276_v43 = vadd.f32 %v5275_v31, %v5197_v52  ;;  %v12840_v31 = vsub.f32 %v9761_v17, %v12828_v44  ;;  %v12851_v42 = vsub.f32 %v9760_v2, %v12842_v54  ;;  %v9768_v2 = vld [vmem:[%s13514_s11 + $0x38] sm:$0xff] }
 0x876   :  { %v5441_v15 = vpop.f32.mrf.mxu1  ;;  %v5611_v24 = vand.u32 4294901760, %v12840_v31 }
 0x878   :  { %v10858_v61 = vpop.f32.mrf.mxu1  ;;  %v5612_v7 = vsub.f32 %v12840_v31, %v5611_v24 }
 0x879   :  { %v5618_v61 = vand.u32 4294901760, %v12851_v42 }
 0x87a   :  { %v5613_v52 = vand.u32 4294901760, %v5612_v7  ;;  %v9766_v7 = vld [vmem:[%s13514_s11 + $0x28] sm:$0xff] }
 0x87e   :  { %v5364_v53 = vpop.f32.mrf.mxu0 }
 0x87f   :  { %v5365_v39 = vadd.f32 %v5364_v53, %v5276_v43  ;;  %v5619_v43 = vsub.f32 %v12851_v42, %v5618_v61 }
 0x880   :  { %v10843_v18 = vpop.f32.mrf.mxu0 }
 0x881   :  { %v5442_v51 = vadd.f32 %v5441_v15, %v5365_v39  ;;  %v5606_v15 = vand.u32 4294901760, %v5605_v59  ;;  %v5620_v53 = vand.u32 4294901760, %v5619_v43  ;;  %v12881_v59 = vand.u32 4294901760, %v9768_v2 }
 0x883   :  { %v5447_v62 = vsel %vm4388_vm8, %v5442_v51, 0.0  ;;  %10873 = vmatpush3.msra.mxu1 %v5606_v15 }
 0x884   :  { %5448 = vadd.xlane.f32.xlu1 %v5447_v62  ;;  %10874 = vmatprep.subr.mxu1 %v13582_v20 }
 0x885   :  { %10875 = vmatpush3.msra.mxu1 %v5613_v52 }
 0x886   :  { %10876 = vmatprep.subr.mxu1 %v13582_v20 }
 0x887   :  { %10877 = vmatpush3.msra.mxu1 %v5620_v53  ;;  %v9765_v53 = vld [vmem:[%s13514_s11 + $0x20] sm:$0xff] }
 0x888   :  { %10892 = vmatprep.subr.mxu1 %v13582_v20 }
 0x90d   :  { %v5449_v12 = vpop.xlane.xlu1 %5448 }
 0x90e   :  { %v5450_v57 = vmul.f32 0.03125, %v5449_v12  ;;  %v9758_v12 = vld [vmem:[#allocation22] ss:$0 sm:$0xff] }
 0x910   :  { %v5451_v4 = vsub.f32 %v5442_v51, %v5450_v57 }
 0x912   :  { %v5452_v50 = vmul.f32 %v5451_v4, %v5451_v4 }
 0x914   :  { %v5453_v40 = vsel %vm4388_vm8, %v5452_v50, 0.0  ;;  %v9759_v50 = vld [vmem:[%s13525_s22] ss:$0 sm:$0xff] }
 0x915   :  { %5454 = vadd.xlane.f32.xlu1 %v5453_v40 }
 0x99e   :  { %v5455_v39 = vpop.xlane.xlu1 %5454 }
 0x99f   :  { %v5456_v18 = vmul.f32 0.03125, %v5455_v39  ;;  %v12899_v39 = vsub.f32 %v9768_v2, %v12881_v59 }
 0x9a1   :  { %v5457_v51 = vadd.f32 1e-05, %v5456_v18  ;;  %v12901_v18 = vand.u32 4294901760, %v9766_v7 }
 0x9a3   :  { %11369 = vrsqrt.f32 %v5457_v51 }
 0x9b0   :  { %v11370_v62 = vpop.eup %11369 }
 0x9b1   :  { %v5459_v57 = vmul.f32 %v11370_v62, %v5451_v4  ;;  %v9767_v4 = vld [vmem:[%s13514_s11 + $0x30] sm:$0xff]  ;;  %s11701_s11 = smov [#allocation23]  }
 0x9b2   :  { %v12891_v52 = vand.u32 4294901760, %v9767_v4  ;;  %s9734_s18 = sshll.u32 %s11701_s11, 4  ;;  %s9735_s18 = int_to_ptr.vmem [resolvable:$true] %s9734_s18 }
 0x9b3   :  { %v5466_v40 = vmul.f32 %v9758_v12, %v5459_v57  ;;  %v12908_v12 = vand.u32 4294901760, %v9765_v53  ;;  %s11646_s30 = scalar_lea.vmem %s9735_s18, 32  ;;  %p11651_p10 = scmp.lt.s32.totalorder %s9735_s18, %s9735_s18 }
 0x9b4   :  { %v12906_v62 = vsub.f32 %v9767_v4, %v12891_v52  ;;  %p11647_p9 = scmp.ne.s32.totalorder %s9735_s18, %s11646_s30  ;;  %p11652_p11 = scmp.lt.s32.totalorder %s11646_s30, %s11646_s30 }
 0x9b5   :  { %v5473_v21 = vadd.f32 %v9759_v50, %v5466_v40  ;;  %v12913_v50 = vand.u32 4294901760, %v12899_v39  ;;  %v12916_v40 = vsub.f32 %v9766_v7, %v12901_v18 }
 0x9b6   :  { %p11653_p12 = por %p11652_p11, %p11651_p10 }
 0x9b7   :  { %v12869_v17 = vadd.f32 %v11385_v9, %v5473_v21  ;;  %v12921_v21 = vand.u32 4294901760, %v12906_v62  ;;  %v12924_v9 = vsub.f32 %v9765_v53, %v12908_v12  ;;  %v6107_v2 = vsub.f32 %v12899_v39, %v12913_v50 }
 0x9b8   :  { %p11654_p13 = pnand %p11653_p12, %p11647_p9 }
 0x9b9   :  { %v5489_v28 = vsel %vm1256_vm3, %v12869_v17, 0  ;;  %v12942_v4 = vand.u32 4294901760, %v12924_v9 }
 0x9ba   :  { %v12876_v34 = vand.u32 4294901760, %v5489_v28 }
 0x9bc   :  { %v5561_v15 = vsub.f32 %v5489_v28, %v12876_v34  ;;  %10879 = vmatmul.mubr.f32.vlgmr.msra.gmra.mxu1 %v12876_v34  ;;  %v12933_v28 = vand.u32 4294901760, %v12916_v40 }
 0x9bd   :  { %10893 = vmatpush3.msra.mxu1 %v12809_v14  ;;  %10900 = vmatprep.mubr.msk.f32.mxu1 %vm11700_vm4, %v13582_v20 }
 0x9be   :  { %10894 = vmatprep.subr.mxu1 %v13582_v20  ;;  %v5562_v43 = vand.u32 4294901760, %v5561_v15  ;;  %v6121_v7 = vsub.f32 %v12916_v40, %v12933_v28 }
 0x9bf   :  { %10895 = vmatpush3.msra.mxu1 %v12817_v47 }
 0x9c0   :  { %10896 = vmatprep.subr.mxu1 %v13582_v20  ;;  %v5563_v51 = vsub.f32 %v5561_v15, %v5562_v43  ;;  %v6122_v53 = vand.u32 4294901760, %v6121_v7 }
 0x9c1   :  { %10897 = vmatpush3.msra.mxu1 %v12828_v44 }
 0x9c2   :  { %10898 = vmatprep.subr.mxu1 %v13582_v20  ;;  %v5564_v57 = vand.u32 4294901760, %v5563_v51 }
 0x9c3   :  { %10899 = vmatpush3.msra.mxu1 %v12842_v54 }
 0x9c4   :  { %10901 = vmatmul.mubr.f32.vlgmr.msra.gmra.mxu1 %v5562_v43  ;;  %10914 = vmatprep.subr.mxu1 %v13582_v20  ;;  %v6128_v43 = vsub.f32 %v12924_v9, %v12942_v4 }
 0x9c5   :  { %10868 = vmatmul.mubr.f32.vlgmr.msra.gmra.mxu0 %v5564_v57  ;;  %10915 = vmatpush3.msra.mxu1 %v12809_v14  ;;  %v6114_v14 = vsub.f32 %v12906_v62, %v12921_v21  ;;  %v9769_v57 = vld [vmem:[#allocation13 + $0x1] ss:$0 sm:$0xff] }
 0x9c6   :  { %10882 = vmatpush3.msra.mxu0 %v12815_v60  ;;  %10916 = vmatprep.subr.mxu1 %v13582_v20 }
 0x9c7   :  { %10883 = vmatprep.subr.mxu0 %v13582_v20  ;;  %10917 = vmatpush3.msra.mxu1 %v12817_v47  ;;  %v6108_v47 = vand.u32 4294901760, %v6107_v2 }
 0x9c8   :  { %10884 = vmatpush3.msra.mxu0 %v12826_v25  ;;  %10918 = vmatprep.subr.mxu1 %v13582_v20 }
 0x9c9   :  { %10885 = vmatprep.subr.mxu0 %v13582_v20  ;;  %10919 = vmatpush3.msra.mxu1 %v12828_v44  ;;  %v6115_v44 = vand.u32 4294901760, %v6114_v14 }
 0x9ca   :  { %10886 = vmatpush3.msra.mxu0 %v12840_v31  ;;  %10920 = vmatprep.subr.mxu1 %v13582_v20 }
 0x9cb   :  { %10887 = vmatprep.subr.mxu0 %v13582_v20  ;;  %10889 = vmatprep.mubr.msk.f32.mxu0 %vm11700_vm4, %v13582_v20 }
 0x9cc   :  { %10888 = vmatpush3.msra.mxu0 %v12851_v42  ;;  %10921 = vmatpush3.msra.mxu1 %v12842_v54  ;;  %v6129_v54 = vand.u32 4294901760, %v6128_v43 }
 0x9cd   :  { %10922 = vmatprep.mubr.msk.f32.mxu1 %vm11700_vm4, %v13582_v20  ;;  %10890 = vmatmul.mubr.f32.vlgmr.msra.gmra.mxu0 %v5561_v15 }
 0x9ce   :  { %10903 = vmatprep.subr.mxu0 %v13582_v20  ;;  %10923 = vmatmul.mubr.f32.vlgmr.msra.gmra.mxu1 %v12876_v34 }
 0x9cf   :  { %10936 = vmatprep.subr.mxu1 %v6108_v47  ;;  %10904 = vmatpush3.msra.mxu0 %v5597_v1 }
 0x9d0   :  { %10937 = vmatpush3.msra.mxu1 %v6108_v47  ;;  %10944 = vmatprep.mubr.f32.mxu1 %v12164_v27 }
 0x9d1   :  { %10905 = vmatprep.subr.mxu0 %v13582_v20  ;;  %10938 = vmatprep.subr.mxu1 %v6115_v44 }
 0x9d2   :  { %10906 = vmatpush3.msra.mxu0 %v5604_v0  ;;  %10939 = vmatpush3.msra.mxu1 %v6115_v44 }
 0x9d3   :  { %10907 = vmatprep.subr.mxu0 %v13582_v20  ;;  %10940 = vmatprep.subr.mxu1 %v6122_v53 }
 0x9d4   :  { %10908 = vmatpush3.msra.mxu0 %v5611_v24  ;;  %10941 = vmatpush3.msra.mxu1 %v6122_v53 }
 0x9d5   :  { %10909 = vmatprep.subr.mxu0 %v13582_v20  ;;  %10942 = vmatprep.subr.mxu1 %v6129_v54 }
 0x9d6   :  { %10910 = vmatpush3.msra.mxu0 %v5618_v61  ;;  %10911 = vmatprep.mubr.msk.f32.mxu0 %vm11700_vm4, %v13582_v20 }
 0x9d7   :  { %10943 = vmatpush3.msra.mxu1 %v6129_v54  ;;  %10912 = vmatmul.mubr.f32.vlgmr.msra.gmra.mxu0 %v12876_v34 }
 0x9d8   :  { %10925 = vmatprep.subr.mxu0 %v12881_v59  ;;  %10945 = vmatmul.mubr.f32.vlgmr.msra.gmra.mxu1 %v12166_v29 }
 0x9d9   :  { %10958 = vmatprep.subr.mxu1 %v12881_v59  ;;  %10926 = vmatpush3.msra.mxu0 %v12881_v59 }
 0x9da   :  { %10933 = vmatprep.mubr.f32.mxu0 %v12199_v45  ;;  %10959 = vmatpush3.msra.mxu1 %v12881_v59 }
 0x9db   :  { %10966 = vmatprep.mubr.f32.mxu1 %v12178_v36  ;;  %10927 = vmatprep.subr.mxu0 %v12891_v52 }
 0x9dc   :  { %10960 = vmatprep.subr.mxu1 %v12891_v52  ;;  %10928 = vmatpush3.msra.mxu0 %v12891_v52 }
 0x9dd   :  { %10961 = vmatpush3.msra.mxu1 %v12891_v52  ;;  %10929 = vmatprep.subr.mxu0 %v12901_v18 }
 0x9de   :  { %10962 = vmatprep.subr.mxu1 %v12901_v18  ;;  %10930 = vmatpush3.msra.mxu0 %v12901_v18 }
 0x9df   :  { %10963 = vmatpush3.msra.mxu1 %v12901_v18  ;;  %10931 = vmatprep.subr.mxu0 %v12908_v12 }
 0x9e0   :  { %10964 = vmatprep.subr.mxu1 %v12908_v12  ;;  %10932 = vmatpush3.msra.mxu0 %v12908_v12 }
 0x9e1   :  { %10965 = vmatpush3.msra.mxu1 %v12908_v12  ;;  %10934 = vmatmul.mubr.f32.vlgmr.msra.gmra.mxu0 %v12201_v46  ;;  %v9764_v46 = vld [vmem:[#allocation11 + $0x1] ss:$0 sm:$0xff] }
 0x9e2   :  { %10947 = vmatprep.subr.mxu0 %v12899_v39  ;;  %10967 = vmatmul.mubr.f32.vlgmr.msra.gmra.mxu1 %v12181_v37 }
 0x9e3   :  { %10980 = vmatprep.subr.mxu1 %v12881_v59  ;;  %10948 = vmatpush3.msra.mxu0 %v12899_v39 }
 0x9e4   :  { %10955 = vmatprep.mubr.f32.mxu0 %v12169_v32  ;;  %10981 = vmatpush3.msra.mxu1 %v12881_v59 }
 0x9e5   :  { %10988 = vmatprep.mubr.f32.mxu1 %v12164_v27  ;;  %10949 = vmatprep.subr.mxu0 %v12906_v62 }
 0x9e6   :  { %10982 = vmatprep.subr.mxu1 %v12891_v52  ;;  %10950 = vmatpush3.msra.mxu0 %v12906_v62 }
 0x9e7   :  { %10983 = vmatpush3.msra.mxu1 %v12891_v52  ;;  %10951 = vmatprep.subr.mxu0 %v12916_v40 }
 0x9e8   :  { %10984 = vmatprep.subr.mxu1 %v12901_v18  ;;  %10952 = vmatpush3.msra.mxu0 %v12916_v40 }
 0x9e9   :  { %10985 = vmatpush3.msra.mxu1 %v12901_v18  ;;  %10953 = vmatprep.subr.mxu0 %v12924_v9 }
 0x9ea   :  { %10986 = vmatprep.subr.mxu1 %v12908_v12  ;;  %10954 = vmatpush3.msra.mxu0 %v12924_v9 }
 0x9eb   :  { %10987 = vmatpush3.msra.mxu1 %v12908_v12  ;;  %10956 = vmatmul.mubr.f32.vlgmr.msra.gmra.mxu0 %v12172_v33 }
 0x9ec   :  { %10969 = vmatprep.subr.mxu0 %v12913_v50  ;;  %10989 = vmatmul.mubr.f32.vlgmr.msra.gmra.mxu1 %v12166_v29 }
 0x9ed   :  { %10970 = vmatpush3.msra.mxu0 %v12913_v50  ;;  %10977 = vmatprep.mubr.f32.mxu0 %v12164_v27 }
 0x9ee   :  { %10971 = vmatprep.subr.mxu0 %v12921_v21  ;;  %10998 = vmatprep.mubr.f32.mxu1 %v12207_v49 }
 0x9ef   :  { %10972 = vmatpush3.msra.mxu0 %v12921_v21 }
 0x9f0   :  { %10973 = vmatprep.subr.mxu0 %v12933_v28 }
 0x9f1   :  { %10974 = vmatpush3.msra.mxu0 %v12933_v28 }
 0x9f2   :  { %10975 = vmatprep.subr.mxu0 %v12942_v4 }
 0x9f3   :  { %10976 = vmatpush3.msra.mxu0 %v12942_v4 }
 0x9f4   :  { %10978 = vmatmul.mubr.f32.vlgmr.msra.gmra.mxu0 %v12166_v29 }
 0x9f5   :  { %10993 = vmatprep.mubr.f32.mxu0 %v12257_v63 }
 0xa7c   :  { %v5657_v32 = vpop.f32.mrf.mxu1 }
 0xa7e   :  { %v10880_v27 = vpop.f32.mrf.mxu1 }
 0xa84   :  { %v5814_v33 = vpop.f32.mrf.mxu1 }
 0xa85   :  { %v5566_v36 = vpop.f32.mrf.mxu0 }
 0xa86   :  { %v10902_v37 = vpop.f32.mrf.mxu1  ;;  %v5567_v60 = vadd.f32 %v9764_v46, %v5566_v36 }
 0xa87   :  { %v10869_v45 = vpop.f32.mrf.mxu0 }
 0xa88   :  { %v5658_v31 = vadd.f32 %v5657_v32, %v5567_v60 }
 0xa8d   :  { %v5737_v1 = vpop.f32.mrf.mxu0 }
 0xa8e   :  { %v5972_v25 = vpop.f32.mrf.mxu1  ;;  %v5738_v42 = vadd.f32 %v5737_v1, %v5658_v31 }
 0xa8f   :  { %v10891_v0 = vpop.f32.mrf.mxu0 }
 0xa90   :  { %v10924_v24 = vpop.f32.mrf.mxu1  ;;  %v5815_v61 = vadd.f32 %v5814_v33, %v5738_v42 }
 0xa97   :  { %v5897_v34 = vpop.f32.mrf.mxu0 }
 0xa98   :  { %v5898_v59 = vadd.f32 %v5897_v34, %v5815_v61 }
 0xa99   :  { %v10913_v29 = vpop.f32.mrf.mxu0 }
 0xa9a   :  { %v5973_v15 = vadd.f32 %v5972_v25, %v5898_v59 }
 0xa9c   :  { %v5976_v63 = vmul.f32 0.35355338, %v5973_v15 }
 0xa9e   :  { %v6519_v52 = vsel %vm2297_vm6, %v5976_v63, 0 }
 0xa9f   :  { %v6552_v39 = vand.u32 4294901760, %v6519_v52 }
 0xaa1   :  { %v6639_v18 = vsub.f32 %v6519_v52, %v6552_v39  ;;  %10991 = vmatprep.subr.mxu0 %v6552_v39 }
 0xaa2   :  { %10992 = vmatpush3.msra.mxu0 %v6552_v39 }
 0xaa3   :  { %10994 = vmatmul.mubr.f32.vlgmr.msra.gmra.mxu0 %v12262_v19  ;;  %11001 = vmatprep.subr.mxu0 %v6639_v18  ;;  %v6640_v51 = vand.u32 4294901760, %v6639_v18 }
 0xaa4   :  { %11002 = vmatpush3.msra.mxu0 %v6639_v18  ;;  %11003 = vmatprep.mubr.f32.mxu0 %v12220_v56 }
 0xaa5   :  { %11011 = vmatprep.subr.mxu0 %v6640_v51  ;;  %v6641_v62 = vsub.f32 %v6639_v18, %v6640_v51 }
 0xaa7   :  { %11004 = vmatmul.mubr.f32.vlgmr.msra.gmra.mxu0 %v12229_v11  ;;  %v6642_v12 = vand.u32 4294901760, %v6641_v62 }
 0xaa8   :  { %11012 = vmatpush3.msra.mxu0 %v6640_v51  ;;  %11013 = vmatprep.mubr.f32.mxu0 %v12207_v49 }
 0xaa9   :  { %10996 = vmatprep.subr.mxu1 %v6642_v12  ;;  %11021 = vmatprep.subr.mxu0 %v12278_v3 }
 0xaaa   :  { %10997 = vmatpush3.msra.mxu1 %v6642_v12 }
 0xaab   :  { %10999 = vmatmul.mubr.f32.vlgmr.msra.gmra.mxu1 %v12215_v55  ;;  %11006 = vmatprep.subr.mxu1 %v6552_v39 }
 0xaac   :  { %11007 = vmatpush3.msra.mxu1 %v6552_v39  ;;  %11008 = vmatprep.mubr.f32.mxu1 %v12234_v58  ;;  %v10946_v58 = vpop.f32.mrf.mxu1 }
 0xaad   :  { %11016 = vmatprep.subr.mxu1 %v6552_v39  ;;  %11014 = vmatmul.mubr.f32.vlgmr.msra.gmra.mxu0 %v12215_v55 }
 0xaae   :  { %11022 = vmatpush3.msra.mxu0 %v12278_v3  ;;  %v6166_v19 = vpop.f32.mrf.mxu1 }
 0xaaf   :  { %11009 = vmatmul.mubr.f32.vlgmr.msra.gmra.mxu1 %v12243_v16  ;;  %11023 = vmatprep.subr.mxu0 %v12286_v6 }
 0xab0   :  { %11017 = vmatpush3.msra.mxu1 %v6552_v39  ;;  %11018 = vmatprep.mubr.f32.mxu1 %v12207_v49  ;;  %v13593_v49 = vld [vmem:[#allocation34_spill] sm:$0xff] }
 0xab1   :  { %11032 = vmatprep.subr.mxu1 %v12318_v30  ;;  %11024 = vmatpush3.msra.mxu0 %v12286_v6 }
 0xab2   :  { %11025 = vmatprep.subr.mxu0 %v12299_v13 }
 0xab3   :  { %11019 = vmatmul.mubr.f32.vlgmr.msra.gmra.mxu1 %v12215_v55  ;;  %11026 = vmatpush3.msra.mxu0 %v12299_v13  ;;  %v10935_v55 = vpop.f32.mrf.mxu0 }
 0xab4   :  { %11033 = vmatpush3.msra.mxu1 %v12318_v30  ;;  %11027 = vmatprep.subr.mxu0 %v12314_v26  ;;  %v6076_v9 = vadd.f32 %v10935_v55, %v9769_v57 }
 0xab5   :  { %11034 = vmatprep.subr.mxu1 %v12331_v38  ;;  %11028 = vmatpush3.msra.mxu0 %v12314_v26  ;;  %v6065_v56 = vpop.f32.mrf.mxu0 }
 0xab6   :  { %11035 = vmatpush3.msra.mxu1 %v12331_v38  ;;  %11043 = vmatprep.subr.mxu0 %v12284_v5  ;;  %v10968_v38 = vpop.f32.mrf.mxu1  ;;  %v6066_v28 = vadd.f32 %v9769_v57, %v6065_v56  ;;  %v6173_v4 = vadd.f32 %v10946_v58, %v6076_v9 }
 0xab7   :  { %11036 = vmatprep.subr.mxu1 %v12341_v41  ;;  %v10957_v11 = vpop.f32.mrf.mxu0 }
 0xab8   :  { %11037 = vmatpush3.msra.mxu1 %v12341_v41  ;;  %v6336_v40 = vpop.f32.mrf.mxu1  ;;  %v6260_v7 = vadd.f32 %v10957_v11, %v6173_v4  ;;  %v6167_v44 = vadd.f32 %v6166_v19, %v6066_v28 }
 0xab9   :  { %11038 = vmatprep.subr.mxu1 %v13593_v49  ;;  %v6252_v16 = vpop.f32.mrf.mxu0 }
 0xaba   :  { %11039 = vmatpush3.msra.mxu1 %v13593_v49  ;;  %v10990_v41 = vpop.f32.mrf.mxu1  ;;  %v6253_v54 = vadd.f32 %v6252_v16, %v6167_v44  ;;  %v6345_v33 = vadd.f32 %v10968_v38, %v6260_v7 }
 0xabb   :  { %11054 = vmatprep.subr.mxu1 %v12278_v3  ;;  %v10979_v30 = vpop.f32.mrf.mxu0 }
 0xabc   :  { %v6508_v47 = vpop.f32.mrf.mxu1  ;;  %v6434_v60 = vadd.f32 %v10979_v30, %v6345_v33  ;;  %v6337_v1 = vadd.f32 %v6336_v40, %v6253_v54 }
 0xabd   :  { %v6427_v50 = vpop.f32.mrf.mxu0 }
 0xabe   :  { %v6428_v24 = vadd.f32 %v6427_v50, %v6337_v1  ;;  %v13056_v29 = vadd.f32 %v10990_v41, %v6434_v60 }
 0xac0   :  { %v13058_v39 = vadd.f32 %v6508_v47, %v6428_v24 }
 0xb63   :  { %v10995_v21 = vpop.f32.mrf.mxu0 }
 0xb65   :  { %v6593_v2 = vpop.f32.mrf.mxu0 }
 0xb67   :  { %v11005_v14 = vpop.f32.mrf.mxu0 }
 0xb69   :  { %v6759_v53 = vpop.f32.mrf.mxu0 }
 0xb6b   :  { %v11000_v43 = vpop.f32.mrf.mxu1 }
 0xb6c   :  { %v6686_v32 = vadd.f32 %v11000_v43, %v10995_v21 }
 0xb6d   :  { %v6679_v27 = vpop.f32.mrf.mxu1  ;;  %v11015_v46 = vpop.f32.mrf.mxu0 }
 0xb6e   :  { %v6680_v36 = vadd.f32 %v6679_v27, %v6593_v2  ;;  %v6767_v37 = vadd.f32 %v11005_v14, %v6686_v32 }
 0xb6f   :  { %v11010_v45 = vpop.f32.mrf.mxu1  ;;  %v6922_v34 = vpop.f32.mrf.mxu0 }
 0xb70   :  { %v6760_v25 = vadd.f32 %v6759_v53, %v6680_v36  ;;  %v6849_v0 = vadd.f32 %v11010_v45, %v6767_v37 }
 0xb71   :  { %v6840_v31 = vpop.f32.mrf.mxu1 }
 0xb72   :  { %v6841_v42 = vadd.f32 %v6840_v31, %v6760_v25  ;;  %v6929_v61 = vadd.f32 %v11015_v46, %v6849_v0 }
 0xb73   :  { %v11020_v59 = vpop.f32.mrf.mxu1 }
 0xb74   :  { %v6923_v15 = vadd.f32 %v6922_v34, %v6841_v42  ;;  %v7007_v63 = vadd.f32 %v11020_v59, %v6929_v61 }
 0xb75   :  { %v7000_v52 = vpop.f32.mrf.mxu1 }
 0xb76   :  { %v7011_v18 = vmul.f32 %v7007_v63, %v13056_v29  ;;  %v7001_v51 = vadd.f32 %v7000_v52, %v6923_v15 }
 0xb78   :  { %v7016_v62 = vsel %vm1256_vm3, %v7011_v18, 0  ;;  %v7010_v12 = vmul.f32 %v7001_v51, %v13058_v39 }
 0xb79   :  { %v7097_v49 = vand.u32 4294901760, %v7016_v62 }
 0xb7a   :  { %v7013_v55 = vsel %vm1256_vm3, %v7010_v12, 0 }
 0xb7b   :  { %v7098_v56 = vsub.f32 %v7016_v62, %v7097_v49  ;;  %v7087_v11 = vand.u32 4294901760, %v7013_v55 }
 0xb7d   :  { %v7088_v58 = vsub.f32 %v7013_v55, %v7087_v11  ;;  %11040 = vmatprep.mubr.f32.mxu1 %v7087_v11  ;;  %v7099_v16 = vand.u32 4294901760, %v7098_v56 }
 0xb7e   :  { %11041 = vmatmul.mubr.f32.vlgmr.msra.gmra.mxu1 %v7097_v49 }
 0xb7f   :  { %11055 = vmatpush3.msra.mxu1 %v12278_v3  ;;  %v7089_v19 = vand.u32 4294901760, %v7088_v58  ;;  %v7100_v38 = vsub.f32 %v7098_v56, %v7099_v16 }
 0xb80   :  { %11056 = vmatprep.subr.mxu1 %v12286_v6 }
 0xb81   :  { %11057 = vmatpush3.msra.mxu1 %v12286_v6  ;;  %11062 = vmatprep.mubr.f32.mxu1 %v7089_v19  ;;  %v7090_v30 = vsub.f32 %v7088_v58, %v7089_v19  ;;  %v7101_v50 = vand.u32 4294901760, %v7100_v38 }
 0xb82   :  { %11058 = vmatprep.subr.mxu1 %v12299_v13 }
 0xb83   :  { %11059 = vmatpush3.msra.mxu1 %v12299_v13  ;;  %v7091_v57 = vand.u32 4294901760, %v7090_v30 }
 0xb84   :  { %11060 = vmatprep.subr.mxu1 %v12314_v26 }
 0xb85   :  { %11061 = vmatpush3.msra.mxu1 %v12314_v26  ;;  %11029 = vmatprep.mubr.f32.mxu0 %v7091_v57 }
 0xb86   :  { %11063 = vmatmul.mubr.f32.vlgmr.msra.gmra.mxu1 %v7099_v16  ;;  %11076 = vmatprep.subr.mxu1 %v12278_v3 }
 0xb87   :  { %11030 = vmatmul.mubr.f32.vlgmr.msra.gmra.mxu0 %v7101_v50  ;;  %11077 = vmatpush3.msra.mxu1 %v12278_v3  ;;  %v13594_v3 = vld [vmem:[#allocation32_spill] sm:$0xff] }
 0xb88   :  { %11044 = vmatpush3.msra.mxu0 %v12284_v5  ;;  %11084 = vmatprep.mubr.f32.mxu1 %v7087_v11  ;;  %v13595_v5 = vld [vmem:[#allocation35_spill] sm:$0xff] }
 0xb89   :  { %11045 = vmatprep.subr.mxu0 %v12297_v10  ;;  %11051 = vmatprep.mubr.f32.mxu0 %v7088_v58 }
 0xb8a   :  { %11078 = vmatprep.subr.mxu1 %v12286_v6  ;;  %11046 = vmatpush3.msra.mxu0 %v12297_v10 }
 0xb8b   :  { %11079 = vmatpush3.msra.mxu1 %v12286_v6  ;;  %11047 = vmatprep.subr.mxu0 %v12312_v23  ;;  %v13596_v6 = vld [vmem:[#allocation33_spill] sm:$0xff] }
 0xb8c   :  { %11080 = vmatprep.subr.mxu1 %v12299_v13  ;;  %11048 = vmatpush3.msra.mxu0 %v12312_v23 }
 0xb8d   :  { %11081 = vmatpush3.msra.mxu1 %v12299_v13  ;;  %11049 = vmatprep.subr.mxu0 %v12326_v35 }
 0xb8e   :  { %11082 = vmatprep.subr.mxu1 %v12314_v26  ;;  %11050 = vmatpush3.msra.mxu0 %v12326_v35 }
 0xb8f   :  { %11083 = vmatpush3.msra.mxu1 %v12314_v26  ;;  %11052 = vmatmul.mubr.f32.vlgmr.msra.gmra.mxu0 %v7098_v56 }
 0xb90   :  { %11065 = vmatprep.subr.mxu0 %v12294_v8  ;;  %11085 = vmatmul.mubr.f32.vlgmr.msra.gmra.mxu1 %v7097_v49 }
 0xb91   :  { %11066 = vmatpush3.msra.mxu0 %v12294_v8  ;;  %11073 = vmatprep.mubr.f32.mxu0 %v7087_v11  ;;  %v13597_v8 = vld [vmem:[#allocation36_spill] sm:$0xff] }
 0xb92   :  { %11067 = vmatprep.subr.mxu0 %v12309_v22  ;;  %11092 = vmatprep.subr.mxu1 %v12408_v48 }
 0xb93   :  { %11068 = vmatpush3.msra.mxu0 %v12309_v22  ;;  %11093 = vmatpush3.msra.mxu1 %v12408_v48 }
 0xb94   :  { %11069 = vmatprep.subr.mxu0 %v13594_v3  ;;  %11102 = vmatprep.subr.mxu1 %v13595_v5 }
 0xb95   :  { %11070 = vmatpush3.msra.mxu0 %v13594_v3 }
 0xb96   :  { %11071 = vmatprep.subr.mxu0 %v13596_v6 }
 0xb97   :  { %11072 = vmatpush3.msra.mxu0 %v13596_v6 }
 0xb98   :  { %11074 = vmatmul.mubr.f32.vlgmr.msra.gmra.mxu0 %v7097_v49  ;;  %11087 = vmatprep.subr.mxu0 %v13595_v5 }
 0xb99   :  { %11088 = vmatpush3.msra.mxu0 %v13595_v5 }
 0xb9a   :  { %11097 = vmatprep.subr.mxu0 %v13597_v8 }
 0xc3e   :  { %v11042_v13 = vpop.f32.mrf.mxu1 }
 0xc40   :  { %v7194_v26 = vpop.f32.mrf.mxu1 }
 0xc46   :  { %v11064_v48 = vpop.f32.mrf.mxu1 }
 0xc47   :  { %v11031_v10 = vpop.f32.mrf.mxu0 }
 0xc48   :  { %v7201_v35 = vadd.f32 %v11042_v13, %v11031_v10  ;;  %v7364_v2 = vpop.f32.mrf.mxu1 }
 0xc49   :  { %v7093_v22 = vpop.f32.mrf.mxu0 }
 0xc4a   :  { %v7195_v21 = vadd.f32 %v7194_v26, %v7093_v22 }
 0xc4f   :  { %v11053_v23 = vpop.f32.mrf.mxu0 }
 0xc50   :  { %v7288_v9 = vadd.f32 %v11053_v23, %v7201_v35  ;;  %v11086_v14 = vpop.f32.mrf.mxu1 }
 0xc51   :  { %v7280_v40 = vpop.f32.mrf.mxu0 }
 0xc52   :  { %v7281_v41 = vadd.f32 %v7280_v40, %v7195_v21  ;;  %v7373_v28 = vadd.f32 %v11064_v48, %v7288_v9  ;;  %v7536_v54 = vpop.f32.mrf.mxu1 }
 0xc54   :  { %v7365_v7 = vadd.f32 %v7364_v2, %v7281_v41 }
 0xc58   :  { %v11075_v4 = vpop.f32.mrf.mxu0 }
 0xc59   :  { %v7462_v47 = vadd.f32 %v11075_v4, %v7373_v28 }
 0xc5a   :  { %v7455_v44 = vpop.f32.mrf.mxu0 }
 0xc5b   :  { %v7543_v43 = vadd.f32 %v11086_v14, %v7462_v47  ;;  %v7456_v53 = vadd.f32 %v7455_v44, %v7365_v7 }
 0xc5d   :  { %v7553_v32 = vsel %vm773_vm1, %v7543_v43, -inf  ;;  %v7537_v27 = vadd.f32 %v7536_v54, %v7456_v53  ;;  %v13598_v54 = vld [vmem:[#allocation37_spill] sm:$0xff] }
 0xc5e   :  { %v7554_v33 = vrot.slane %v7553_v32, 4 }
 0xc5f   :  { %v7546_v36 = vsel %vm773_vm1, %v7537_v27, -inf }
 0xc60   :  { %v7555_v37 = vmax.f32 %v7553_v32, %v7554_v33  ;;  %v7547_v45 = vrot.slane %v7546_v36, 4  ;;  %v9772_v32 = vld [vmem:[%s13516_s13 + $0x30] sm:$0xff] }
 0xc61   :  { %v13129_v33 = vand.u32 4294901760, %v9772_v32 }
 0xc62   :  { %v7556_v46 = vrot.slane %v7555_v37, 2  ;;  %v7548_v60 = vmax.f32 %v7546_v36, %v7547_v45  ;;  %v9771_v36 = vld [vmem:[%s13516_s13 + $0x28] sm:$0xff] }
 0xc63   :  { %v13138_v45 = vsub.f32 %v9772_v32, %v13129_v33 }
 0xc64   :  { %v7557_v1 = vmax.f32 %v7555_v37, %v7556_v46  ;;  %v7549_v25 = vrot.slane %v7548_v60, 2  ;;  %v13140_v46 = vand.u32 4294901760, %v9771_v36 }
 0xc66   :  { %v7558_v0 = vrot.slane %v7557_v1, 1  ;;  %v7550_v31 = vmax.f32 %v7548_v60, %v7549_v25  ;;  %v9770_v60 = vld [vmem:[%s13516_s13 + $0x20] sm:$0xff]  ;;  %v8232_v25 = vand.u32 4294901760, %v13138_v45 }
 0xc68   :  { %v7559_v24 = vmax.f32 %v7557_v1, %v7558_v0  ;;  %v7551_v42 = vrot.slane %v7550_v31, 1  ;;  %v13152_v0 = vsub.f32 %v9771_v36, %v13140_v46 }
 0xc6a   :  { %v7561_v61 = vsub.f32 %v7543_v43, %v7559_v24  ;;  %v7552_v34 = vmax.f32 %v7550_v31, %v7551_v42  ;;  %v13154_v31 = vand.u32 4294901760, %v9770_v60  ;;  %v8233_v42 = vsub.f32 %v13138_v45, %v8232_v25 }
 0xc6c   :  { %v7564_v59 = vmul.f32 1.442695, %v7561_v61  ;;  %v7560_v15 = vsub.f32 %v7537_v27, %v7552_v34  ;;  %v8239_v61 = vand.u32 4294901760, %v13152_v0  ;;  %v13163_v34 = vsub.f32 %v9770_v60, %v13154_v31 }
 0xc6e   :  { %11371 = vpow2.f32 %v7564_v59  ;;  %v7562_v63 = vmul.f32 1.442695, %v7560_v15  ;;  %v8234_v59 = vand.u32 4294901760, %v8233_v42  ;;  %v8240_v15 = vsub.f32 %v13152_v0, %v8239_v61 }
 0xc70   :  { %11373 = vpow2.f32 %v7562_v63  ;;  %v8246_v63 = vand.u32 4294901760, %v13163_v34 }
 0xc7b   :  { %v11372_v52 = vpop.eup %11371 }
 0xc7c   :  { %v7573_v18 = vsel %vm773_vm1, %v11372_v52, 0.0 }
 0xc7d   :  { %v11374_v51 = vpop.eup %11373  ;;  %v7574_v62 = vrot.slane %v7573_v18, 4 }
 0xc7e   :  { %v7566_v12 = vsel %vm773_vm1, %v11374_v51, 0.0 }
 0xc7f   :  { %v7575_v49 = vadd.f32 %v7574_v62, %v7573_v18  ;;  %v7567_v55 = vrot.slane %v7566_v12, 4  ;;  %v8247_v18 = vsub.f32 %v13163_v34, %v8246_v63 }
 0xc81   :  { %v7568_v56 = vadd.f32 %v7567_v55, %v7566_v12  ;;  %v7576_v11 = vrot.slane %v7575_v49, 2 }
 0xc83   :  { %v7569_v58 = vrot.slane %v7568_v56, 2  ;;  %v7577_v16 = vadd.f32 %v7576_v11, %v7575_v49 }
 0xc85   :  { %v7570_v19 = vadd.f32 %v7569_v58, %v7568_v56  ;;  %v7578_v30 = vrot.slane %v7577_v16, 1 }
 0xc87   :  { %v7571_v38 = vrot.slane %v7570_v19, 1  ;;  %v7579_v57 = vadd.f32 %v7578_v30, %v7577_v16 }
 0xc89   :  { %v7572_v50 = vadd.f32 %v7571_v38, %v7570_v19  ;;  %11375 = vrcp.f32 %v7579_v57 }
 0xc8b   :  { %11377 = vrcp.f32 %v7572_v50 }
 0xc96   :  { %v11376_v3 = vpop.eup %11375 }
 0xc97   :  { %v7583_v6 = vmul.f32 %v11376_v3, %v7579_v57 }
 0xc98   :  { %v11378_v10 = vpop.eup %11377 }
 0xc99   :  { %v7582_v13 = vmul.f32 %v11378_v10, %v7572_v50  ;;  %v7585_v22 = vsub.f32 2.0, %v7583_v6 }
 0xc9b   :  { %v7584_v23 = vsub.f32 2.0, %v7582_v13  ;;  %v7587_v26 = vmul.f32 %v11376_v3, %v7585_v22 }
 0xc9d   :  { %v7586_v35 = vmul.f32 %v11378_v10, %v7584_v23  ;;  %v7589_v48 = vmul.f32 %v11372_v52, %v7587_v26  ;;  %v8241_v52 = vand.u32 4294901760, %v8240_v15 }
 0xc9f   :  { %v7588_v40 = vmul.f32 %v11374_v51, %v7586_v35  ;;  %v7594_v21 = vsel %vm773_vm1, %v7589_v48, 0  ;;  %v8248_v51 = vand.u32 4294901760, %v8247_v18 }
 0xca0   :  { %v7672_v9 = vand.u32 4294901760, %v7594_v21 }
 0xca1   :  { %v7591_v41 = vsel %vm773_vm1, %v7588_v40, 0 }
 0xca2   :  { %v7662_v2 = vand.u32 4294901760, %v7591_v41  ;;  %v7673_v28 = vsub.f32 %v7594_v21, %v7672_v9 }
 0xca4   :  { %11094 = vmatprep.mubr.f32.mxu1 %v7662_v2  ;;  %v7663_v14 = vsub.f32 %v7591_v41, %v7662_v2  ;;  %v7674_v4 = vand.u32 4294901760, %v7673_v28 }
 0xca5   :  { %11095 = vmatmul.mubr.f32.vlgmr.msra.gmra.mxu1 %v7672_v9 }
 0xca6   :  { %11103 = vmatpush3.msra.mxu1 %v13595_v5  ;;  %v7664_v47 = vand.u32 4294901760, %v7663_v14  ;;  %v7675_v7 = vsub.f32 %v7673_v28, %v7674_v4 }
 0xca7   :  { %11112 = vmatprep.subr.mxu1 %v13595_v5 }
 0xca8   :  { %11104 = vmatprep.mubr.f32.mxu1 %v7664_v47  ;;  %v7665_v44 = vsub.f32 %v7663_v14, %v7664_v47  ;;  %v7676_v53 = vand.u32 4294901760, %v7675_v7 }
 0xca9   :  { %11105 = vmatmul.mubr.f32.vlgmr.msra.gmra.mxu1 %v7674_v4 }
 0xcaa   :  { %11114 = vmatprep.mubr.f32.mxu1 %v7662_v2  ;;  %v7666_v43 = vand.u32 4294901760, %v7665_v44  ;;  %11113 = vmatpush3.msra.mxu1 %v13595_v5  ;;  %v9773_v5 = vld [vmem:[%s13516_s13 + $0x38] sm:$0xff] }
 0xcab   :  { %11128 = vmatprep.subr.mxu1 %v13582_v20 }
 0xcac   :  { %11089 = vmatprep.mubr.f32.mxu0 %v7666_v43 }
 0xcad   :  { %11090 = vmatmul.mubr.f32.vlgmr.msra.gmra.mxu0 %v7676_v53  ;;  %11115 = vmatmul.mubr.f32.vlgmr.msra.gmra.mxu1 %v7672_v9 }
 0xcae   :  { %11099 = vmatprep.mubr.f32.mxu0 %v7663_v14  ;;  %11098 = vmatpush3.msra.mxu0 %v13597_v8  ;;  %v13121_v8 = vand.u32 4294901760, %v9773_v5 }
 0xcaf   :  { %11107 = vmatprep.subr.mxu0 %v13598_v54  ;;  %11136 = vmatprep.mubr.msk.f32.mxu1 %vm11700_vm4, %v13582_v20 }
 0xcb0   :  { %v13127_v27 = vsub.f32 %v9773_v5, %v13121_v8 }
 0xcb1   :  { %11100 = vmatmul.mubr.f32.vlgmr.msra.gmra.mxu0 %v7673_v28 }
 0xcb2   :  { %11109 = vmatprep.mubr.f32.mxu0 %v7662_v2  ;;  %11108 = vmatpush3.msra.mxu0 %v13598_v54  ;;  %v8225_v37 = vand.u32 4294901760, %v13127_v27 }
 0xcb3   :  { %11117 = vmatprep.subr.mxu0 %v13582_v20 }
 0xcb4   :  { %v8226_v1 = vsub.f32 %v13127_v27, %v8225_v37 }
 0xcb5   :  { %11110 = vmatmul.mubr.f32.vlgmr.msra.gmra.mxu0 %v7672_v9 }
 0xcb6   :  { %11125 = vmatprep.mubr.msk.f32.mxu0 %vm11700_vm4, %v13582_v20  ;;  %11118 = vmatpush3.msra.mxu0 %v13121_v8  ;;  %v8227_v24 = vand.u32 4294901760, %v8226_v1 }
 0xcb7   :  { %11119 = vmatprep.subr.mxu0 %v13582_v20 }
 0xcb8   :  { %11120 = vmatpush3.msra.mxu0 %v13129_v33  ;;  %11129 = vmatpush3.msra.mxu1 %v8227_v24 }
 0xcb9   :  { %11121 = vmatprep.subr.mxu0 %v13582_v20  ;;  %11130 = vmatprep.subr.mxu1 %v13582_v20 }
 0xcba   :  { %11122 = vmatpush3.msra.mxu0 %v13140_v46  ;;  %11131 = vmatpush3.msra.mxu1 %v8234_v59 }
 0xcbb   :  { %11123 = vmatprep.subr.mxu0 %v13582_v20  ;;  %11132 = vmatprep.subr.mxu1 %v13582_v20 }
 0xcbc   :  { %11124 = vmatpush3.msra.mxu0 %v13154_v31  ;;  %11133 = vmatpush3.msra.mxu1 %v8241_v52 }
 0xcbd   :  { %11139 = vmatprep.subr.mxu0 %v13582_v20  ;;  %11134 = vmatprep.subr.mxu1 %v13582_v20 }
 0xcbe   :  { %11135 = vmatpush3.msra.mxu1 %v8248_v51 }
 0xcbf   :  { %11150 = vmatprep.subr.mxu1 %v13582_v20 }
 0xd65   :  { %v11096_v62 = vpop.f32.mrf.mxu1 }
 0xd67   :  { %v7754_v12 = vpop.f32.mrf.mxu1 }
 0xd69   :  { %v11106_v49 = vpop.f32.mrf.mxu1 }
 0xd6b   :  { %v7915_v58 = vpop.f32.mrf.mxu1 }
 0xd6d   :  { %v11091_v55 = vpop.f32.mrf.mxu0  ;;  %v11116_v3 = vpop.f32.mrf.mxu1 }
 0xd6e   :  { %v7761_v11 = vadd.f32 %v11096_v62, %v11091_v55 }
 0xd6f   :  { %v7668_v56 = vpop.f32.mrf.mxu0  ;;  %v8075_v35 = vpop.f32.mrf.mxu1 }
 0xd70   :  { %v7755_v19 = vadd.f32 %v7754_v12, %v7668_v56 }
 0xd71   :  { %v11101_v16 = vpop.f32.mrf.mxu0 }
 0xd72   :  { %v7842_v30 = vadd.f32 %v11101_v16, %v7761_v11 }
 0xd73   :  { %v7834_v38 = vpop.f32.mrf.mxu0 }
 0xd74   :  { %v7835_v57 = vadd.f32 %v7834_v38, %v7755_v19  ;;  %v7924_v50 = vadd.f32 %v11106_v49, %v7842_v30  ;;  %v8639_v19 = vld [vmem:[#allocation19 + $0x38] sm:$0xff]  ;;  %v8638_v30 = vld [vmem:[#allocation19 + $0x30] sm:$0xff]  ;;  %v8637_v38 = vld [vmem:[#allocation19 + $0x28] sm:$0xff] }
 0xd75   :  { %v11111_v6 = vpop.f32.mrf.mxu0 }
 0xd76   :  { %v8004_v10 = vadd.f32 %v11111_v6, %v7924_v50  ;;  %v7916_v13 = vadd.f32 %v7915_v58, %v7835_v57  ;;  %v13234_v57 = vand.u32 4294901760, %v8639_v19  ;;  %v13236_v50 = vand.u32 4294901760, %v8638_v30  ;;  %v8636_v6 = vld [vmem:[#allocation19 + $0x20] sm:$0xff] }
 0xd77   :  { %v7997_v22 = vpop.f32.mrf.mxu0 }
 0xd78   :  { %v8082_v23 = vadd.f32 %v11116_v3, %v8004_v10  ;;  %v7998_v26 = vadd.f32 %v7997_v22, %v7916_v13  ;;  %v13238_v3 = vand.u32 4294901760, %v8637_v38  ;;  %v13240_v10 = vand.u32 4294901760, %v8636_v6 }
 0xd79   :  { %v13243_v13 = vsub.f32 %v8639_v19, %v13234_v57  ;;  %v13246_v22 = vsub.f32 %v8638_v30, %v13236_v50 }
 0xd7a   :  { %v8086_v48 = vmul.f32 %v8082_v23, %v13056_v29  ;;  %v8076_v40 = vadd.f32 %v8075_v35, %v7998_v26  ;;  %v13249_v23 = vsub.f32 %v8637_v38, %v13238_v3  ;;  %v13253_v26 = vsub.f32 %v8636_v6, %v13240_v10 }
 0xd7b   :  { %v8757_v35 = vand.u32 4294901760, %v13243_v13 }
 0xd7c   :  { %v8094_v21 = vsel %vm1256_vm3, %v8086_v48, 0.0  ;;  %v8085_v9 = vmul.f32 %v8076_v40, %v13058_v39  ;;  %v8764_v48 = vand.u32 4294901760, %v13246_v22  ;;  %v8771_v40 = vand.u32 4294901760, %v13249_v23 }
 0xd7d   :  { %v8095_v41 = vrot.slane %v8094_v21, 4 }
 0xd7e   :  { %v8087_v2 = vsel %vm1256_vm3, %v8085_v9, 0.0  ;;  %v8758_v9 = vsub.f32 %v13243_v13, %v8757_v35 }
 0xd7f   :  { %v8096_v28 = vadd.f32 %v8095_v41, %v8094_v21  ;;  %v8088_v14 = vrot.slane %v8087_v2, 4  ;;  %v8778_v21 = vand.u32 4294901760, %v13253_v26  ;;  %v8765_v41 = vsub.f32 %v13246_v22, %v8764_v48 }
 0xd81   :  { %v8097_v4 = vrot.slane %v8096_v28, 2  ;;  %v8089_v47 = vadd.f32 %v8088_v14, %v8087_v2  ;;  %v8772_v2 = vsub.f32 %v13249_v23, %v8771_v40  ;;  %v8766_v14 = vand.u32 4294901760, %v8765_v41 }
 0xd83   :  { %v8098_v7 = vadd.f32 %v8097_v4, %v8096_v28  ;;  %v8090_v44 = vrot.slane %v8089_v47, 2  ;;  %v8759_v28 = vand.u32 4294901760, %v8758_v9  ;;  %v8779_v4 = vsub.f32 %v13253_v26, %v8778_v21 }
 0xd85   :  { %v8099_v43 = vrot.slane %v8098_v7, 1  ;;  %v8091_v53 = vadd.f32 %v8090_v44, %v8089_v47  ;;  %v8773_v47 = vand.u32 4294901760, %v8772_v2 }
 0xd87   :  { %v8092_v54 = vrot.slane %v8091_v53, 1  ;;  %v8100_v5 = vadd.f32 %v8099_v43, %v8098_v7  ;;  %v8780_v7 = vand.u32 4294901760, %v8779_v4 }
 0xd89   :  { %v8093_v32 = vadd.f32 %v8092_v54, %v8091_v53 }
 0xd8b   :  { %v8116_v29 = vsel %vm3897_vm7, %v8100_v5, %v8093_v32  ;;  %v9775_v5 = vld [vmem:[#allocation16 + $0x1] ss:$0 sm:$0xff] }
 0xd8c   :  { %v8117_v36 = vsel %vm1256_vm3, %v8116_v29, 0  ;;  %v9776_v29 = vld [vmem:[#allocation17 + $0x1] ss:$0 sm:$0xff] }
 0xd8d   :  { %v8188_v60 = vand.u32 4294901760, %v8117_v36 }
 0xd8f   :  { %v8189_v39 = vsub.f32 %v8117_v36, %v8188_v60  ;;  %11137 = vmatmul.mubr.f32.vlgmr.msra.gmra.mxu1 %v8188_v60 }
 0xd90   :  { %11151 = vmatpush3.msra.mxu1 %v13121_v8  ;;  %11158 = vmatprep.mubr.msk.f32.mxu1 %vm11700_vm4, %v13582_v20 }
 0xd91   :  { %11152 = vmatprep.subr.mxu1 %v13582_v20  ;;  %v8190_v1 = vand.u32 4294901760, %v8189_v39 }
 0xd92   :  { %11153 = vmatpush3.msra.mxu1 %v13129_v33 }
 0xd93   :  { %11154 = vmatprep.subr.mxu1 %v13582_v20  ;;  %v8191_v24 = vsub.f32 %v8189_v39, %v8190_v1 }
 0xd94   :  { %11155 = vmatpush3.msra.mxu1 %v13140_v46 }
 0xd95   :  { %11156 = vmatprep.subr.mxu1 %v13582_v20  ;;  %v8192_v42 = vand.u32 4294901760, %v8191_v24 }
 0xd96   :  { %11157 = vmatpush3.msra.mxu1 %v13154_v31 }
 0xd97   :  { %11159 = vmatmul.mubr.f32.vlgmr.msra.gmra.mxu1 %v8190_v1  ;;  %11172 = vmatprep.subr.mxu1 %v13582_v20 }
 0xd98   :  { %11126 = vmatmul.mubr.f32.vlgmr.msra.gmra.mxu0 %v8192_v42  ;;  %11173 = vmatpush3.msra.mxu1 %v13121_v8 }
 0xd99   :  { %11140 = vmatpush3.msra.mxu0 %v13127_v27  ;;  %11174 = vmatprep.subr.mxu1 %v13582_v20 }
 0xd9a   :  { %11141 = vmatprep.subr.mxu0 %v13582_v20  ;;  %11175 = vmatpush3.msra.mxu1 %v13129_v33 }
 0xd9b   :  { %11142 = vmatpush3.msra.mxu0 %v13138_v45  ;;  %11176 = vmatprep.subr.mxu1 %v13582_v20 }
 0xd9c   :  { %11143 = vmatprep.subr.mxu0 %v13582_v20  ;;  %11177 = vmatpush3.msra.mxu1 %v13140_v46 }
 0xd9d   :  { %11144 = vmatpush3.msra.mxu0 %v13152_v0  ;;  %11178 = vmatprep.subr.mxu1 %v13582_v20 }
 0xd9e   :  { %11145 = vmatprep.subr.mxu0 %v13582_v20  ;;  %11147 = vmatprep.mubr.msk.f32.mxu0 %vm11700_vm4, %v13582_v20 }
 0xd9f   :  { %11146 = vmatpush3.msra.mxu0 %v13163_v34  ;;  %11179 = vmatpush3.msra.mxu1 %v13154_v31 }
 0xda0   :  { %11180 = vmatprep.mubr.msk.f32.mxu1 %vm11700_vm4, %v13582_v20  ;;  %11148 = vmatmul.mubr.f32.vlgmr.msra.gmra.mxu0 %v8189_v39 }
 0xda1   :  { %11161 = vmatprep.subr.mxu0 %v13582_v20  ;;  %11181 = vmatmul.mubr.f32.vlgmr.msra.gmra.mxu1 %v8188_v60 }
 0xda2   :  { %11162 = vmatpush3.msra.mxu0 %v8225_v37  ;;  %11169 = vmatprep.mubr.msk.f32.mxu0 %vm11700_vm4, %v13582_v20 }
 0xda3   :  { %11163 = vmatprep.subr.mxu0 %v13582_v20  ;;  %11194 = vmatprep.subr.mxu1 %v13582_v20 }
 0xda4   :  { %11164 = vmatpush3.msra.mxu0 %v8232_v25  ;;  %11202 = vmatprep.mubr.msk.f32.mxu1 %vm11700_vm4, %v13582_v20  ;;  %v9774_v25 = vld [vmem:[#allocation14 + $0x1] ss:$0 sm:$0xff] }
 0xda5   :  { %11165 = vmatprep.subr.mxu0 %v13582_v20  ;;  %11195 = vmatpush3.msra.mxu1 %v8759_v28  ;;  %v9777_v28 = vld [vmem:[#allocation20 + $0x1] ss:$0 sm:$0xff] }
 0xda6   :  { %11166 = vmatpush3.msra.mxu0 %v8239_v61  ;;  %11196 = vmatprep.subr.mxu1 %v13582_v20 }
 0xda7   :  { %11167 = vmatprep.subr.mxu0 %v13582_v20  ;;  %11197 = vmatpush3.msra.mxu1 %v8766_v14 }
 0xda8   :  { %11168 = vmatpush3.msra.mxu0 %v8246_v63  ;;  %11198 = vmatprep.subr.mxu1 %v13582_v20 }
 0xda9   :  { %11170 = vmatmul.mubr.f32.vlgmr.msra.gmra.mxu0 %v8188_v60  ;;  %11183 = vmatprep.subr.mxu0 %v13582_v20 }
 0xdaa   :  { %11191 = vmatprep.mubr.msk.f32.mxu0 %vm11700_vm4, %v13582_v20  ;;  %11184 = vmatpush3.msra.mxu0 %v13234_v57 }
 0xdab   :  { %11185 = vmatprep.subr.mxu0 %v13582_v20  ;;  %11199 = vmatpush3.msra.mxu1 %v8773_v47 }
 0xdac   :  { %11186 = vmatpush3.msra.mxu0 %v13236_v50  ;;  %11200 = vmatprep.subr.mxu1 %v13582_v20 }
 0xdad   :  { %11187 = vmatprep.subr.mxu0 %v13582_v20  ;;  %11201 = vmatpush3.msra.mxu1 %v8780_v7 }
 0xdae   :  { %11188 = vmatpush3.msra.mxu0 %v13238_v3  ;;  %11216 = vmatprep.subr.mxu1 %v13582_v20 }
 0xdaf   :  { %11189 = vmatprep.subr.mxu0 %v13582_v20 }
 0xdb0   :  { %11190 = vmatpush3.msra.mxu0 %v13240_v10 }
 0xdb1   :  { %11205 = vmatprep.subr.mxu0 %v13582_v20 }
 0xe4f   :  { %v8285_v8 = vpop.f32.mrf.mxu1 }
 0xe51   :  { %v11138_v27 = vpop.f32.mrf.mxu1 }
 0xe57   :  { %v8442_v33 = vpop.f32.mrf.mxu1 }
 0xe58   :  { %v8194_v37 = vpop.f32.mrf.mxu0 }
 0xe59   :  { %v11160_v45 = vpop.f32.mrf.mxu1  ;;  %v8195_v0 = vadd.f32 %v9774_v25, %v8194_v37 }
 0xe5a   :  { %v11127_v46 = vpop.f32.mrf.mxu0  ;;  %v9782_v45 = vld [vmem:[%s13522_s19 + $0x50] sm:$0xff] }
 0xe5b   :  { %v8286_v59 = vadd.f32 %v8285_v8, %v8195_v0  ;;  %v13342_v25 = vand.u32 4294901760, %v9782_v45  ;;  %v9781_v0 = vld [vmem:[%s13522_s19 + $0x48] sm:$0xff] }
 0xe60   :  { %v8365_v31 = vpop.f32.mrf.mxu0 }
 0xe61   :  { %v8600_v61 = vpop.f32.mrf.mxu1  ;;  %v8366_v63 = vadd.f32 %v8365_v31, %v8286_v59  ;;  %v13353_v59 = vand.u32 4294901760, %v9781_v0 }
 0xe62   :  { %v11149_v15 = vpop.f32.mrf.mxu0 }
 0xe63   :  { %v11182_v34 = vpop.f32.mrf.mxu1  ;;  %v8443_v52 = vadd.f32 %v8442_v33, %v8366_v63  ;;  %v9783_v33 = vld [vmem:[%s13522_s19 + $0x58] sm:$0xff]  ;;  %v9780_v15 = vld [vmem:[%s13522_s19 + $0x40] sm:$0xff] }
 0xe64   :  { %v13334_v37 = vand.u32 4294901760, %v9783_v33 }
 0xe66   :  { %v13340_v46 = vsub.f32 %v9783_v33, %v13334_v37 }
 0xe68   :  { %v9259_v31 = vand.u32 4294901760, %v13340_v46 }
 0xe69   :  { %v8525_v18 = vpop.f32.mrf.mxu0 }
 0xe6a   :  { %v8526_v51 = vadd.f32 %v8525_v18, %v8443_v52  ;;  %v9260_v34 = vsub.f32 %v13340_v46, %v9259_v31  ;;  %v13365_v52 = vsub.f32 %v9781_v0, %v13353_v59  ;;  %v13367_v18 = vand.u32 4294901760, %v9780_v15 }
 0xe6b   :  { %v11171_v62 = vpop.f32.mrf.mxu0 }
 0xe6c   :  { %v8601_v12 = vadd.f32 %v8600_v61, %v8526_v51  ;;  %v13351_v61 = vsub.f32 %v9782_v45, %v13342_v25  ;;  %v9779_v51 = vld [vmem:[%s13522_s19 + $0x38] sm:$0xff]  ;;  %v9261_v62 = vand.u32 4294901760, %v9260_v34 }
 0xe6e   :  { %v8608_v49 = vsel %vm4388_vm8, %v8601_v12, 0.0  ;;  %v9266_v63 = vand.u32 4294901760, %v13351_v61 }
 0xe6f   :  { %8609 = vadd.xlane.f32.xlu0 %v8608_v49  ;;  %v9273_v49 = vand.u32 4294901760, %v13365_v52 }
 0xef8   :  { %v8610_v55 = vpop.xlane.xlu0 %8609 }
 0xef9   :  { %v8611_v56 = vmul.f32 0.03125, %v8610_v55  ;;  %v13379_v55 = vsub.f32 %v9780_v15, %v13367_v18 }
 0xefb   :  { %v8612_v11 = vsub.f32 %v8601_v12, %v8611_v56  ;;  %v9267_v12 = vsub.f32 %v13351_v61, %v9266_v63  ;;  %v13382_v56 = vand.u32 4294901760, %v9779_v51  ;;  %v9280_v19 = vand.u32 4294901760, %v13379_v55 }
 0xefd   :  { %v8613_v58 = vmul.f32 %v8612_v11, %v8612_v11  ;;  %v13396_v38 = vsub.f32 %v9779_v51, %v13382_v56 }
 0xeff   :  { %v8614_v16 = vsel %vm4388_vm8, %v8613_v58, 0.0  ;;  %v9268_v58 = vand.u32 4294901760, %v9267_v12  ;;  %v9287_v6 = vand.u32 4294901760, %v13396_v38 }
 0xf00   :  { %8615 = vadd.xlane.f32.xlu1 %v8614_v16  ;;  %v9274_v16 = vsub.f32 %v13365_v52, %v9273_v49 }
 0xf89   :  { %v8616_v44 = vpop.xlane.xlu1 %8615 }
 0xf8a   :  { %v8617_v43 = vmul.f32 0.03125, %v8616_v44 }
 0xf8c   :  { %v8618_v53 = vadd.f32 1e-05, %v8617_v43 }
 0xf8e   :  { %11379 = vrsqrt.f32 %v8618_v53 }
 0xf9b   :  { %v11380_v54 = vpop.eup %11379 }
 0xf9c   :  { %v8620_v32 = vmul.f32 %v11380_v54, %v8612_v11  ;;  %v9778_v11 = vld [vmem:[%s13522_s19 + $0x30] sm:$0xff] }
 0xf9d   :  { %v13392_v30 = vand.u32 4294901760, %v9778_v11 }
 0xf9e   :  { %v8627_v36 = vmul.f32 %v9775_v5, %v8620_v32 }
 0xfa0   :  { %v8634_v60 = vadd.f32 %v9776_v29, %v8627_v36 }
 0xfa2   :  { %v8649_v39 = vsel %vm1256_vm3, %v8634_v60, 0 }
 0xfa3   :  { %v8720_v1 = vand.u32 4294901760, %v8649_v39 }
 0xfa5   :  { %v8721_v24 = vsub.f32 %v8649_v39, %v8720_v1  ;;  %11203 = vmatmul.mubr.f32.vlgmr.msra.gmra.mxu1 %v8720_v1 }
 0xfa6   :  { %11217 = vmatpush3.msra.mxu1 %v13234_v57  ;;  %11224 = vmatprep.mubr.msk.f32.mxu1 %vm11700_vm4, %v13582_v20 }
 0xfa7   :  { %11218 = vmatprep.subr.mxu1 %v13582_v20  ;;  %v8722_v42 = vand.u32 4294901760, %v8721_v24 }
 0xfa8   :  { %11219 = vmatpush3.msra.mxu1 %v13236_v50 }
 0xfa9   :  { %11220 = vmatprep.subr.mxu1 %v13582_v20  ;;  %v8723_v8 = vsub.f32 %v8721_v24, %v8722_v42 }
 0xfaa   :  { %11221 = vmatpush3.msra.mxu1 %v13238_v3 }
 0xfab   :  { %11222 = vmatprep.subr.mxu1 %v13582_v20  ;;  %v8724_v27 = vand.u32 4294901760, %v8723_v8 }
 0xfac   :  { %11223 = vmatpush3.msra.mxu1 %v13240_v10 }
 0xfad   :  { %11225 = vmatmul.mubr.f32.vlgmr.msra.gmra.mxu1 %v8722_v42  ;;  %11238 = vmatprep.subr.mxu1 %v13582_v20 }
 0xfae   :  { %11192 = vmatmul.mubr.f32.vlgmr.msra.gmra.mxu0 %v8724_v27  ;;  %11239 = vmatpush3.msra.mxu1 %v13234_v57  ;;  %v9275_v57 = vand.u32 4294901760, %v9274_v16 }
 0xfaf   :  { %11206 = vmatpush3.msra.mxu0 %v13243_v13  ;;  %11240 = vmatprep.subr.mxu1 %v13582_v20 }
 0xfb0   :  { %11207 = vmatprep.subr.mxu0 %v13582_v20  ;;  %11241 = vmatpush3.msra.mxu1 %v13236_v50  ;;  %v9281_v50 = vsub.f32 %v13379_v55, %v9280_v19 }
 0xfb1   :  { %11208 = vmatpush3.msra.mxu0 %v13246_v22  ;;  %11242 = vmatprep.subr.mxu1 %v13582_v20  ;;  %v9288_v22 = vsub.f32 %v13396_v38, %v9287_v6 }
 0xfb2   :  { %11209 = vmatprep.subr.mxu0 %v13582_v20  ;;  %11243 = vmatpush3.msra.mxu1 %v13238_v3  ;;  %v13403_v3 = vsub.f32 %v9778_v11, %v13392_v30 }
 0xfb3   :  { %11210 = vmatpush3.msra.mxu0 %v13249_v23  ;;  %11244 = vmatprep.subr.mxu1 %v13582_v20 }
 0xfb4   :  { %11211 = vmatprep.subr.mxu0 %v13582_v20  ;;  %11213 = vmatprep.mubr.msk.f32.mxu0 %vm11700_vm4, %v13582_v20  ;;  %v9294_v13 = vand.u32 4294901760, %v13403_v3 }
 0xfb5   :  { %11212 = vmatpush3.msra.mxu0 %v13253_v26  ;;  %11245 = vmatpush3.msra.mxu1 %v13240_v10  ;;  %v9282_v10 = vand.u32 4294901760, %v9281_v50  ;;  %v9289_v26 = vand.u32 4294901760, %v9288_v22 }
 0xfb6   :  { %11246 = vmatprep.mubr.msk.f32.mxu1 %vm11700_vm4, %v13582_v20  ;;  %11214 = vmatmul.mubr.f32.vlgmr.msra.gmra.mxu0 %v8721_v24  ;;  %v9295_v23 = vsub.f32 %v13403_v3, %v9294_v13 }
 0xfb7   :  { %11227 = vmatprep.subr.mxu0 %v13582_v20  ;;  %11247 = vmatmul.mubr.f32.vlgmr.msra.gmra.mxu1 %v8720_v1 }
 0xfb8   :  { %11228 = vmatpush3.msra.mxu0 %v8757_v35  ;;  %11235 = vmatprep.mubr.msk.f32.mxu0 %vm11700_vm4, %v13582_v20  ;;  %v9296_v35 = vand.u32 4294901760, %v9295_v23 }
 0xfb9   :  { %11229 = vmatprep.subr.mxu0 %v13582_v20  ;;  %11264 = vmatprep.subr.mxu1 %v13582_v20 }
 0xfba   :  { %11230 = vmatpush3.msra.mxu0 %v8764_v48  ;;  %11276 = vmatprep.mubr.msk.f32.mxu1 %vm11700_vm4, %v13582_v20 }
 0xfbb   :  { %11231 = vmatprep.subr.mxu0 %v13582_v20  ;;  %11265 = vmatpush3.msra.mxu1 %v9261_v62 }
 0xfbc   :  { %11232 = vmatpush3.msra.mxu0 %v8771_v40  ;;  %11266 = vmatprep.subr.mxu1 %v13582_v20 }
 0xfbd   :  { %11233 = vmatprep.subr.mxu0 %v13582_v20  ;;  %11267 = vmatpush3.msra.mxu1 %v9268_v58 }
 0xfbe   :  { %11234 = vmatpush3.msra.mxu0 %v8778_v21  ;;  %11268 = vmatprep.subr.mxu1 %v13582_v20 }
 0xfbf   :  { %11236 = vmatmul.mubr.f32.vlgmr.msra.gmra.mxu0 %v8720_v1  ;;  %11249 = vmatprep.subr.mxu0 %v13582_v20 }
 0xfc0   :  { %11261 = vmatprep.mubr.msk.f32.mxu0 %vm11700_vm4, %v13582_v20  ;;  %11250 = vmatpush3.msra.mxu0 %v13334_v37 }
 0xfc1   :  { %11251 = vmatprep.subr.mxu0 %v13582_v20  ;;  %11269 = vmatpush3.msra.mxu1 %v9275_v57 }
 0xfc2   :  { %11252 = vmatpush3.msra.mxu0 %v13342_v25  ;;  %11270 = vmatprep.subr.mxu1 %v13582_v20 }
 0xfc3   :  { %11253 = vmatprep.subr.mxu0 %v13582_v20  ;;  %11271 = vmatpush3.msra.mxu1 %v9282_v10  ;;  %v9788_v10 = vld [vmem:[%s13525_s22 + $0x1] ss:$0 sm:$0xff] }
 0xfc4   :  { %11254 = vmatpush3.msra.mxu0 %v13353_v59  ;;  %11272 = vmatprep.subr.mxu1 %v13582_v20 }
 0xfc5   :  { %11255 = vmatprep.subr.mxu0 %v13582_v20  ;;  %11273 = vmatpush3.msra.mxu1 %v9289_v26 }
 0xfc6   :  { %11256 = vmatpush3.msra.mxu0 %v13367_v18  ;;  %11274 = vmatprep.subr.mxu1 %v13582_v20 }
 0xfc7   :  { %11257 = vmatprep.subr.mxu0 %v13582_v20  ;;  %11275 = vmatpush3.msra.mxu1 %v9296_v35 }
 0xfc8   :  { %11258 = vmatpush3.msra.mxu0 %v13382_v56  ;;  %11294 = vmatprep.subr.mxu1 %v13582_v20 }
 0xfc9   :  { %11259 = vmatprep.subr.mxu0 %v13582_v20 }
 0xfca   :  { %11260 = vmatpush3.msra.mxu0 %v13392_v30 }
 0xfcb   :  { %11279 = vmatprep.subr.mxu0 %v13582_v20 }
0x1065   :  { %v8817_v48 = vpop.f32.mrf.mxu1 }
0x1067   :  { %v11204_v40 = vpop.f32.mrf.mxu1 }
0x106d   :  { %v8974_v21 = vpop.f32.mrf.mxu1 }
0x106e   :  { %v8726_v9 = vpop.f32.mrf.mxu0 }
0x106f   :  { %v11226_v41 = vpop.f32.mrf.mxu1  ;;  %v8727_v14 = vadd.f32 %v9777_v28, %v8726_v9 }
0x1070   :  { %v11193_v2 = vpop.f32.mrf.mxu0 }
0x1071   :  { %v8818_v7 = vadd.f32 %v8817_v48, %v8727_v14 }
0x1076   :  { %v8897_v4 = vpop.f32.mrf.mxu0 }
0x1077   :  { %v9132_v47 = vpop.f32.mrf.mxu1  ;;  %v8898_v53 = vadd.f32 %v8897_v4, %v8818_v7  ;;  %v9789_v4 = vld [vmem:[%s13526_s23] ss:$0 sm:$0xff] }
0x1078   :  { %v11215_v44 = vpop.f32.mrf.mxu0 }
0x1079   :  { %v11248_v43 = vpop.f32.mrf.mxu1  ;;  %v8975_v54 = vadd.f32 %v8974_v21, %v8898_v53 }
0x107f   :  { %v9057_v5 = vpop.f32.mrf.mxu0 }
0x1080   :  { %v9058_v32 = vadd.f32 %v9057_v5, %v8975_v54 }
0x1081   :  { %v11237_v29 = vpop.f32.mrf.mxu0 }
0x1082   :  { %v9133_v36 = vadd.f32 %v9132_v47, %v9058_v32  ;;  %v9790_v47 = vld [vmem:[%s13527_s24] ss:$0 sm:$0xff] }
0x1084   :  { %v9136_v60 = vmax.f32 %v9133_v36, 0.0 }
0x1086   :  { %v9153_v39 = vsel %vm4930_vm9, %v9136_v60, 0 }
0x1087   :  { %v9226_v1 = vand.u32 4294901760, %v9153_v39 }
0x1089   :  { %v9227_v24 = vsub.f32 %v9153_v39, %v9226_v1  ;;  %11277 = vmatmul.mubr.f32.vlgmr.msra.gmra.mxu1 %v9226_v1 }
0x108a   :  { %11295 = vmatpush3.msra.mxu1 %v13334_v37  ;;  %11306 = vmatprep.mubr.msk.f32.mxu1 %vm11700_vm4, %v13582_v20 }
0x108b   :  { %11296 = vmatprep.subr.mxu1 %v13582_v20  ;;  %v9228_v42 = vand.u32 4294901760, %v9227_v24 }
0x108c   :  { %11297 = vmatpush3.msra.mxu1 %v13342_v25 }
0x108d   :  { %11298 = vmatprep.subr.mxu1 %v13582_v20  ;;  %v9229_v8 = vsub.f32 %v9227_v24, %v9228_v42 }
0x108e   :  { %11299 = vmatpush3.msra.mxu1 %v13353_v59 }
0x108f   :  { %11300 = vmatprep.subr.mxu1 %v13582_v20  ;;  %v9230_v27 = vand.u32 4294901760, %v9229_v8 }
0x1090   :  { %11301 = vmatpush3.msra.mxu1 %v13367_v18 }
0x1091   :  { %11302 = vmatprep.subr.mxu1 %v13582_v20  ;;  %11262 = vmatmul.mubr.f32.vlgmr.msra.gmra.mxu0 %v9230_v27 }
0x1092   :  { %11280 = vmatpush3.msra.mxu0 %v13340_v46  ;;  %11303 = vmatpush3.msra.mxu1 %v13382_v56 }
0x1093   :  { %11281 = vmatprep.subr.mxu0 %v13582_v20  ;;  %11304 = vmatprep.subr.mxu1 %v13582_v20 }
0x1094   :  { %11282 = vmatpush3.msra.mxu0 %v13351_v61  ;;  %11305 = vmatpush3.msra.mxu1 %v13392_v30 }
0x1095   :  { %11283 = vmatprep.subr.mxu0 %v13582_v20  ;;  %11307 = vmatmul.mubr.f32.vlgmr.msra.gmra.mxu1 %v9228_v42 }
0x1096   :  { %11324 = vmatprep.subr.mxu1 %v13582_v20  ;;  %11284 = vmatpush3.msra.mxu0 %v13365_v52 }
0x1097   :  { %11325 = vmatpush3.msra.mxu1 %v13334_v37  ;;  %11285 = vmatprep.subr.mxu0 %v13582_v20 }
0x1098   :  { %11326 = vmatprep.subr.mxu1 %v13582_v20  ;;  %11286 = vmatpush3.msra.mxu0 %v13379_v55 }
0x1099   :  { %11327 = vmatpush3.msra.mxu1 %v13342_v25  ;;  %11287 = vmatprep.subr.mxu0 %v13582_v20 }
0x109a   :  { %11328 = vmatprep.subr.mxu1 %v13582_v20  ;;  %11288 = vmatpush3.msra.mxu0 %v13396_v38 }
0x109b   :  { %11329 = vmatpush3.msra.mxu1 %v13353_v59  ;;  %11289 = vmatprep.subr.mxu0 %v13582_v20 }
0x109c   :  { %11330 = vmatprep.subr.mxu1 %v13582_v20  ;;  %11290 = vmatpush3.msra.mxu0 %v13403_v3  ;;  %v9787_v3 = vld [vmem:[#allocation22 + $0x1] ss:$0 sm:$0xff] }
0x109d   :  { %11291 = vmatprep.mubr.msk.f32.mxu0 %vm11700_vm4, %v13582_v20  ;;  %11331 = vmatpush3.msra.mxu1 %v13367_v18 }
0x109e   :  { %11292 = vmatmul.mubr.f32.vlgmr.msra.gmra.mxu0 %v9227_v24  ;;  %11309 = vmatprep.subr.mxu0 %v13582_v20 }
0x109f   :  { %11332 = vmatprep.subr.mxu1 %v13582_v20  ;;  %11310 = vmatpush3.msra.mxu0 %v9259_v31  ;;  %v9785_v31 = vld [vmem:[%s13523_s20 + $0x1] ss:$0 sm:$0xff] }
0x10a0   :  { %11333 = vmatpush3.msra.mxu1 %v13382_v56  ;;  %11311 = vmatprep.subr.mxu0 %v13582_v20 }
0x10a1   :  { %11334 = vmatprep.subr.mxu1 %v13582_v20  ;;  %11312 = vmatpush3.msra.mxu0 %v9266_v63 }
0x10a2   :  { %11335 = vmatpush3.msra.mxu1 %v13392_v30  ;;  %11336 = vmatprep.mubr.msk.f32.mxu1 %vm11700_vm4, %v13582_v20 }
0x10a3   :  { %11313 = vmatprep.subr.mxu0 %v13582_v20  ;;  %11337 = vmatmul.mubr.f32.vlgmr.msra.gmra.mxu1 %v9226_v1 }
0x10a4   :  { %11314 = vmatpush3.msra.mxu0 %v9273_v49  ;;  %11321 = vmatprep.mubr.msk.f32.mxu0 %vm11700_vm4, %v13582_v20 }
0x10a5   :  { %11315 = vmatprep.subr.mxu0 %v13582_v20 }
0x10a6   :  { %11316 = vmatpush3.msra.mxu0 %v9280_v19 }
0x10a7   :  { %11317 = vmatprep.subr.mxu0 %v13582_v20 }
0x10a8   :  { %11318 = vmatpush3.msra.mxu0 %v9287_v6 }
0x10a9   :  { %11319 = vmatprep.subr.mxu0 %v13582_v20 }
0x10aa   :  { %11320 = vmatpush3.msra.mxu0 %v9294_v13 }
0x10ab   :  { %11322 = vmatmul.mubr.f32.vlgmr.msra.gmra.mxu0 %v9226_v1 }
0x1149   :  { %v9333_v33 = vpop.f32.mrf.mxu1 }
0x114b   :  { %v11278_v37 = vpop.f32.mrf.mxu1 }
0x1151   :  { %v9232_v45 = vpop.f32.mrf.mxu0 }
0x1152   :  { %v9233_v59 = vadd.f32 %v9785_v31, %v9232_v45 }
0x1153   :  { %v11263_v46 = vpop.f32.mrf.mxu0 }
0x1154   :  { %v9334_v63 = vadd.f32 %v9333_v33, %v9233_v59 }
0x1155   :  { %v9496_v25 = vpop.f32.mrf.mxu1 }
0x1157   :  { %v11308_v0 = vpop.f32.mrf.mxu1 }
0x115e   :  { %v9417_v61 = vpop.f32.mrf.mxu0 }
0x115f   :  { %v9418_v52 = vadd.f32 %v9417_v61, %v9334_v63 }
0x1160   :  { %v11293_v15 = vpop.f32.mrf.mxu0 }
0x1161   :  { %v9497_v18 = vadd.f32 %v9496_v25, %v9418_v52 }
0x1163   :  { %v9662_v34 = vpop.f32.mrf.mxu1 }
0x1165   :  { %v11338_v20 = vpop.f32.mrf.mxu1 }
0x116b   :  { %v9585_v51 = vpop.f32.mrf.mxu0 }
0x116c   :  { %v9586_v62 = vadd.f32 %v9585_v51, %v9497_v18 }
0x116d   :  { %v11323_v12 = vpop.f32.mrf.mxu0 }
0x116e   :  { %v9663_v49 = vadd.f32 %v9662_v34, %v9586_v62 }
0x1170   :  { %v9670_v55 = vsel %vm4388_vm8, %v9663_v49, 0.0 }
0x1171   :  { %9671 = vadd.xlane.f32.xlu0 %v9670_v55 }
0x11fa   :  { %v9672_v56 = vpop.xlane.xlu0 %9671 }
0x11fb   :  { %v9673_v11 = vmul.f32 0.03125, %v9672_v56 }
0x11fd   :  { %v9674_v58 = vsub.f32 %v9663_v49, %v9673_v11 }
0x11ff   :  { %v9675_v16 = vmul.f32 %v9674_v58, %v9674_v58 }
0x1201   :  { %v9676_v19 = vsel %vm4388_vm8, %v9675_v16, 0.0 }
0x1202   :  { %9677 = vadd.xlane.f32.xlu1 %v9676_v19 }
0x128b   :  { %v9678_v30 = vpop.xlane.xlu1 %9677 }
0x128c   :  { %v9679_v38 = vmul.f32 0.03125, %v9678_v30 }
0x128e   :  { %v9680_v57 = vadd.f32 1e-05, %v9679_v38 }
0x1290   :  { %11381 = vrsqrt.f32 %v9680_v57 }
0x129d   :  { %v11382_v50 = vpop.eup %11381 }
0x129e   :  { %v9682_v6 = vmul.f32 %v11382_v50, %v9674_v58 }
0x12a0   :  { %v9689_v13 = vmul.f32 %v9787_v3, %v9682_v6 }
0x12a2   :  { %v9696_v22 = vadd.f32 %v9788_v10, %v9689_v13 }
0x12a4   :  { %v9697_v23 = vadd.f32 %v9696_v22, %v12869_v17 }
0x12a6   :  { %v9700_v26 = vsel %vm4388_vm8, %v9697_v23, 0.0 }
0x12a7   :  { %9701 = vadd.xlane.f32.xlu0 %v9700_v26 }
0x1330   :  { %v9702_v35 = vpop.xlane.xlu0 %9701 }
0x1331   :  { %v9703_v48 = vmul.f32 0.03125, %v9702_v35 }
0x1333   :  { %v9704_v40 = vsub.f32 %v9697_v23, %v9703_v48 }
0x1335   :  { %v9705_v21 = vmul.f32 %v9704_v40, %v9704_v40 }
0x1337   :  { %v9706_v9 = vsel %vm4388_vm8, %v9705_v21, 0.0 }
0x1338   :  { %9707 = vadd.xlane.f32.xlu1 %v9706_v9 }
0x13c1   :  { %v9708_v41 = vpop.xlane.xlu1 %9707 }
0x13c2   :  { %v9709_v2 = vmul.f32 0.03125, %v9708_v41 }
0x13c4   :  { %v9710_v28 = vadd.f32 1e-05, %v9709_v2 }
0x13c6   :  { %11383 = vrsqrt.f32 %v9710_v28 }
0x13d3   :  { %v11384_v14 = vpop.eup %11383 }
0x13d4   :  { %v9712_v17 = vmul.f32 %v11384_v14, %v9704_v40 }
0x13d6   :  { %v9719_v7 = vmul.f32 %v9789_v4, %v9712_v17 }
0x13d8   :  { %v9726_v44 = vadd.f32 %v9790_v47, %v9719_v7 }
0x13da   :  { %9727 = vst.msk [vmem:[#allocation23] sm:$0x3] %vm4388_vm8, %v9726_v44 }
0x13db   :  { %11657 = shalt.err (!%p11654_p13)
}
0x13dc   :  { %9737 = dma.vmem_to_hbm [thread:$0]  %s9735_s18, 32, %s13528_s25, [#allocation4]  }
0x13dd   :  { %11680 = dma.done.wait [#allocation4], 32  }
0x13de   :  { %11681 = vsyncadd [#allocation4], 4294967264 }
0x13df   :  { %9741 = vsyncpa [#allocation3], 1 }
0x13e0   :  { %9742 = vsyncpa [#allocation6], 1 }
0x13e1   :  { %9743 = vsyncpa [#allocation9], 1 }
0x13e2   :  { %9744 = vsyncpa [#allocation12], 1 }
0x13e3   :  { %9745 = vsyncpa [#allocation15], 1 }
0x13e4   :  { %9746 = vsyncpa [#allocation18], 1 }
0x13e5   :  { %9747 = vsyncpa [#allocation21], 1 }
0x13e6   :  { %9748 = vsyncpa [#allocation4], 1 }

</bundles_post_ra>
